<compile_context>
chip_gen: v7x
topology: tpu7x:2x2x1
jax: 0.10.0
libtpu: 0.0.40
codegen_flags: <defaults>
</compile_context>

<pallas_src>
import functools
import math

import jax
import jax.numpy as jnp
from jax.experimental import pallas as pl
from jax.experimental.pallas import tpu as pltpu


def _round_up(x, m):
    return ((x + m - 1) // m) * m


def _pad_rows(x2d, tm):
    M, _ = x2d.shape
    Mp = _round_up(M, tm)
    if Mp != M:
        x2d = jnp.pad(x2d, ((0, Mp - M), (0, 0)))
    return x2d, Mp


# ---------------------------------------------------------------------------
# BatchNorm (training-mode batch statistics) + ReLU for the bn1 path.
# Lane-dense: C == 64 slabs are repacked to 128 lanes (free reshape).
# ---------------------------------------------------------------------------

def _bn_stats_kernel(x_ref, sum_ref, sq_ref):
    # Per-tile partial per-channel sum / sum-of-squares, each written with a single
    # full-block store (no masked sub-row stores, no resident accumulator needed).
    x = x_ref[...].astype(jnp.float32)
    sum_ref[0] = jnp.sum(x, axis=0, keepdims=True)
    sq_ref[0] = jnp.sum(x * x, axis=0, keepdims=True)


def _bn_apply_relu_kernel(x_ref, mean_ref, scale_ref, beta_ref, o_ref):
    x = x_ref[...].astype(jnp.float32)
    y = (x - mean_ref[...]) * scale_ref[...] + beta_ref[...]
    o_ref[...] = jnp.maximum(y, 0.0).astype(o_ref.dtype)


def batchnorm_relu(x2d, gamma, beta, eps=1e-5, out_dtype=jnp.bfloat16, tile_m=1024):
    """relu((x - mean(x)) * rsqrt(var(x) + eps) * gamma + beta) over an (M, C) slab."""
    M, C = x2d.shape
    # Lane-pack C == 64 -> 128 lanes (pure reshape, no data movement): channel c of
    # even rows lands in lane c, of odd rows in lane c + 64.
    pack = 2 if (C == 64 and M % 2 == 0) else 1
    xp = x2d.reshape(M // pack, C * pack)
    Mr, Cp = xp.shape
    tm = min(tile_m, _round_up(Mr, 8))
    xpad, Mpad = _pad_rows(xp, tm)          # zero rows do not change the sums
    G = Mpad // tm

    psum, psq = pl.pallas_call(
        _bn_stats_kernel,
        out_shape=(jax.ShapeDtypeStruct((G, 1, Cp), jnp.float32),
                   jax.ShapeDtypeStruct((G, 1, Cp), jnp.float32)),
        grid=(G,),
        in_specs=[pl.BlockSpec((tm, Cp), lambda i: (i, 0))],
        out_specs=(pl.BlockSpec((1, 1, Cp), lambda i: (i, 0, 0)),
                   pl.BlockSpec((1, 1, Cp), lambda i: (i, 0, 0))),
        compiler_params=pltpu.CompilerParams(dimension_semantics=("parallel",)),
    )(xpad)

    s1 = psum.sum(axis=(0, 1))
    s2 = psq.sum(axis=(0, 1))
    if pack == 2:
        s1 = s1[:C] + s1[C:]
        s2 = s2[:C] + s2[C:]
    mean = s1 / M
    var = s2 / M - mean * mean              # biased variance (PyTorch training mode)
    scale = gamma * jax.lax.rsqrt(var + eps)

    mean_l = jnp.tile(mean, pack).reshape(1, Cp)
    scale_l = jnp.tile(scale, pack).reshape(1, Cp)
    beta_l = jnp.tile(beta, pack).reshape(1, Cp)

    y = pl.pallas_call(
        _bn_apply_relu_kernel,
        out_shape=jax.ShapeDtypeStruct((Mpad, Cp), out_dtype),
        grid=(G,),
        in_specs=[pl.BlockSpec((tm, Cp), lambda i: (i, 0)),
                  pl.BlockSpec((1, Cp), lambda i: (0, 0)),
                  pl.BlockSpec((1, Cp), lambda i: (0, 0)),
                  pl.BlockSpec((1, Cp), lambda i: (0, 0))],
        out_specs=pl.BlockSpec((tm, Cp), lambda i: (i, 0)),
        compiler_params=pltpu.CompilerParams(dimension_semantics=("parallel",)),
    )(xpad, mean_l, scale_l, beta_l)
    return y[:Mr].reshape(M, C)


# ---------------------------------------------------------------------------
# conv1: 3x3 / stride s / pad 1 on the phase-decomposed bf16 input, bf16 output,
# with the bn2 per-channel sum / sumsq fused into the epilogue.
# ---------------------------------------------------------------------------

def _phase_decompose(x, kh, kw, stride, pad, oh, ow):
    """(N,H,W,C) -> (s*s, N, phr, phc, C): phase planes of the zero-padded input.

    Phase (p,q) plane at [y,x] equals xpad[s*y+p, s*x+q], so tap (i,j) reads a
    *contiguous* (oh,ow) window at offset (i//s, j//s) of phase (i%s, j%s).  Total
    bytes equal the input — no 9x im2col expansion in HBM.  Phase-major layout so
    several images can be folded into one MXU matmul.
    """
    n, h, w, c = x.shape
    s = stride
    phr = (kh - 1) // s + oh
    phc = (kw - 1) // s + ow
    pad_b, pad_r = s * phr - h - pad, s * phc - w - pad
    assert pad_b >= 0 and pad_r >= 0
    xp = jnp.pad(x, ((0, 0), (pad, pad_b), (pad, pad_r), (0, 0)))
    xp = xp.reshape(n, phr, s, phc, s, c)
    xp = jnp.transpose(xp, (2, 4, 0, 1, 3, 5))          # (p, q, n, phr, phc, c)
    return xp.reshape(s * s, n, phr, phc, c), phr, phc


def _conv_bn_stats_kernel(xph_ref, w_ref, o_ref, sum_ref, sq_ref, *,
                          kh, kw, stride, oh, ow):
    s = stride
    ipb = xph_ref.shape[1]
    cin = xph_ref.shape[-1]
    cout = w_ref.shape[-1]
    m = ipb * oh * ow
    acc = None
    for t in range(kh * kw):                            # static, fully unrolled taps
        i, j = divmod(t, kw)
        ph = (i % s) * s + (j % s)
        di, dj = i // s, j // s
        patch = xph_ref[ph, :, di:di + oh, dj:dj + ow, :].reshape(m, cin)
        d = jnp.dot(patch, w_ref[t], preferred_element_type=jnp.float32)
        acc = d if acc is None else acc + d
    o_ref[...] = acc.reshape(ipb, oh, ow, cout).astype(o_ref.dtype)
    # Fused bn2 partial statistics (from the f32 accumulator, before the bf16 cast):
    # full-block stores, no separate stats pass over o1 later.
    sum_ref[0] = jnp.sum(acc, axis=0, keepdims=True)
    sq_ref[0] = jnp.sum(acc * acc, axis=0, keepdims=True)


def conv3x3_bn_stats(x, w, stride, images_per_block=1):
    n, h, wd, cin = x.shape
    kh, kw, _, cout = w.shape
    s = stride
    oh = (h + 2 - kh) // s + 1
    ow = (wd + 2 - kw) // s + 1
    ipb = max(1, images_per_block)
    while n % ipb:
        ipb -= 1
    g = n // ipb

    xph, phr, phc = _phase_decompose(x.astype(jnp.bfloat16), kh, kw, s, 1, oh, ow)
    wmat = w.reshape(kh * kw, cin, cout).astype(jnp.bfloat16)

    o1, psum, psq = pl.pallas_call(
        functools.partial(_conv_bn_stats_kernel, kh=kh, kw=kw, stride=s, oh=oh, ow=ow),
        out_shape=(jax.ShapeDtypeStruct((n, oh, ow, cout), jnp.bfloat16),
                   jax.ShapeDtypeStruct((g, 1, cout), jnp.float32),
                   jax.ShapeDtypeStruct((g, 1, cout), jnp.float32)),
        grid=(g,),
        in_specs=[pl.BlockSpec((s * s, ipb, phr, phc, cin),
                               lambda i: (0, i, 0, 0, 0)),
                  pl.BlockSpec((kh * kw, cin, cout), lambda i: (0, 0, 0))],
        out_specs=(pl.BlockSpec((ipb, oh, ow, cout), lambda i: (i, 0, 0, 0)),
                   pl.BlockSpec((1, 1, cout), lambda i: (i, 0, 0)),
                   pl.BlockSpec((1, 1, cout), lambda i: (i, 0, 0))),
        compiler_params=pltpu.CompilerParams(dimension_semantics=("parallel",)),
    )(xph, wmat)
    return o1, psum.sum(axis=(0, 1)), psq.sum(axis=(0, 1))


# ---------------------------------------------------------------------------
# conv2: fused [bn2 apply + ReLU] -> 3x3 stride-1 conv -> [+ shortcut] kernel.
# The shortcut is either a fused 1x1 conv (only phase-(0,0) samples of its input,
# no 4x over-fetch) or the identity residual.
# ---------------------------------------------------------------------------

def _conv2_bn_res_kernel(o1_ref, mean_ref, scale_ref, beta_ref, w_ref, *rest,
                         oh, ow, conv_shortcut):
    if conv_shortcut:
        xs_ref, wsc_ref, out_ref, hpad = rest
    else:
        res_ref, out_ref, hpad = rest
    ipb = o1_ref.shape[0]
    c = o1_ref.shape[-1]
    cout = w_ref.shape[-1]
    m = ipb * oh * ow

    # bn2 apply + ReLU on the raw bf16 conv1 output; result goes into a zero-padded
    # f32 VMEM scratch so the conv's zero padding is handled in-kernel (no wrapper
    # pad pass, h2 never hits HBM).
    mean = mean_ref[...].reshape(1, 1, 1, c)
    scale = scale_ref[...].reshape(1, 1, 1, c)
    beta = beta_ref[...].reshape(1, 1, 1, c)
    h2 = jnp.maximum((o1_ref[...].astype(jnp.float32) - mean) * scale + beta, 0.0)
    hpad[...] = jnp.zeros_like(hpad)
    hpad[:, 1:1 + oh, 1:1 + ow, :] = h2

    acc = None
    for t in range(9):                                  # static, fully unrolled taps
        i, j = divmod(t, 3)
        patch = hpad[:, i:i + oh, j:j + ow, :].reshape(m, c).astype(jnp.bfloat16)
        d = jnp.dot(patch, w_ref[t], preferred_element_type=jnp.float32)
        acc = d if acc is None else acc + d

    # Residual branch fused into the epilogue.
    if conv_shortcut:
        xs = xs_ref[...].reshape(m, xs_ref.shape[-1])
        acc = acc + jnp.dot(xs, wsc_ref[...], preferred_element_type=jnp.float32)
    else:
        acc = acc + res_ref[...].astype(jnp.float32).reshape(m, cout)

    out_ref[...] = acc.reshape(ipb, oh, ow, cout).astype(out_ref.dtype)


def conv3x3_bn_relu_residual(o1, w2, mean, scale, beta, shortcut, images_per_block=1):
    n, oh, ow, c = o1.shape
    cout = w2.shape[-1]
    ipb = max(1, images_per_block)
    while n % ipb:
        ipb -= 1
    g = n // ipb
    w2m = w2.reshape(9, c, cout).astype(jnp.bfloat16)
    conv_shortcut = shortcut[0] == "conv"

    in_specs = [
        pl.BlockSpec((ipb, oh, ow, c), lambda i: (i, 0, 0, 0)),
        pl.BlockSpec((1, c), lambda i: (0, 0)),
        pl.BlockSpec((1, c), lambda i: (0, 0)),
        pl.BlockSpec((1, c), lambda i: (0, 0)),
        pl.BlockSpec((9, c, cout), lambda i: (0, 0, 0)),
    ]
    args = [o1, mean.reshape(1, c), scale.reshape(1, c), beta.reshape(1, c), w2m]
    if conv_shortcut:
        xs, wsc = shortcut[1], shortcut[2]
        cin_sc = xs.shape[-1]
        in_specs += [pl.BlockSpec((ipb, oh, ow, cin_sc), lambda i: (i, 0, 0, 0)),
                     pl.BlockSpec((cin_sc, cout), lambda i: (0, 0))]
        args += [xs, wsc]
    else:
        in_specs += [pl.BlockSpec((ipb, oh, ow, cout), lambda i: (i, 0, 0, 0))]
        args += [shortcut[1]]

    return pl.pallas_call(
        functools.partial(_conv2_bn_res_kernel, oh=oh, ow=ow,
                          conv_shortcut=conv_shortcut),
        out_shape=jax.ShapeDtypeStruct((n, oh, ow, cout), jnp.float32),
        grid=(g,),
        in_specs=in_specs,
        out_specs=pl.BlockSpec((ipb, oh, ow, cout), lambda i: (i, 0, 0, 0)),
        scratch_shapes=[pltpu.VMEM((ipb, oh + 2, ow + 2, c), jnp.float32)],
        compiler_params=pltpu.CompilerParams(dimension_semantics=("parallel",)),
    )(*args)


# ---------------------------------------------------------------------------
# PreActBlock forward (NCHW in / NCHW out, matching the PyTorch module)
# ---------------------------------------------------------------------------

def preact_block_forward(x_nchw, params, *, stride, out_shortcut=False,
                         images_per_block=None):
    x = jnp.transpose(x_nchw, (0, 2, 3, 1)).astype(jnp.float32)      # NHWC internally
    n, h, w, cin = x.shape
    planes = params["conv1_w"].shape[-1]

    if images_per_block is None:
        oh_ = (h - 1) // stride + 1
        ow_ = (w - 1) // stride + 1
        # Fill the MXU M dimension (aim >= 128 rows) without dropping the conv grid
        # below 2 steps (keeps some pipelining / megacore work when the batch allows).
        images_per_block = max(1, min(n // 2 if n >= 2 else 1,
                                      -(-128 // (oh_ * ow_))))

    # bn1 + ReLU (training-mode batch stats), lane-dense Pallas kernels, bf16 output.
    x2d = x.reshape(-1, cin)
    h1 = batchnorm_relu(x2d, params["bn1_g"], params["bn1_b"]).reshape(n, h, w, cin)

    # conv1 (3x3, stride, pad 1) with bn2 statistics fused into its epilogue.
    o1, s2, q2 = conv3x3_bn_stats(h1, params["conv1_w"], stride, images_per_block)
    cnt2 = o1.shape[0] * o1.shape[1] * o1.shape[2]
    mean2 = s2 / cnt2
    var2 = q2 / cnt2 - mean2 * mean2          # biased variance (training-mode BN)
    scale2 = params["bn2_g"] * jax.lax.rsqrt(var2 + 1e-5)

    # Shortcut branch: the 1x1 stride-s conv only ever reads phase (0,0) samples,
    # so feed exactly those (fixes the 4x over-fetch) and fuse the matmul into conv2.
    if "sc_w" in params:
        sc_src = h1 if out_shortcut else x.astype(jnp.bfloat16)
        xs = sc_src[:, ::stride, ::stride, :]
        wsc = params["sc_w"].reshape(cin, planes).astype(jnp.bfloat16)
        shortcut = ("conv", xs, wsc)
    else:
        shortcut = ("identity", x)            # stride == 1 and cin == planes

    # conv2 (3x3, stride 1, pad 1) fused with bn2 apply+ReLU and the residual add.
    out = conv3x3_bn_relu_residual(o1, params["conv2_w"], mean2, scale2,
                                   params["bn2_b"], shortcut, images_per_block)
    return jnp.transpose(out, (0, 3, 1, 2))                          # back to NCHW


# ---------------------------------------------------------------------------
# Pure-JAX f32 reference (tolerance check) and demo
# ---------------------------------------------------------------------------

def _ref_bn_relu(x, g, b, eps=1e-5):
    mean = jnp.mean(x, axis=(0, 1, 2), keepdims=True)
    var = jnp.mean(jnp.square(x - mean), axis=(0, 1, 2), keepdims=True)
    return jax.nn.relu((x - mean) * jax.lax.rsqrt(var + eps) * g + b)


def _ref_conv(x, w, stride, pad):
    return jax.lax.conv_general_dilated(
        x, w, (stride, stride), [(pad, pad), (pad, pad)],
        dimension_numbers=("NHWC", "HWIO", "NHWC"),
        precision=jax.lax.Precision.HIGHEST)


def preact_block_reference(x_nchw, params, *, stride, out_shortcut=False):
    x = jnp.transpose(x_nchw, (0, 2, 3, 1)).astype(jnp.float32)
    h1 = _ref_bn_relu(x, params["bn1_g"], params["bn1_b"])
    if "sc_w" in params:
        sc = _ref_conv(h1 if out_shortcut else x, params["sc_w"], stride, 0)
    else:
        sc = x
    o1 = _ref_conv(h1, params["conv1_w"], stride, 1)
    h2 = _ref_bn_relu(o1, params["bn2_g"], params["bn2_b"])
    out = _ref_conv(h2, params["conv2_w"], 1, 1) + sc
    return jnp.transpose(out, (0, 3, 1, 2))


if __name__ == "__main__":
    def conv_init(k, kh, kw, cin, cout):
        std = math.sqrt(2.0 / (kh * kw * cin))
        return std * jax.random.normal(k, (kh, kw, cin, cout), jnp.float32)

    def make_params(key, in_planes, planes, stride):
        ks = jax.random.split(key, 7)
        p = {
            "bn1_g": 1.0 + 0.1 * jax.random.normal(ks[0], (in_planes,), jnp.float32),
            "bn1_b": 0.1 * jax.random.normal(ks[1], (in_planes,), jnp.float32),
            "conv1_w": conv_init(ks[2], 3, 3, in_planes, planes),
            "bn2_g": 1.0 + 0.1 * jax.random.normal(ks[3], (planes,), jnp.float32),
            "bn2_b": 0.1 * jax.random.normal(ks[4], (planes,), jnp.float32),
            "conv2_w": conv_init(ks[5], 3, 3, planes, planes),
        }
        if stride != 1 or in_planes != planes:          # mirrors the PyTorch condition
            p["sc_w"] = conv_init(ks[6], 1, 1, in_planes, planes)
        return p

    def run_case(key, in_planes, planes, stride, N, H, W, images_per_block=None):
        kp, kx = jax.random.split(key)
        params = make_params(kp, in_planes, planes, stride)
        x = jax.random.normal(kx, (N, in_planes, H, W), jnp.float32)
        fwd = jax.jit(functools.partial(preact_block_forward, stride=stride,
                                        out_shortcut=False,
                                        images_per_block=images_per_block))
        out = jax.block_until_ready(fwd(x, params))
        oh = (H - 1) // stride + 1
        assert out.shape == (N, planes, oh, oh), out.shape
        ref = preact_block_reference(x, params, stride=stride, out_shortcut=False)
        rel = float(jnp.max(jnp.abs(out - ref)) / (jnp.max(jnp.abs(ref)) + 1e-6))
        assert rel < 3e-2, f"relative error too large: {rel}"

    key = jax.random.PRNGKey(0)
    k1, k2 = jax.random.split(key)
    # Primary config: 64 -> 128 channels, stride 2 (1x1-conv shortcut fused into conv2;
    # lane-packed C=64 BN path).
    run_case(k1, 64, 128, 2, 2, 16, 16)
    # Identity-shortcut config: stride 1, in_planes == planes; also exercises folding
    # two images into one block (MXU M = 128 per tap matmul).
    run_case(k2, 128, 128, 1, 2, 8, 8, images_per_block=2)
    print("KERNEL_OK")
</pallas_src>

<mosaic_0001>
module attributes {stable_mosaic.version = 11 : i64} {
  func.func @_bn_stats_kernel(%arg0: i32, %arg1: memref<256x128xf32, #tpu.memory_space<vmem>>, %arg2: memref<1x1x128xf32, #tpu.memory_space<vmem>>, %arg3: memref<1x1x128xf32, #tpu.memory_space<vmem>>) attributes {dimension_semantics = [#tpu.dimension_semantics<parallel>], iteration_bounds = array<i64: 1>, scalar_prefetch = 0 : i64, scratch_operands = 0 : i64, tpu.core_type = #tpu.core_type<tc>, window_params = [{transform_indices = @transform_0, window_bounds = array<i64: 256, 128>}, {transform_indices = @transform_1, window_bounds = array<i64: 1, 1, 128>}, {transform_indices = @transform_2, window_bounds = array<i64: 1, 1, 128>}]} {
    %c0 = arith.constant 0 : index
    %c0_0 = arith.constant 0 : index
    %0 = vector.load %arg1[%c0, %c0_0] : memref<256x128xf32, #tpu.memory_space<vmem>>, vector<256x128xf32>
    %cst = arith.constant dense<0.000000e+00> : vector<128xf32>
    %1 = vector.multi_reduction <add>, %0, %cst [0] : vector<256x128xf32> to vector<128xf32>
    %2 = vector.shape_cast %1 : vector<128xf32> to vector<1x128xf32>
    %c0_1 = arith.constant 0 : index
    %c0_2 = arith.constant 0 : index
    %c0_3 = arith.constant 0 : index
    %3 = vector.load %arg2[%c0_1, %c0_2, %c0_3] : memref<1x1x128xf32, #tpu.memory_space<vmem>>, vector<1x1x128xf32>
    %4 = vector.shape_cast %3 : vector<1x1x128xf32> to vector<1x128xf32>
    %5 = vector.shape_cast %2 : vector<1x128xf32> to vector<1x1x128xf32>
    tpu.vector_store %arg2[%c0_1, %c0_2, %c0_3], %5 {strides = array<i32>} : memref<1x1x128xf32, #tpu.memory_space<vmem>>, vector<1x1x128xf32>,
    %6 = arith.mulf %0, %0 : vector<256x128xf32>
    %cst_4 = arith.constant dense<0.000000e+00> : vector<128xf32>
    %7 = vector.multi_reduction <add>, %6, %cst_4 [0] : vector<256x128xf32> to vector<128xf32>
    %8 = vector.shape_cast %7 : vector<128xf32> to vector<1x128xf32>
    %c0_5 = arith.constant 0 : index
    %c0_6 = arith.constant 0 : index
    %c0_7 = arith.constant 0 : index
    %9 = vector.load %arg3[%c0_5, %c0_6, %c0_7] : memref<1x1x128xf32, #tpu.memory_space<vmem>>, vector<1x1x128xf32>
    %10 = vector.shape_cast %9 : vector<1x1x128xf32> to vector<1x128xf32>
    %11 = vector.shape_cast %8 : vector<1x128xf32> to vector<1x1x128xf32>
    tpu.vector_store %arg3[%c0_5, %c0_6, %c0_7], %11 {strides = array<i32>} : memref<1x1x128xf32, #tpu.memory_space<vmem>>, vector<1x1x128xf32>,
    return
  }
  func.func @transform_0(%arg0: i32) -> (i32, i32) {
    %c0_i32 = arith.constant 0 : i32
    %c0_i32_0 = arith.constant 0 : i32
    return %arg0, %c0_i32 : i32, i32
  }
  func.func @transform_1(%arg0: i32) -> (i32, i32, i32) {
    %c0_i32 = arith.constant 0 : i32
    %c0_i32_0 = arith.constant 0 : i32
    %c0_i32_1 = arith.constant 0 : i32
    return %arg0, %c0_i32, %c0_i32_0 : i32, i32, i32
  }
  func.func @transform_2(%arg0: i32) -> (i32, i32, i32) {
    %c0_i32 = arith.constant 0 : i32
    %c0_i32_0 = arith.constant 0 : i32
    %c0_i32_1 = arith.constant 0 : i32
    return %arg0, %c0_i32, %c0_i32_0 : i32, i32, i32
  }
}

module attributes {stable_mosaic.version = 11 : i64} {
  func.func @_bn_apply_relu_kernel(%arg0: i32, %arg1: memref<256x128xf32, #tpu.memory_space<vmem>>, %arg2: memref<1x128xf32, #tpu.memory_space<vmem>>, %arg3: memref<1x128xf32, #tpu.memory_space<vmem>>, %arg4: memref<1x128xf32, #tpu.memory_space<vmem>>, %arg5: memref<256x128xbf16, #tpu.memory_space<vmem>>) attributes {dimension_semantics = [#tpu.dimension_semantics<parallel>], iteration_bounds = array<i64: 1>, scalar_prefetch = 0 : i64, scratch_operands = 0 : i64, tpu.core_type = #tpu.core_type<tc>, window_params = [{transform_indices = @transform_0, window_bounds = array<i64: 256, 128>}, {pipeline_mode = #tpu.pipeline_mode<synchronous>, transform_indices = @transform_1, window_bounds = array<i64: 1, 128>}, {pipeline_mode = #tpu.pipeline_mode<synchronous>, transform_indices = @transform_2, window_bounds = array<i64: 1, 128>}, {pipeline_mode = #tpu.pipeline_mode<synchronous>, transform_indices = @transform_3, window_bounds = array<i64: 1, 128>}, {transform_indices = @transform_4, window_bounds = array<i64: 256, 128>}]} {
    %c0 = arith.constant 0 : index
    %c0_0 = arith.constant 0 : index
    %0 = vector.load %arg1[%c0, %c0_0] : memref<256x128xf32, #tpu.memory_space<vmem>>, vector<256x128xf32>
    %c0_1 = arith.constant 0 : index
    %c0_2 = arith.constant 0 : index
    %1 = vector.load %arg2[%c0_1, %c0_2] : memref<1x128xf32, #tpu.memory_space<vmem>>, vector<1x128xf32>
    %2 = vector.broadcast %1 : vector<1x128xf32> to vector<256x128xf32>
    %3 = arith.subf %0, %2 : vector<256x128xf32>
    %c0_3 = arith.constant 0 : index
    %c0_4 = arith.constant 0 : index
    %4 = vector.load %arg3[%c0_3, %c0_4] : memref<1x128xf32, #tpu.memory_space<vmem>>, vector<1x128xf32>
    %5 = vector.broadcast %4 : vector<1x128xf32> to vector<256x128xf32>
    %6 = arith.mulf %3, %5 : vector<256x128xf32>
    %c0_5 = arith.constant 0 : index
    %c0_6 = arith.constant 0 : index
    %7 = vector.load %arg4[%c0_5, %c0_6] : memref<1x128xf32, #tpu.memory_space<vmem>>, vector<1x128xf32>
    %8 = vector.broadcast %7 : vector<1x128xf32> to vector<256x128xf32>
    %9 = arith.addf %6, %8 : vector<256x128xf32>
    %cst = arith.constant 0.000000e+00 : f32
    %10 = vector.broadcast %cst : f32 to vector<256x128xf32>
    %11 = arith.maximumf %9, %10 : vector<256x128xf32>
    %12 = arith.truncf %11 : vector<256x128xf32> to vector<256x128xbf16>
    %c0_7 = arith.constant 0 : index
    %c0_8 = arith.constant 0 : index
    %13 = vector.load %arg5[%c0_7, %c0_8] : memref<256x128xbf16, #tpu.memory_space<vmem>>, vector<256x128xbf16>
    tpu.vector_store %arg5[%c0_7, %c0_8], %12 {strides = array<i32>} : memref<256x128xbf16, #tpu.memory_space<vmem>>, vector<256x128xbf16>,
    return
  }
  func.func @transform_0(%arg0: i32) -> (i32, i32) {
    %c0_i32 = arith.constant 0 : i32
    %c0_i32_0 = arith.constant 0 : i32
    return %arg0, %c0_i32 : i32, i32
  }
  func.func @transform_1(%arg0: i32) -> (i32, i32) {
    %c0_i32 = arith.constant 0 : i32
    %c0_i32_0 = arith.constant 0 : i32
    %c0_i32_1 = arith.constant 0 : i32
    return %c0_i32, %c0_i32_0 : i32, i32
  }
  func.func @transform_2(%arg0: i32) -> (i32, i32) {
    %c0_i32 = arith.constant 0 : i32
    %c0_i32_0 = arith.constant 0 : i32
    %c0_i32_1 = arith.constant 0 : i32
    return %c0_i32, %c0_i32_0 : i32, i32
  }
  func.func @transform_3(%arg0: i32) -> (i32, i32) {
    %c0_i32 = arith.constant 0 : i32
    %c0_i32_0 = arith.constant 0 : i32
    %c0_i32_1 = arith.constant 0 : i32
    return %c0_i32, %c0_i32_0 : i32, i32
  }
  func.func @transform_4(%arg0: i32) -> (i32, i32) {
    %c0_i32 = arith.constant 0 : i32
    %c0_i32_0 = arith.constant 0 : i32
    return %arg0, %c0_i32 : i32, i32
  }
}

module attributes {stable_mosaic.version = 11 : i64} {
  func.func @_conv_bn_stats_kernel(%arg0: i32, %arg1: memref<4x1x9x9x64xbf16, #tpu.memory_space<vmem>>, %arg2: memref<9x64x128xbf16, #tpu.memory_space<vmem>>, %arg3: memref<1x8x8x128xbf16, #tpu.memory_space<vmem>>, %arg4: memref<1x1x128xf32, #tpu.memory_space<vmem>>, %arg5: memref<1x1x128xf32, #tpu.memory_space<vmem>>) attributes {dimension_semantics = [#tpu.dimension_semantics<parallel>], iteration_bounds = array<i64: 2>, scalar_prefetch = 0 : i64, scratch_operands = 0 : i64, tpu.core_type = #tpu.core_type<tc>, window_params = [{transform_indices = @transform_0, window_bounds = array<i64: 4, 1, 9, 9, 64>}, {pipeline_mode = #tpu.pipeline_mode<synchronous>, transform_indices = @transform_1, window_bounds = array<i64: 9, 64, 128>}, {transform_indices = @transform_2, window_bounds = array<i64: 1, 8, 8, 128>}, {transform_indices = @transform_3, window_bounds = array<i64: 1, 1, 128>}, {transform_indices = @transform_4, window_bounds = array<i64: 1, 1, 128>}]} {
    %c0 = arith.constant 0 : index
    %c0_0 = arith.constant 0 : index
    %c0_1 = arith.constant 0 : index
    %c0_2 = arith.constant 0 : index
    %c0_3 = arith.constant 0 : index
    %0 = vector.load %arg1[%c0, %c0_0, %c0_1, %c0_2, %c0_3] : memref<4x1x9x9x64xbf16, #tpu.memory_space<vmem>>, vector<1x1x8x8x64xbf16>
    %1 = vector.shape_cast %0 : vector<1x1x8x8x64xbf16> to vector<1x8x8x64xbf16>
    %2 = vector.shape_cast %1 : vector<1x8x8x64xbf16> to vector<64x64xbf16>
    %c0_4 = arith.constant 0 : index
    %c0_5 = arith.constant 0 : index
    %c0_6 = arith.constant 0 : index
    %3 = vector.load %arg2[%c0_4, %c0_5, %c0_6] : memref<9x64x128xbf16, #tpu.memory_space<vmem>>, vector<1x64x128xbf16>
    %4 = vector.shape_cast %3 : vector<1x64x128xbf16> to vector<64x128xbf16>
    %cst = arith.constant dense<0.000000e+00> : vector<64x128xf32>
    %5 = tpu.matmul %2, %4, %cst {dimension_numbers = #tpu.dot_dimension_numbers<[1], [0], [0], [1], [0, 0, 1, 1], [], []>} : vector<64x64xbf16>, vector<64x128xbf16>, vector<64x128xf32> -> vector<64x128xf32>
    %c1 = arith.constant 1 : index
    %c0_7 = arith.constant 0 : index
    %c0_8 = arith.constant 0 : index
    %c0_9 = arith.constant 0 : index
    %c0_10 = arith.constant 0 : index
    %6 = vector.load %arg1[%c1, %c0_7, %c0_8, %c0_9, %c0_10] : memref<4x1x9x9x64xbf16, #tpu.memory_space<vmem>>, vector<1x1x8x8x64xbf16>
    %7 = vector.shape_cast %6 : vector<1x1x8x8x64xbf16> to vector<1x8x8x64xbf16>
    %8 = vector.shape_cast %7 : vector<1x8x8x64xbf16> to vector<64x64xbf16>
    %c1_11 = arith.constant 1 : index
    %c0_12 = arith.constant 0 : index
    %c0_13 = arith.constant 0 : index
    %9 = vector.load %arg2[%c1_11, %c0_12, %c0_13] : memref<9x64x128xbf16, #tpu.memory_space<vmem>>, vector<1x64x128xbf16>
    %10 = vector.shape_cast %9 : vector<1x64x128xbf16> to vector<64x128xbf16>
    %cst_14 = arith.constant dense<0.000000e+00> : vector<64x128xf32>
    %11 = tpu.matmul %8, %10, %cst_14 {dimension_numbers = #tpu.dot_dimension_numbers<[1], [0], [0], [1], [0, 0, 1, 1], [], []>} : vector<64x64xbf16>, vector<64x128xbf16>, vector<64x128xf32> -> vector<64x128xf32>
    %12 = arith.addf %5, %11 : vector<64x128xf32>
    %c0_15 = arith.constant 0 : index
    %c0_16 = arith.constant 0 : index
    %c0_17 = arith.constant 0 : index
    %c1_18 = arith.constant 1 : index
    %c0_19 = arith.constant 0 : index
    %13 = vector.load %arg1[%c0_15, %c0_16, %c0_17, %c1_18, %c0_19] : memref<4x1x9x9x64xbf16, #tpu.memory_space<vmem>>, vector<1x1x8x8x64xbf16>
    %14 = vector.shape_cast %13 : vector<1x1x8x8x64xbf16> to vector<1x8x8x64xbf16>
    %15 = vector.shape_cast %14 : vector<1x8x8x64xbf16> to vector<64x64xbf16>
    %c2 = arith.constant 2 : index
    %c0_20 = arith.constant 0 : index
    %c0_21 = arith.constant 0 : index
    %16 = vector.load %arg2[%c2, %c0_20, %c0_21] : memref<9x64x128xbf16, #tpu.memory_space<vmem>>, vector<1x64x128xbf16>
    %17 = vector.shape_cast %16 : vector<1x64x128xbf16> to vector<64x128xbf16>
    %cst_22 = arith.constant dense<0.000000e+00> : vector<64x128xf32>
    %18 = tpu.matmul %15, %17, %cst_22 {dimension_numbers = #tpu.dot_dimension_numbers<[1], [0], [0], [1], [0, 0, 1, 1], [], []>} : vector<64x64xbf16>, vector<64x128xbf16>, vector<64x128xf32> -> vector<64x128xf32>
    %19 = arith.addf %12, %18 : vector<64x128xf32>
    %c2_23 = arith.constant 2 : index
    %c0_24 = arith.constant 0 : index
    %c0_25 = arith.constant 0 : index
    %c0_26 = arith.constant 0 : index
    %c0_27 = arith.constant 0 : index
    %20 = vector.load %arg1[%c2_23, %c0_24, %c0_25, %c0_26, %c0_27] : memref<4x1x9x9x64xbf16, #tpu.memory_space<vmem>>, vector<1x1x8x8x64xbf16>
    %21 = vector.shape_cast %20 : vector<1x1x8x8x64xbf16> to vector<1x8x8x64xbf16>
    %22 = vector.shape_cast %21 : vector<1x8x8x64xbf16> to vector<64x64xbf16>
    %c3 = arith.constant 3 : index
    %c0_28 = arith.constant 0 : index
    %c0_29 = arith.constant 0 : index
    %23 = vector.load %arg2[%c3, %c0_28, %c0_29] : memref<9x64x128xbf16, #tpu.memory_space<vmem>>, vector<1x64x128xbf16>
    %24 = vector.shape_cast %23 : vector<1x64x128xbf16> to vector<64x128xbf16>
    %cst_30 = arith.constant dense<0.000000e+00> : vector<64x128xf32>
    %25 = tpu.matmul %22, %24, %cst_30 {dimension_numbers = #tpu.dot_dimension_numbers<[1], [0], [0], [1], [0, 0, 1, 1], [], []>} : vector<64x64xbf16>, vector<64x128xbf16>, vector<64x128xf32> -> vector<64x128xf32>
    %26 = arith.addf %19, %25 : vector<64x128xf32>
    %c3_31 = arith.constant 3 : index
    %c0_32 = arith.constant 0 : index
    %c0_33 = arith.constant 0 : index
    %c0_34 = arith.constant 0 : index
    %c0_35 = arith.constant 0 : index
    %27 = vector.load %arg1[%c3_31, %c0_32, %c0_33, %c0_34, %c0_35] : memref<4x1x9x9x64xbf16, #tpu.memory_space<vmem>>, vector<1x1x8x8x64xbf16>
    %28 = vector.shape_cast %27 : vector<1x1x8x8x64xbf16> to vector<1x8x8x64xbf16>
    %29 = vector.shape_cast %28 : vector<1x8x8x64xbf16> to vector<64x64xbf16>
    %c4 = arith.constant 4 : index
    %c0_36 = arith.constant 0 : index
    %c0_37 = arith.constant 0 : index
    %30 = vector.load %arg2[%c4, %c0_36, %c0_37] : memref<9x64x128xbf16, #tpu.memory_space<vmem>>, vector<1x64x128xbf16>
    %31 = vector.shape_cast %30 : vector<1x64x128xbf16> to vector<64x128xbf16>
    %cst_38 = arith.constant dense<0.000000e+00> : vector<64x128xf32>
    %32 = tpu.matmul %29, %31, %cst_38 {dimension_numbers = #tpu.dot_dimension_numbers<[1], [0], [0], [1], [0, 0, 1, 1], [], []>} : vector<64x64xbf16>, vector<64x128xbf16>, vector<64x128xf32> -> vector<64x128xf32>
    %33 = arith.addf %26, %32 : vector<64x128xf32>
    %c2_39 = arith.constant 2 : index
    %c0_40 = arith.constant 0 : index
    %c0_41 = arith.constant 0 : index
    %c1_42 = arith.constant 1 : index
    %c0_43 = arith.constant 0 : index
    %34 = vector.load %arg1[%c2_39, %c0_40, %c0_41, %c1_42, %c0_43] : memref<4x1x9x9x64xbf16, #tpu.memory_space<vmem>>, vector<1x1x8x8x64xbf16>
    %35 = vector.shape_cast %34 : vector<1x1x8x8x64xbf16> to vector<1x8x8x64xbf16>
    %36 = vector.shape_cast %35 : vector<1x8x8x64xbf16> to vector<64x64xbf16>
    %c5 = arith.constant 5 : index
    %c0_44 = arith.constant 0 : index
    %c0_45 = arith.constant 0 : index
    %37 = vector.load %arg2[%c5, %c0_44, %c0_45] : memref<9x64x128xbf16, #tpu.memory_space<vmem>>, vector<1x64x128xbf16>
    %38 = vector.shape_cast %37 : vector<1x64x128xbf16> to vector<64x128xbf16>
    %cst_46 = arith.constant dense<0.000000e+00> : vector<64x128xf32>
    %39 = tpu.matmul %36, %38, %cst_46 {dimension_numbers = #tpu.dot_dimension_numbers<[1], [0], [0], [1], [0, 0, 1, 1], [], []>} : vector<64x64xbf16>, vector<64x128xbf16>, vector<64x128xf32> -> vector<64x128xf32>
    %40 = arith.addf %33, %39 : vector<64x128xf32>
    %c0_47 = arith.constant 0 : index
    %c0_48 = arith.constant 0 : index
    %c1_49 = arith.constant 1 : index
    %c0_50 = arith.constant 0 : index
    %c0_51 = arith.constant 0 : index
    %41 = vector.load %arg1[%c0_47, %c0_48, %c1_49, %c0_50, %c0_51] : memref<4x1x9x9x64xbf16, #tpu.memory_space<vmem>>, vector<1x1x8x8x64xbf16>
    %42 = vector.shape_cast %41 : vector<1x1x8x8x64xbf16> to vector<1x8x8x64xbf16>
    %43 = vector.shape_cast %42 : vector<1x8x8x64xbf16> to vector<64x64xbf16>
    %c6 = arith.constant 6 : index
    %c0_52 = arith.constant 0 : index
    %c0_53 = arith.constant 0 : index
    %44 = vector.load %arg2[%c6, %c0_52, %c0_53] : memref<9x64x128xbf16, #tpu.memory_space<vmem>>, vector<1x64x128xbf16>
    %45 = vector.shape_cast %44 : vector<1x64x128xbf16> to vector<64x128xbf16>
    %cst_54 = arith.constant dense<0.000000e+00> : vector<64x128xf32>
    %46 = tpu.matmul %43, %45, %cst_54 {dimension_numbers = #tpu.dot_dimension_numbers<[1], [0], [0], [1], [0, 0, 1, 1], [], []>} : vector<64x64xbf16>, vector<64x128xbf16>, vector<64x128xf32> -> vector<64x128xf32>
    %47 = arith.addf %40, %46 : vector<64x128xf32>
    %c1_55 = arith.constant 1 : index
    %c0_56 = arith.constant 0 : index
    %c1_57 = arith.constant 1 : index
    %c0_58 = arith.constant 0 : index
    %c0_59 = arith.constant 0 : index
    %48 = vector.load %arg1[%c1_55, %c0_56, %c1_57, %c0_58, %c0_59] : memref<4x1x9x9x64xbf16, #tpu.memory_space<vmem>>, vector<1x1x8x8x64xbf16>
    %49 = vector.shape_cast %48 : vector<1x1x8x8x64xbf16> to vector<1x8x8x64xbf16>
    %50 = vector.shape_cast %49 : vector<1x8x8x64xbf16> to vector<64x64xbf16>
    %c7 = arith.constant 7 : index
    %c0_60 = arith.constant 0 : index
    %c0_61 = arith.constant 0 : index
    %51 = vector.load %arg2[%c7, %c0_60, %c0_61] : memref<9x64x128xbf16, #tpu.memory_space<vmem>>, vector<1x64x128xbf16>
    %52 = vector.shape_cast %51 : vector<1x64x128xbf16> to vector<64x128xbf16>
    %cst_62 = arith.constant dense<0.000000e+00> : vector<64x128xf32>
    %53 = tpu.matmul %50, %52, %cst_62 {dimension_numbers = #tpu.dot_dimension_numbers<[1], [0], [0], [1], [0, 0, 1, 1], [], []>} : vector<64x64xbf16>, vector<64x128xbf16>, vector<64x128xf32> -> vector<64x128xf32>
    %54 = arith.addf %47, %53 : vector<64x128xf32>
    %c0_63 = arith.constant 0 : index
    %c0_64 = arith.constant 0 : index
    %c1_65 = arith.constant 1 : index
    %c1_66 = arith.constant 1 : index
    %c0_67 = arith.constant 0 : index
    %55 = vector.load %arg1[%c0_63, %c0_64, %c1_65, %c1_66, %c0_67] : memref<4x1x9x9x64xbf16, #tpu.memory_space<vmem>>, vector<1x1x8x8x64xbf16>
    %56 = vector.shape_cast %55 : vector<1x1x8x8x64xbf16> to vector<1x8x8x64xbf16>
    %57 = vector.shape_cast %56 : vector<1x8x8x64xbf16> to vector<64x64xbf16>
    %c8 = arith.constant 8 : index
    %c0_68 = arith.constant 0 : index
    %c0_69 = arith.constant 0 : index
    %58 = vector.load %arg2[%c8, %c0_68, %c0_69] : memref<9x64x128xbf16, #tpu.memory_space<vmem>>, vector<1x64x128xbf16>
    %59 = vector.shape_cast %58 : vector<1x64x128xbf16> to vector<64x128xbf16>
    %cst_70 = arith.constant dense<0.000000e+00> : vector<64x128xf32>
    %60 = tpu.matmul %57, %59, %cst_70 {dimension_numbers = #tpu.dot_dimension_numbers<[1], [0], [0], [1], [0, 0, 1, 1], [], []>} : vector<64x64xbf16>, vector<64x128xbf16>, vector<64x128xf32> -> vector<64x128xf32>
    %61 = arith.addf %54, %60 : vector<64x128xf32>
    %62 = vector.shape_cast %61 : vector<64x128xf32> to vector<1x8x8x128xf32>
    %63 = arith.truncf %62 : vector<1x8x8x128xf32> to vector<1x8x8x128xbf16>
    %c0_71 = arith.constant 0 : index
    %c0_72 = arith.constant 0 : index
    %c0_73 = arith.constant 0 : index
    %c0_74 = arith.constant 0 : index
    %64 = vector.load %arg3[%c0_71, %c0_72, %c0_73, %c0_74] : memref<1x8x8x128xbf16, #tpu.memory_space<vmem>>, vector<1x8x8x128xbf16>
    tpu.vector_store %arg3[%c0_71, %c0_72, %c0_73, %c0_74], %63 {strides = array<i32>} : memref<1x8x8x128xbf16, #tpu.memory_space<vmem>>, vector<1x8x8x128xbf16>,
    %cst_75 = arith.constant dense<0.000000e+00> : vector<128xf32>
    %65 = vector.multi_reduction <add>, %61, %cst_75 [0] : vector<64x128xf32> to vector<128xf32>
    %66 = vector.shape_cast %65 : vector<128xf32> to vector<1x128xf32>
    %c0_76 = arith.constant 0 : index
    %c0_77 = arith.constant 0 : index
    %c0_78 = arith.constant 0 : index
    %67 = vector.load %arg4[%c0_76, %c0_77, %c0_78] : memref<1x1x128xf32, #tpu.memory_space<vmem>>, vector<1x1x128xf32>
    %68 = vector.shape_cast %67 : vector<1x1x128xf32> to vector<1x128xf32>
    %69 = vector.shape_cast %66 : vector<1x128xf32> to vector<1x1x128xf32>
    tpu.vector_store %arg4[%c0_76, %c0_77, %c0_78], %69 {strides = array<i32>} : memref<1x1x128xf32, #tpu.memory_space<vmem>>, vector<1x1x128xf32>,
    %70 = arith.mulf %61, %61 : vector<64x128xf32>
    %cst_79 = arith.constant dense<0.000000e+00> : vector<128xf32>
    %71 = vector.multi_reduction <add>, %70, %cst_79 [0] : vector<64x128xf32> to vector<128xf32>
    %72 = vector.shape_cast %71 : vector<128xf32> to vector<1x128xf32>
    %c0_80 = arith.constant 0 : index
    %c0_81 = arith.constant 0 : index
    %c0_82 = arith.constant 0 : index
    %73 = vector.load %arg5[%c0_80, %c0_81, %c0_82] : memref<1x1x128xf32, #tpu.memory_space<vmem>>, vector<1x1x128xf32>
    %74 = vector.shape_cast %73 : vector<1x1x128xf32> to vector<1x128xf32>
    %75 = vector.shape_cast %72 : vector<1x128xf32> to vector<1x1x128xf32>
    tpu.vector_store %arg5[%c0_80, %c0_81, %c0_82], %75 {strides = array<i32>} : memref<1x1x128xf32, #tpu.memory_space<vmem>>, vector<1x1x128xf32>,
    return
  }
  func.func @transform_0(%arg0: i32) -> (i32, i32, i32, i32, i32) {
    %c0_i32 = arith.constant 0 : i32
    %c0_i32_0 = arith.constant 0 : i32
    %c0_i32_1 = arith.constant 0 : i32
    %c0_i32_2 = arith.constant 0 : i32
    %c0_i32_3 = arith.constant 0 : i32
    return %c0_i32, %arg0, %c0_i32_0, %c0_i32_1, %c0_i32_2 : i32, i32, i32, i32, i32
  }
  func.func @transform_1(%arg0: i32) -> (i32, i32, i32) {
    %c0_i32 = arith.constant 0 : i32
    %c0_i32_0 = arith.constant 0 : i32
    %c0_i32_1 = arith.constant 0 : i32
    %c0_i32_2 = arith.constant 0 : i32
    return %c0_i32, %c0_i32_0, %c0_i32_1 : i32, i32, i32
  }
  func.func @transform_2(%arg0: i32) -> (i32, i32, i32, i32) {
    %c0_i32 = arith.constant 0 : i32
    %c0_i32_0 = arith.constant 0 : i32
    %c0_i32_1 = arith.constant 0 : i32
    %c0_i32_2 = arith.constant 0 : i32
    return %arg0, %c0_i32, %c0_i32_0, %c0_i32_1 : i32, i32, i32, i32
  }
  func.func @transform_3(%arg0: i32) -> (i32, i32, i32) {
    %c0_i32 = arith.constant 0 : i32
    %c0_i32_0 = arith.constant 0 : i32
    %c0_i32_1 = arith.constant 0 : i32
    return %arg0, %c0_i32, %c0_i32_0 : i32, i32, i32
  }
  func.func @transform_4(%arg0: i32) -> (i32, i32, i32) {
    %c0_i32 = arith.constant 0 : i32
    %c0_i32_0 = arith.constant 0 : i32
    %c0_i32_1 = arith.constant 0 : i32
    return %arg0, %c0_i32, %c0_i32_0 : i32, i32, i32
  }
}

module attributes {stable_mosaic.version = 11 : i64} {
  func.func @_conv2_bn_res_kernel(%arg0: i32, %arg1: memref<1x8x8x128xbf16, #tpu.memory_space<vmem>>, %arg2: memref<1x128xf32, #tpu.memory_space<vmem>>, %arg3: memref<1x128xf32, #tpu.memory_space<vmem>>, %arg4: memref<1x128xf32, #tpu.memory_space<vmem>>, %arg5: memref<9x128x128xbf16, #tpu.memory_space<vmem>>, %arg6: memref<1x8x8x64xbf16, #tpu.memory_space<vmem>>, %arg7: memref<64x128xbf16, #tpu.memory_space<vmem>>, %arg8: memref<1x8x8x128xf32, #tpu.memory_space<vmem>>, %arg9: memref<1x10x10x128xf32, #tpu.memory_space<vmem>>) attributes {dimension_semantics = [#tpu.dimension_semantics<parallel>], iteration_bounds = array<i64: 2>, scalar_prefetch = 0 : i64, scratch_operands = 1 : i64, tpu.core_type = #tpu.core_type<tc>, window_params = [{transform_indices = @transform_0, window_bounds = array<i64: 1, 8, 8, 128>}, {pipeline_mode = #tpu.pipeline_mode<synchronous>, transform_indices = @transform_1, window_bounds = array<i64: 1, 128>}, {pipeline_mode = #tpu.pipeline_mode<synchronous>, transform_indices = @transform_2, window_bounds = array<i64: 1, 128>}, {pipeline_mode = #tpu.pipeline_mode<synchronous>, transform_indices = @transform_3, window_bounds = array<i64: 1, 128>}, {pipeline_mode = #tpu.pipeline_mode<synchronous>, transform_indices = @transform_4, window_bounds = array<i64: 9, 128, 128>}, {transform_indices = @transform_5, window_bounds = array<i64: 1, 8, 8, 64>}, {pipeline_mode = #tpu.pipeline_mode<synchronous>, transform_indices = @transform_6, window_bounds = array<i64: 64, 128>}, {transform_indices = @transform_7, window_bounds = array<i64: 1, 8, 8, 128>}]} {
    %c0 = arith.constant 0 : index
    %c0_0 = arith.constant 0 : index
    %0 = vector.load %arg2[%c0, %c0_0] : memref<1x128xf32, #tpu.memory_space<vmem>>, vector<1x128xf32>
    %1 = vector.shape_cast %0 : vector<1x128xf32> to vector<1x1x1x128xf32>
    %c0_1 = arith.constant 0 : index
    %c0_2 = arith.constant 0 : index
    %2 = vector.load %arg3[%c0_1, %c0_2] : memref<1x128xf32, #tpu.memory_space<vmem>>, vector<1x128xf32>
    %3 = vector.shape_cast %2 : vector<1x128xf32> to vector<1x1x1x128xf32>
    %c0_3 = arith.constant 0 : index
    %c0_4 = arith.constant 0 : index
    %4 = vector.load %arg4[%c0_3, %c0_4] : memref<1x128xf32, #tpu.memory_space<vmem>>, vector<1x128xf32>
    %5 = vector.shape_cast %4 : vector<1x128xf32> to vector<1x1x1x128xf32>
    %c0_5 = arith.constant 0 : index
    %c0_6 = arith.constant 0 : index
    %c0_7 = arith.constant 0 : index
    %c0_8 = arith.constant 0 : index
    %6 = vector.load %arg1[%c0_5, %c0_6, %c0_7, %c0_8] : memref<1x8x8x128xbf16, #tpu.memory_space<vmem>>, vector<1x8x8x128xbf16>
    %7 = arith.extf %6 : vector<1x8x8x128xbf16> to vector<1x8x8x128xf32>
    %8 = vector.broadcast %1 : vector<1x1x1x128xf32> to vector<1x8x8x128xf32>
    %9 = arith.subf %7, %8 : vector<1x8x8x128xf32>
    %10 = vector.broadcast %3 : vector<1x1x1x128xf32> to vector<1x8x8x128xf32>
    %11 = arith.mulf %9, %10 : vector<1x8x8x128xf32>
    %12 = vector.broadcast %5 : vector<1x1x1x128xf32> to vector<1x8x8x128xf32>
    %13 = arith.addf %11, %12 : vector<1x8x8x128xf32>
    %cst = arith.constant 0.000000e+00 : f32
    %14 = vector.broadcast %cst : f32 to vector<1x8x8x128xf32>
    %15 = arith.maximumf %13, %14 : vector<1x8x8x128xf32>
    %cst_9 = arith.constant 0.000000e+00 : f32
    %16 = vector.broadcast %cst_9 : f32 to vector<1x10x10x128xf32>
    %c0_10 = arith.constant 0 : index
    %c0_11 = arith.constant 0 : index
    %c0_12 = arith.constant 0 : index
    %c0_13 = arith.constant 0 : index
    %17 = vector.load %arg9[%c0_10, %c0_11, %c0_12, %c0_13] : memref<1x10x10x128xf32, #tpu.memory_space<vmem>>, vector<1x10x10x128xf32>
    tpu.vector_store %arg9[%c0_10, %c0_11, %c0_12, %c0_13], %16 {strides = array<i32>} : memref<1x10x10x128xf32, #tpu.memory_space<vmem>>, vector<1x10x10x128xf32>,
    %c0_14 = arith.constant 0 : index
    %c1 = arith.constant 1 : index
    %c1_15 = arith.constant 1 : index
    %c0_16 = arith.constant 0 : index
    %18 = vector.load %arg9[%c0_14, %c1, %c1_15, %c0_16] : memref<1x10x10x128xf32, #tpu.memory_space<vmem>>, vector<1x8x8x128xf32>
    tpu.vector_store %arg9[%c0_14, %c1, %c1_15, %c0_16], %15 {strides = array<i32>} : memref<1x10x10x128xf32, #tpu.memory_space<vmem>>, vector<1x8x8x128xf32>,
    %c0_17 = arith.constant 0 : index
    %c0_18 = arith.constant 0 : index
    %c0_19 = arith.constant 0 : index
    %c0_20 = arith.constant 0 : index
    %19 = vector.load %arg9[%c0_17, %c0_18, %c0_19, %c0_20] : memref<1x10x10x128xf32, #tpu.memory_space<vmem>>, vector<1x8x8x128xf32>
    %20 = vector.shape_cast %19 : vector<1x8x8x128xf32> to vector<64x128xf32>
    %21 = arith.truncf %20 : vector<64x128xf32> to vector<64x128xbf16>
    %c0_21 = arith.constant 0 : index
    %c0_22 = arith.constant 0 : index
    %c0_23 = arith.constant 0 : index
    %22 = vector.load %arg5[%c0_21, %c0_22, %c0_23] : memref<9x128x128xbf16, #tpu.memory_space<vmem>>, vector<1x128x128xbf16>
    %23 = vector.shape_cast %22 : vector<1x128x128xbf16> to vector<128x128xbf16>
    %cst_24 = arith.constant dense<0.000000e+00> : vector<64x128xf32>
    %24 = tpu.matmul %21, %23, %cst_24 {dimension_numbers = #tpu.dot_dimension_numbers<[1], [0], [0], [1], [0, 0, 1, 1], [], []>} : vector<64x128xbf16>, vector<128x128xbf16>, vector<64x128xf32> -> vector<64x128xf32>
    %c0_25 = arith.constant 0 : index
    %c0_26 = arith.constant 0 : index
    %c1_27 = arith.constant 1 : index
    %c0_28 = arith.constant 0 : index
    %25 = vector.load %arg9[%c0_25, %c0_26, %c1_27, %c0_28] : memref<1x10x10x128xf32, #tpu.memory_space<vmem>>, vector<1x8x8x128xf32>
    %26 = vector.shape_cast %25 : vector<1x8x8x128xf32> to vector<64x128xf32>
    %27 = arith.truncf %26 : vector<64x128xf32> to vector<64x128xbf16>
    %c1_29 = arith.constant 1 : index
    %c0_30 = arith.constant 0 : index
    %c0_31 = arith.constant 0 : index
    %28 = vector.load %arg5[%c1_29, %c0_30, %c0_31] : memref<9x128x128xbf16, #tpu.memory_space<vmem>>, vector<1x128x128xbf16>
    %29 = vector.shape_cast %28 : vector<1x128x128xbf16> to vector<128x128xbf16>
    %cst_32 = arith.constant dense<0.000000e+00> : vector<64x128xf32>
    %30 = tpu.matmul %27, %29, %cst_32 {dimension_numbers = #tpu.dot_dimension_numbers<[1], [0], [0], [1], [0, 0, 1, 1], [], []>} : vector<64x128xbf16>, vector<128x128xbf16>, vector<64x128xf32> -> vector<64x128xf32>
    %31 = arith.addf %24, %30 : vector<64x128xf32>
    %c0_33 = arith.constant 0 : index
    %c0_34 = arith.constant 0 : index
    %c2 = arith.constant 2 : index
    %c0_35 = arith.constant 0 : index
    %32 = vector.load %arg9[%c0_33, %c0_34, %c2, %c0_35] : memref<1x10x10x128xf32, #tpu.memory_space<vmem>>, vector<1x8x8x128xf32>
    %33 = vector.shape_cast %32 : vector<1x8x8x128xf32> to vector<64x128xf32>
    %34 = arith.truncf %33 : vector<64x128xf32> to vector<64x128xbf16>
    %c2_36 = arith.constant 2 : index
    %c0_37 = arith.constant 0 : index
    %c0_38 = arith.constant 0 : index
    %35 = vector.load %arg5[%c2_36, %c0_37, %c0_38] : memref<9x128x128xbf16, #tpu.memory_space<vmem>>, vector<1x128x128xbf16>
    %36 = vector.shape_cast %35 : vector<1x128x128xbf16> to vector<128x128xbf16>
    %cst_39 = arith.constant dense<0.000000e+00> : vector<64x128xf32>
    %37 = tpu.matmul %34, %36, %cst_39 {dimension_numbers = #tpu.dot_dimension_numbers<[1], [0], [0], [1], [0, 0, 1, 1], [], []>} : vector<64x128xbf16>, vector<128x128xbf16>, vector<64x128xf32> -> vector<64x128xf32>
    %38 = arith.addf %31, %37 : vector<64x128xf32>
    %c0_40 = arith.constant 0 : index
    %c1_41 = arith.constant 1 : index
    %c0_42 = arith.constant 0 : index
    %c0_43 = arith.constant 0 : index
    %39 = vector.load %arg9[%c0_40, %c1_41, %c0_42, %c0_43] : memref<1x10x10x128xf32, #tpu.memory_space<vmem>>, vector<1x8x8x128xf32>
    %40 = vector.shape_cast %39 : vector<1x8x8x128xf32> to vector<64x128xf32>
    %41 = arith.truncf %40 : vector<64x128xf32> to vector<64x128xbf16>
    %c3 = arith.constant 3 : index
    %c0_44 = arith.constant 0 : index
    %c0_45 = arith.constant 0 : index
    %42 = vector.load %arg5[%c3, %c0_44, %c0_45] : memref<9x128x128xbf16, #tpu.memory_space<vmem>>, vector<1x128x128xbf16>
    %43 = vector.shape_cast %42 : vector<1x128x128xbf16> to vector<128x128xbf16>
    %cst_46 = arith.constant dense<0.000000e+00> : vector<64x128xf32>
    %44 = tpu.matmul %41, %43, %cst_46 {dimension_numbers = #tpu.dot_dimension_numbers<[1], [0], [0], [1], [0, 0, 1, 1], [], []>} : vector<64x128xbf16>, vector<128x128xbf16>, vector<64x128xf32> -> vector<64x128xf32>
    %45 = arith.addf %38, %44 : vector<64x128xf32>
    %c0_47 = arith.constant 0 : index
    %c1_48 = arith.constant 1 : index
    %c1_49 = arith.constant 1 : index
    %c0_50 = arith.constant 0 : index
    %46 = vector.load %arg9[%c0_47, %c1_48, %c1_49, %c0_50] : memref<1x10x10x128xf32, #tpu.memory_space<vmem>>, vector<1x8x8x128xf32>
    %47 = vector.shape_cast %46 : vector<1x8x8x128xf32> to vector<64x128xf32>
    %48 = arith.truncf %47 : vector<64x128xf32> to vector<64x128xbf16>
    %c4 = arith.constant 4 : index
    %c0_51 = arith.constant 0 : index
    %c0_52 = arith.constant 0 : index
    %49 = vector.load %arg5[%c4, %c0_51, %c0_52] : memref<9x128x128xbf16, #tpu.memory_space<vmem>>, vector<1x128x128xbf16>
    %50 = vector.shape_cast %49 : vector<1x128x128xbf16> to vector<128x128xbf16>
    %cst_53 = arith.constant dense<0.000000e+00> : vector<64x128xf32>
    %51 = tpu.matmul %48, %50, %cst_53 {dimension_numbers = #tpu.dot_dimension_numbers<[1], [0], [0], [1], [0, 0, 1, 1], [], []>} : vector<64x128xbf16>, vector<128x128xbf16>, vector<64x128xf32> -> vector<64x128xf32>
    %52 = arith.addf %45, %51 : vector<64x128xf32>
    %c0_54 = arith.constant 0 : index
    %c1_55 = arith.constant 1 : index
    %c2_56 = arith.constant 2 : index
    %c0_57 = arith.constant 0 : index
    %53 = vector.load %arg9[%c0_54, %c1_55, %c2_56, %c0_57] : memref<1x10x10x128xf32, #tpu.memory_space<vmem>>, vector<1x8x8x128xf32>
    %54 = vector.shape_cast %53 : vector<1x8x8x128xf32> to vector<64x128xf32>
    %55 = arith.truncf %54 : vector<64x128xf32> to vector<64x128xbf16>
    %c5 = arith.constant 5 : index
    %c0_58 = arith.constant 0 : index
    %c0_59 = arith.constant 0 : index
    %56 = vector.load %arg5[%c5, %c0_58, %c0_59] : memref<9x128x128xbf16, #tpu.memory_space<vmem>>, vector<1x128x128xbf16>
    %57 = vector.shape_cast %56 : vector<1x128x128xbf16> to vector<128x128xbf16>
    %cst_60 = arith.constant dense<0.000000e+00> : vector<64x128xf32>
    %58 = tpu.matmul %55, %57, %cst_60 {dimension_numbers = #tpu.dot_dimension_numbers<[1], [0], [0], [1], [0, 0, 1, 1], [], []>} : vector<64x128xbf16>, vector<128x128xbf16>, vector<64x128xf32> -> vector<64x128xf32>
    %59 = arith.addf %52, %58 : vector<64x128xf32>
    %c0_61 = arith.constant 0 : index
    %c2_62 = arith.constant 2 : index
    %c0_63 = arith.constant 0 : index
    %c0_64 = arith.constant 0 : index
    %60 = vector.load %arg9[%c0_61, %c2_62, %c0_63, %c0_64] : memref<1x10x10x128xf32, #tpu.memory_space<vmem>>, vector<1x8x8x128xf32>
    %61 = vector.shape_cast %60 : vector<1x8x8x128xf32> to vector<64x128xf32>
    %62 = arith.truncf %61 : vector<64x128xf32> to vector<64x128xbf16>
    %c6 = arith.constant 6 : index
    %c0_65 = arith.constant 0 : index
    %c0_66 = arith.constant 0 : index
    %63 = vector.load %arg5[%c6, %c0_65, %c0_66] : memref<9x128x128xbf16, #tpu.memory_space<vmem>>, vector<1x128x128xbf16>
    %64 = vector.shape_cast %63 : vector<1x128x128xbf16> to vector<128x128xbf16>
    %cst_67 = arith.constant dense<0.000000e+00> : vector<64x128xf32>
    %65 = tpu.matmul %62, %64, %cst_67 {dimension_numbers = #tpu.dot_dimension_numbers<[1], [0], [0], [1], [0, 0, 1, 1], [], []>} : vector<64x128xbf16>, vector<128x128xbf16>, vector<64x128xf32> -> vector<64x128xf32>
    %66 = arith.addf %59, %65 : vector<64x128xf32>
    %c0_68 = arith.constant 0 : index
    %c2_69 = arith.constant 2 : index
    %c1_70 = arith.constant 1 : index
    %c0_71 = arith.constant 0 : index
    %67 = vector.load %arg9[%c0_68, %c2_69, %c1_70, %c0_71] : memref<1x10x10x128xf32, #tpu.memory_space<vmem>>, vector<1x8x8x128xf32>
    %68 = vector.shape_cast %67 : vector<1x8x8x128xf32> to vector<64x128xf32>
    %69 = arith.truncf %68 : vector<64x128xf32> to vector<64x128xbf16>
    %c7 = arith.constant 7 : index
    %c0_72 = arith.constant 0 : index
    %c0_73 = arith.constant 0 : index
    %70 = vector.load %arg5[%c7, %c0_72, %c0_73] : memref<9x128x128xbf16, #tpu.memory_space<vmem>>, vector<1x128x128xbf16>
    %71 = vector.shape_cast %70 : vector<1x128x128xbf16> to vector<128x128xbf16>
    %cst_74 = arith.constant dense<0.000000e+00> : vector<64x128xf32>
    %72 = tpu.matmul %69, %71, %cst_74 {dimension_numbers = #tpu.dot_dimension_numbers<[1], [0], [0], [1], [0, 0, 1, 1], [], []>} : vector<64x128xbf16>, vector<128x128xbf16>, vector<64x128xf32> -> vector<64x128xf32>
    %73 = arith.addf %66, %72 : vector<64x128xf32>
    %c0_75 = arith.constant 0 : index
    %c2_76 = arith.constant 2 : index
    %c2_77 = arith.constant 2 : index
    %c0_78 = arith.constant 0 : index
    %74 = vector.load %arg9[%c0_75, %c2_76, %c2_77, %c0_78] : memref<1x10x10x128xf32, #tpu.memory_space<vmem>>, vector<1x8x8x128xf32>
    %75 = vector.shape_cast %74 : vector<1x8x8x128xf32> to vector<64x128xf32>
    %76 = arith.truncf %75 : vector<64x128xf32> to vector<64x128xbf16>
    %c8 = arith.constant 8 : index
    %c0_79 = arith.constant 0 : index
    %c0_80 = arith.constant 0 : index
    %77 = vector.load %arg5[%c8, %c0_79, %c0_80] : memref<9x128x128xbf16, #tpu.memory_space<vmem>>, vector<1x128x128xbf16>
    %78 = vector.shape_cast %77 : vector<1x128x128xbf16> to vector<128x128xbf16>
    %cst_81 = arith.constant dense<0.000000e+00> : vector<64x128xf32>
    %79 = tpu.matmul %76, %78, %cst_81 {dimension_numbers = #tpu.dot_dimension_numbers<[1], [0], [0], [1], [0, 0, 1, 1], [], []>} : vector<64x128xbf16>, vector<128x128xbf16>, vector<64x128xf32> -> vector<64x128xf32>
    %80 = arith.addf %73, %79 : vector<64x128xf32>
    %c0_82 = arith.constant 0 : index
    %c0_83 = arith.constant 0 : index
    %c0_84 = arith.constant 0 : index
    %c0_85 = arith.constant 0 : index
    %81 = vector.load %arg6[%c0_82, %c0_83, %c0_84, %c0_85] : memref<1x8x8x64xbf16, #tpu.memory_space<vmem>>, vector<1x8x8x64xbf16>
    %82 = vector.shape_cast %81 : vector<1x8x8x64xbf16> to vector<64x64xbf16>
    %c0_86 = arith.constant 0 : index
    %c0_87 = arith.constant 0 : index
    %83 = vector.load %arg7[%c0_86, %c0_87] : memref<64x128xbf16, #tpu.memory_space<vmem>>, vector<64x128xbf16>
    %cst_88 = arith.constant dense<0.000000e+00> : vector<64x128xf32>
    %84 = tpu.matmul %82, %83, %cst_88 {dimension_numbers = #tpu.dot_dimension_numbers<[1], [0], [0], [1], [0, 0, 1, 1], [], []>} : vector<64x64xbf16>, vector<64x128xbf16>, vector<64x128xf32> -> vector<64x128xf32>
    %85 = arith.addf %80, %84 : vector<64x128xf32>
    %86 = vector.shape_cast %85 : vector<64x128xf32> to vector<1x8x8x128xf32>
    %c0_89 = arith.constant 0 : index
    %c0_90 = arith.constant 0 : index
    %c0_91 = arith.constant 0 : index
    %c0_92 = arith.constant 0 : index
    %87 = vector.load %arg8[%c0_89, %c0_90, %c0_91, %c0_92] : memref<1x8x8x128xf32, #tpu.memory_space<vmem>>, vector<1x8x8x128xf32>
    tpu.vector_store %arg8[%c0_89, %c0_90, %c0_91, %c0_92], %86 {strides = array<i32>} : memref<1x8x8x128xf32, #tpu.memory_space<vmem>>, vector<1x8x8x128xf32>,
    return
  }
  func.func @transform_0(%arg0: i32) -> (i32, i32, i32, i32) {
    %c0_i32 = arith.constant 0 : i32
    %c0_i32_0 = arith.constant 0 : i32
    %c0_i32_1 = arith.constant 0 : i32
    %c0_i32_2 = arith.constant 0 : i32
    return %arg0, %c0_i32, %c0_i32_0, %c0_i32_1 : i32, i32, i32, i32
  }
  func.func @transform_1(%arg0: i32) -> (i32, i32) {
    %c0_i32 = arith.constant 0 : i32
    %c0_i32_0 = arith.constant 0 : i32
    %c0_i32_1 = arith.constant 0 : i32
    return %c0_i32, %c0_i32_0 : i32, i32
  }
  func.func @transform_2(%arg0: i32) -> (i32, i32) {
    %c0_i32 = arith.constant 0 : i32
    %c0_i32_0 = arith.constant 0 : i32
    %c0_i32_1 = arith.constant 0 : i32
    return %c0_i32, %c0_i32_0 : i32, i32
  }
  func.func @transform_3(%arg0: i32) -> (i32, i32) {
    %c0_i32 = arith.constant 0 : i32
    %c0_i32_0 = arith.constant 0 : i32
    %c0_i32_1 = arith.constant 0 : i32
    return %c0_i32, %c0_i32_0 : i32, i32
  }
  func.func @transform_4(%arg0: i32) -> (i32, i32, i32) {
    %c0_i32 = arith.constant 0 : i32
    %c0_i32_0 = arith.constant 0 : i32
    %c0_i32_1 = arith.constant 0 : i32
    %c0_i32_2 = arith.constant 0 : i32
    return %c0_i32, %c0_i32_0, %c0_i32_1 : i32, i32, i32
  }
  func.func @transform_5(%arg0: i32) -> (i32, i32, i32, i32) {
    %c0_i32 = arith.constant 0 : i32
    %c0_i32_0 = arith.constant 0 : i32
    %c0_i32_1 = arith.constant 0 : i32
    %c0_i32_2 = arith.constant 0 : i32
    return %arg0, %c0_i32, %c0_i32_0, %c0_i32_1 : i32, i32, i32, i32
  }
  func.func @transform_6(%arg0: i32) -> (i32, i32) {
    %c0_i32 = arith.constant 0 : i32
    %c0_i32_0 = arith.constant 0 : i32
    %c0_i32_1 = arith.constant 0 : i32
    return %c0_i32, %c0_i32_0 : i32, i32
  }
  func.func @transform_7(%arg0: i32) -> (i32, i32, i32, i32) {
    %c0_i32 = arith.constant 0 : i32
    %c0_i32_0 = arith.constant 0 : i32
    %c0_i32_1 = arith.constant 0 : i32
    %c0_i32_2 = arith.constant 0 : i32
    return %arg0, %c0_i32, %c0_i32_0, %c0_i32_1 : i32, i32, i32, i32
  }
}

</mosaic_0001>

<bundles_post_ra>
// kernel: tile.18
= control target key start
LH: loop header
LB: loop body
LE: loop exit
PB: predicated region body
PF: predicated region fallthrough
CT: control target
= control target key end

     0   :  { %s22_s0 = inlined_call_operand.vmem [shape: f32[64], index: 0, kind: input, shape index: {}]   ;;  %s23_s1 = inlined_call_operand.vmem [shape: f32[2,64], index: 1, kind: output, shape index: {}]  }
   0x1   :  { %v4_v0 = vld [vmem:[%s22_s0] ss:$0 sm:$0xff] }
   0x2   :  { %5 = vst [vmem:[%s23_s1] sm:$0x3] %v4_v0 }

// kernel: tile.19
= control target key start
LH: loop header
LB: loop body
LE: loop exit
PB: predicated region body
PF: predicated region fallthrough
CT: control target
= control target key end

     0   :  { %vm7_vm0 = vcmask 523264   ;;  %vm13_vm1 = vcmask 1048064   ;;  %s39_s0 = inlined_call_operand.vmem [shape: f32[2,64], index: 0, kind: input, shape index: {}]   ;;  %s40_s1 = inlined_call_operand.vmem [shape: f32[1,128], index: 1, kind: output, shape index: {}]  }
   0x1   :  { %v4_v0 = vld [vmem:[%s39_s0] sm:$0x3]  ;;  %s22_s0 = smov 64  }
   0x2   :  { %5 = vst [vmem:[#allocation1] sm:$0x3] %v4_v0 }
   0x9   :  { %v10_v1 = vld [vmem:[#allocation1 + $0x1] sm:$0x1]   ;;  %v6_v2 = vld [vmem:[#allocation1] sm:$0x1]  }
   0xa   :  { %11 = vrot.lane.b32.xlu0 %v10_v1, %s22_s0  ;;  %8 = vst.msk [vmem:[#allocation0] sm:$0x1] %vm7_vm0, %v6_v2  }
  0x7c   :  { %v12_v3 = vpop.permute.xlu0 %11  }
  0x7d   :  { %14 = vst.msk [vmem:[#allocation0] sm:$0x1] %vm13_vm1, %v12_v3  }
  0x84   :  { %v18_v4 = vld [vmem:[#allocation0] sm:$0x1] }
  0x85   :  { %20 = vst [vmem:[%s40_s1] sm:$0x1] %v18_v4 }

// kernel: preact_block_forward.4
= control target key start
LH: loop header
LB: loop body
LE: loop exit
PB: predicated region body
PF: predicated region fallthrough
CT: control target
= control target key end

     0   :  { %s275_s0 = inlined_call_operand.vmem [shape: f32[256,128], index: 0, kind: input, shape index: {}]   ;;  %s276_s1 = inlined_call_operand.vmem [shape: f32[1,1,128], index: 1, kind: output, shape index: {0}]   ;;  %s277_s2 = inlined_call_operand.vmem [shape: f32[1,1,128], index: 2, kind: output, shape index: {1}]  }
   0x1   :  { %v10_v0 = vld [vmem:[%s275_s0] sm:$0xff]  ;;  %v11_v1 = vld [vmem:[%s275_s0 + $0x8] sm:$0xff]  ;;  %v12_v2 = vld [vmem:[%s275_s0 + $0x10] sm:$0xff] }
   0x2   :  { %v13_v3 = vld [vmem:[%s275_s0 + $0x18] sm:$0xff]  ;;  %v42_v4 = vadd.f32 %v11_v1, %v10_v0  ;;  %v80_v5 = vmul.f32 %v10_v0, %v10_v0  ;;  %v81_v6 = vmul.f32 %v11_v1, %v11_v1  ;;  %v82_v7 = vmul.f32 %v12_v2, %v12_v2  ;;  %v14_v8 = vld [vmem:[%s275_s0 + $0x20] sm:$0xff]  ;;  %v15_v12 = vld [vmem:[%s275_s0 + $0x28] sm:$0xff] }
   0x3   :  { %v83_v10 = vmul.f32 %v13_v3, %v13_v3  ;;  %v84_v14 = vmul.f32 %v14_v8, %v14_v8  ;;  %v16_v16 = vld [vmem:[%s275_s0 + $0x30] sm:$0xff]  ;;  %v85_v18 = vmul.f32 %v15_v12, %v15_v12  ;;  %v17_v20 = vld [vmem:[%s275_s0 + $0x38] sm:$0xff]  ;;  %v18_v24 = vld [vmem:[%s275_s0 + $0x40] sm:$0xff] }
   0x4   :  { %v43_v9 = vadd.f32 %v42_v4, %v12_v2  ;;  %v112_v11 = vadd.f32 %v81_v6, %v80_v5  ;;  %v86_v22 = vmul.f32 %v16_v16, %v16_v16  ;;  %v87_v26 = vmul.f32 %v17_v20, %v17_v20  ;;  %v19_v28 = vld [vmem:[%s275_s0 + $0x48] sm:$0xff]  ;;  %v20_v32 = vld [vmem:[%s275_s0 + $0x50] sm:$0xff]  ;;  %v21_v36 = vld [vmem:[%s275_s0 + $0x58] sm:$0xff] }
   0x5   :  { %v88_v30 = vmul.f32 %v18_v24, %v18_v24  ;;  %v89_v34 = vmul.f32 %v19_v28, %v19_v28  ;;  %v90_v38 = vmul.f32 %v20_v32, %v20_v32  ;;  %v22_v40 = vld [vmem:[%s275_s0 + $0x60] sm:$0xff]  ;;  %v91_v42 = vmul.f32 %v21_v36, %v21_v36  ;;  %v23_v44 = vld [vmem:[%s275_s0 + $0x68] sm:$0xff]  ;;  %v24_v48 = vld [vmem:[%s275_s0 + $0x70] sm:$0xff] }
   0x6   :  { %v44_v13 = vadd.f32 %v43_v9, %v13_v3  ;;  %v113_v15 = vadd.f32 %v112_v11, %v82_v7  ;;  %v92_v46 = vmul.f32 %v22_v40, %v22_v40  ;;  %v93_v50 = vmul.f32 %v23_v44, %v23_v44  ;;  %v25_v52 = vld [vmem:[%s275_s0 + $0x78] sm:$0xff]  ;;  %v26_v56 = vld [vmem:[%s275_s0 + $0x80] sm:$0xff]  ;;  %v27_v60 = vld [vmem:[%s275_s0 + $0x88] sm:$0xff] }
   0x7   :  { %v94_v54 = vmul.f32 %v24_v48, %v24_v48  ;;  %v95_v58 = vmul.f32 %v25_v52, %v25_v52  ;;  %v96_v62 = vmul.f32 %v26_v56, %v26_v56  ;;  %v28_v0 = vld [vmem:[%s275_s0 + $0x90] sm:$0xff]  ;;  %v97_v2 = vmul.f32 %v27_v60, %v27_v60  ;;  %v29_v4 = vld [vmem:[%s275_s0 + $0x98] sm:$0xff] }
   0x8   :  { %v45_v17 = vadd.f32 %v44_v13, %v14_v8  ;;  %v114_v19 = vadd.f32 %v113_v15, %v83_v10  ;;  %v98_v6 = vmul.f32 %v28_v0, %v28_v0  ;;  %v30_v8 = vld [vmem:[%s275_s0 + $0xa0] sm:$0xff]  ;;  %v99_v10 = vmul.f32 %v29_v4, %v29_v4 }
   0xa   :  { %v46_v21 = vadd.f32 %v45_v17, %v15_v12  ;;  %v115_v23 = vadd.f32 %v114_v19, %v84_v14  ;;  %v31_v12 = vld [vmem:[%s275_s0 + $0xa8] sm:$0xff]  ;;  %v100_v14 = vmul.f32 %v30_v8, %v30_v8 }
   0xc   :  { %v47_v25 = vadd.f32 %v46_v21, %v16_v16  ;;  %v116_v27 = vadd.f32 %v115_v23, %v85_v18  ;;  %v32_v16 = vld [vmem:[%s275_s0 + $0xb0] sm:$0xff]  ;;  %v101_v18 = vmul.f32 %v31_v12, %v31_v12 }
   0xe   :  { %v48_v29 = vadd.f32 %v47_v25, %v17_v20  ;;  %v117_v31 = vadd.f32 %v116_v27, %v86_v22  ;;  %v33_v20 = vld [vmem:[%s275_s0 + $0xb8] sm:$0xff]  ;;  %v102_v22 = vmul.f32 %v32_v16, %v32_v16 }
  0x10   :  { %v49_v33 = vadd.f32 %v48_v29, %v18_v24  ;;  %v118_v35 = vadd.f32 %v117_v31, %v87_v26  ;;  %v34_v24 = vld [vmem:[%s275_s0 + $0xc0] sm:$0xff]  ;;  %v103_v26 = vmul.f32 %v33_v20, %v33_v20 }
  0x12   :  { %v50_v37 = vadd.f32 %v49_v33, %v19_v28  ;;  %v119_v39 = vadd.f32 %v118_v35, %v88_v30  ;;  %v35_v28 = vld [vmem:[%s275_s0 + $0xc8] sm:$0xff]  ;;  %v104_v30 = vmul.f32 %v34_v24, %v34_v24 }
  0x14   :  { %v51_v41 = vadd.f32 %v50_v37, %v20_v32  ;;  %v120_v43 = vadd.f32 %v119_v39, %v89_v34  ;;  %v36_v32 = vld [vmem:[%s275_s0 + $0xd0] sm:$0xff]  ;;  %v105_v34 = vmul.f32 %v35_v28, %v35_v28 }
  0x16   :  { %v52_v45 = vadd.f32 %v51_v41, %v21_v36  ;;  %v121_v47 = vadd.f32 %v120_v43, %v90_v38  ;;  %v37_v36 = vld [vmem:[%s275_s0 + $0xd8] sm:$0xff]  ;;  %v106_v38 = vmul.f32 %v36_v32, %v36_v32 }
  0x18   :  { %v53_v49 = vadd.f32 %v52_v45, %v22_v40  ;;  %v122_v51 = vadd.f32 %v121_v47, %v91_v42  ;;  %v38_v40 = vld [vmem:[%s275_s0 + $0xe0] sm:$0xff]  ;;  %v107_v42 = vmul.f32 %v37_v36, %v37_v36 }
  0x1a   :  { %v54_v53 = vadd.f32 %v53_v49, %v23_v44  ;;  %v123_v55 = vadd.f32 %v122_v51, %v92_v46  ;;  %v39_v44 = vld [vmem:[%s275_s0 + $0xe8] sm:$0xff]  ;;  %v108_v46 = vmul.f32 %v38_v40, %v38_v40 }
  0x1c   :  { %v55_v57 = vadd.f32 %v54_v53, %v24_v48  ;;  %v124_v59 = vadd.f32 %v123_v55, %v93_v50  ;;  %v40_v48 = vld [vmem:[%s275_s0 + $0xf0] sm:$0xff]  ;;  %v109_v50 = vmul.f32 %v39_v44, %v39_v44 }
  0x1e   :  { %v56_v61 = vadd.f32 %v55_v57, %v25_v52  ;;  %v125_v63 = vadd.f32 %v124_v59, %v94_v54  ;;  %v41_v52 = vld [vmem:[%s275_s0 + $0xf8] sm:$0xff]  ;;  %v110_v54 = vmul.f32 %v40_v48, %v40_v48 }
  0x1f   :  { %v111_v57 = vmul.f32 %v41_v52, %v41_v52 }
  0x20   :  { %v57_v1 = vadd.f32 %v56_v61, %v26_v56  ;;  %v126_v3 = vadd.f32 %v125_v63, %v95_v58 }
  0x22   :  { %v58_v5 = vadd.f32 %v57_v1, %v27_v60  ;;  %v127_v7 = vadd.f32 %v126_v3, %v96_v62 }
  0x24   :  { %v59_v9 = vadd.f32 %v58_v5, %v28_v0  ;;  %v128_v11 = vadd.f32 %v127_v7, %v97_v2 }
  0x26   :  { %v60_v13 = vadd.f32 %v59_v9, %v29_v4  ;;  %v129_v15 = vadd.f32 %v128_v11, %v98_v6 }
  0x28   :  { %v61_v17 = vadd.f32 %v60_v13, %v30_v8  ;;  %v130_v19 = vadd.f32 %v129_v15, %v99_v10 }
  0x2a   :  { %v62_v21 = vadd.f32 %v61_v17, %v31_v12  ;;  %v131_v23 = vadd.f32 %v130_v19, %v100_v14 }
  0x2c   :  { %v63_v25 = vadd.f32 %v62_v21, %v32_v16  ;;  %v132_v27 = vadd.f32 %v131_v23, %v101_v18 }
  0x2e   :  { %v64_v29 = vadd.f32 %v63_v25, %v33_v20  ;;  %v133_v31 = vadd.f32 %v132_v27, %v102_v22 }
  0x30   :  { %v65_v33 = vadd.f32 %v64_v29, %v34_v24  ;;  %v134_v35 = vadd.f32 %v133_v31, %v103_v26 }
  0x32   :  { %v66_v37 = vadd.f32 %v65_v33, %v35_v28  ;;  %v135_v39 = vadd.f32 %v134_v35, %v104_v30 }
  0x34   :  { %v67_v41 = vadd.f32 %v66_v37, %v36_v32  ;;  %v136_v43 = vadd.f32 %v135_v39, %v105_v34 }
  0x36   :  { %v68_v45 = vadd.f32 %v67_v41, %v37_v36  ;;  %v137_v47 = vadd.f32 %v136_v43, %v106_v38 }
  0x38   :  { %v69_v49 = vadd.f32 %v68_v45, %v38_v40  ;;  %v138_v51 = vadd.f32 %v137_v47, %v107_v42 }
  0x3a   :  { %v70_v53 = vadd.f32 %v69_v49, %v39_v44  ;;  %v139_v55 = vadd.f32 %v138_v51, %v108_v46 }
  0x3c   :  { %v71_v56 = vadd.f32 %v70_v53, %v40_v48  ;;  %v140_v58 = vadd.f32 %v139_v55, %v109_v50 }
  0x3e   :  { %v72_v59 = vadd.f32 %v71_v56, %v41_v52  ;;  %v141_v60 = vadd.f32 %v140_v58, %v110_v54 }
  0x40   :  { %v73_v61 = vrot.slane %v72_v59, 4  ;;  %v142_v62 = vadd.f32 %v141_v60, %v111_v57 }
  0x42   :  { %v74_v63 = vadd.f32 %v73_v61, %v72_v59  ;;  %v143_v0 = vrot.slane %v142_v62, 4 }
  0x44   :  { %v75_v1 = vrot.slane %v74_v63, 2  ;;  %v144_v2 = vadd.f32 %v143_v0, %v142_v62 }
  0x46   :  { %v76_v3 = vadd.f32 %v75_v1, %v74_v63  ;;  %v145_v4 = vrot.slane %v144_v2, 2 }
  0x48   :  { %v77_v5 = vrot.slane %v76_v3, 1  ;;  %v146_v6 = vadd.f32 %v145_v4, %v144_v2 }
  0x4a   :  { %v78_v7 = vadd.f32 %v77_v5, %v76_v3  ;;  %v147_v8 = vrot.slane %v146_v6, 1 }
  0x4c   :  { %79 = vst [vmem:[%s276_s1] sm:$0x1] %v78_v7  ;;  %v148_v9 = vadd.f32 %v147_v8, %v146_v6 }
  0x4e   :  { %149 = vst [vmem:[%s277_s2] sm:$0x1] %v148_v9 }

// kernel: preact_block_forward.5
= control target key start
LH: loop header
LB: loop body
LE: loop exit
PB: predicated region body
PF: predicated region fallthrough
CT: control target
= control target key end

     0   :  { %s804_s0 = inlined_call_operand.vmem [shape: f32[256,128], index: 0, kind: input, shape index: {}]   ;;  %s805_s1 = inlined_call_operand.vmem [shape: f32[1,128], index: 1, kind: input, shape index: {}]   ;;  %s806_s2 = inlined_call_operand.vmem [shape: f32[1,128], index: 2, kind: input, shape index: {}]   ;;  %s807_s3 = inlined_call_operand.vmem [shape: f32[1,128], index: 3, kind: input, shape index: {}]   ;;  %s808_s4 = inlined_call_operand.vmem [shape: bf16[256,128], index: 4, kind: output, shape index: {}]  }
   0x1   :  { %v17_v0 = vld [vmem:[%s804_s0] sm:$0xff]  ;;  %v18_v1 = vld [vmem:[%s804_s0 + $0x8] sm:$0xff]  ;;  %v19_v7 = vld [vmem:[%s804_s0 + $0x10] sm:$0xff] }
   0x2   :  { %v558_v2 = vld [vmem:[%s805_s1] ss:$0 sm:$0xff]  ;;  %v20_v8 = vld [vmem:[%s804_s0 + $0x18] sm:$0xff]  ;;  %v22_v11 = vld [vmem:[%s804_s0 + $0x28] sm:$0xff] }
   0x3   :  { %v56_v3 = vsub.f32 %v17_v0, %v558_v2  ;;  %v57_v4 = vsub.f32 %v18_v1, %v558_v2  ;;  %v565_v5 = vld [vmem:[%s806_s2] ss:$0 sm:$0xff]  ;;  %v58_v9 = vsub.f32 %v19_v7, %v558_v2  ;;  %v59_v14 = vsub.f32 %v20_v8, %v558_v2  ;;  %v23_v16 = vld [vmem:[%s804_s0 + $0x30] sm:$0xff]  ;;  %v24_v17 = vld [vmem:[%s804_s0 + $0x38] sm:$0xff] }
   0x4   :  { %v570_v6 = vld [vmem:[%s807_s3] ss:$0 sm:$0xff]  ;;  %v61_v19 = vsub.f32 %v22_v11, %v558_v2  ;;  %v62_v20 = vsub.f32 %v23_v16, %v558_v2  ;;  %v63_v21 = vsub.f32 %v24_v17, %v558_v2  ;;  %v26_v35 = vld [vmem:[%s804_s0 + $0x48] sm:$0xff]  ;;  %v27_v40 = vld [vmem:[%s804_s0 + $0x50] sm:$0xff] }
   0x5   :  { %v21_v10 = vld [vmem:[%s804_s0 + $0x20] sm:$0xff]  ;;  %v95_v12 = vmul.f32 %v565_v5, %v56_v3  ;;  %v96_v13 = vmul.f32 %v565_v5, %v57_v4  ;;  %v97_v18 = vmul.f32 %v565_v5, %v58_v9  ;;  %v98_v24 = vmul.f32 %v565_v5, %v59_v14  ;;  %v28_v41 = vld [vmem:[%s804_s0 + $0x58] sm:$0xff]  ;;  %v30_v51 = vld [vmem:[%s804_s0 + $0x68] sm:$0xff] }
   0x6   :  { %v60_v15 = vsub.f32 %v21_v10, %v558_v2  ;;  %v100_v27 = vmul.f32 %v565_v5, %v61_v19  ;;  %v101_v28 = vmul.f32 %v565_v5, %v62_v20  ;;  %v102_v29 = vmul.f32 %v565_v5, %v63_v21  ;;  %v25_v30 = vld [vmem:[%s804_s0 + $0x40] sm:$0xff]  ;;  %v31_v56 = vld [vmem:[%s804_s0 + $0x70] sm:$0xff]  ;;  %v32_v57 = vld [vmem:[%s804_s0 + $0x78] sm:$0xff] }
   0x7   :  { %v134_v22 = vadd.f32 %v570_v6, %v95_v12  ;;  %v135_v23 = vadd.f32 %v570_v6, %v96_v13  ;;  %v136_v26 = vadd.f32 %v570_v6, %v97_v18  ;;  %v137_v33 = vadd.f32 %v570_v6, %v98_v24  ;;  %v29_v46 = vld [vmem:[%s804_s0 + $0x60] sm:$0xff]  ;;  %v34_v18 = vld [vmem:[%s804_s0 + $0x88] sm:$0xff]  ;;  %v36_v24 = vld [vmem:[%s804_s0 + $0x98] sm:$0xff] }
   0x8   :  { %v99_v25 = vmul.f32 %v565_v5, %v60_v15  ;;  %v139_v37 = vadd.f32 %v570_v6, %v100_v27  ;;  %v140_v38 = vadd.f32 %v570_v6, %v101_v28  ;;  %v141_v39 = vadd.f32 %v570_v6, %v102_v29  ;;  %v33_v9 = vld [vmem:[%s804_s0 + $0x80] sm:$0xff] }
   0x9   :  { %v166_v31 = vmax.f32 %v134_v22, 0.0  ;;  %v167_v32 = vmax.f32 %v135_v23, 0.0  ;;  %v168_v36 = vmax.f32 %v136_v26, 0.0  ;;  %v169_v43 = vmax.f32 %v137_v33, 0.0  ;;  %v35_v23 = vld [vmem:[%s804_s0 + $0x90] sm:$0xff]  ;;  %v37_v29 = vld [vmem:[%s804_s0 + $0xa0] sm:$0xff] }
   0xa   :  { %v138_v34 = vadd.f32 %v570_v6, %v99_v25  ;;  %v64_v45 = vsub.f32 %v25_v30, %v558_v2  ;;  %v171_v47 = vmax.f32 %v139_v37, 0.0  ;;  %v172_v48 = vmax.f32 %v140_v38, 0.0 }
   0xb   :  { %v432_v42 = vpack.c.bf16 %v167_v32, %v166_v31  ;;  %v173_v49 = vmax.f32 %v141_v39, 0.0  ;;  %v65_v50 = vsub.f32 %v26_v35, %v558_v2  ;;  %v437_v52 = vpack.c.bf16 %v169_v43, %v168_v36  ;;  %v39_v39 = vld [vmem:[%s804_s0 + $0xb0] sm:$0xff] }
   0xc   :  { %v170_v44 = vmax.f32 %v138_v34, 0.0  ;;  %v103_v53 = vmul.f32 %v565_v5, %v64_v45  ;;  %v66_v54 = vsub.f32 %v27_v40, %v558_v2  ;;  %v67_v55 = vsub.f32 %v28_v41, %v558_v2  ;;  %v38_v34 = vld [vmem:[%s804_s0 + $0xa8] sm:$0xff] }
   0xd   :  { %433 = vst [vmem:[%s808_s4] sm:$0xff] %v432_v42   ;;  %v447_v59 = vpack.c.bf16 %v173_v49, %v172_v48  ;;  %v104_v60 = vmul.f32 %v565_v5, %v65_v50  ;;  %v68_v61 = vsub.f32 %v29_v46, %v558_v2  ;;  %509 = vst [vmem:[%s808_s4 + $0x8] sm:$0xff] %v437_v52   ;;  %v41_v49 = vld [vmem:[%s804_s0 + $0xc0] sm:$0xff] }
   0xe   :  { %v442_v58 = vpack.c.bf16 %v171_v47, %v170_v44  ;;  %v142_v62 = vadd.f32 %v570_v6, %v103_v53  ;;  %v105_v63 = vmul.f32 %v565_v5, %v66_v54  ;;  %v106_v0 = vmul.f32 %v565_v5, %v67_v55  ;;  %v40_v44 = vld [vmem:[%s804_s0 + $0xb8] sm:$0xff] }
   0xf   :  { %v69_v1 = vsub.f32 %v30_v51, %v558_v2  ;;  %511 = vst [vmem:[%s808_s4 + $0x18] sm:$0xff] %v447_v59   ;;  %v143_v3 = vadd.f32 %v570_v6, %v104_v60  ;;  %v107_v4 = vmul.f32 %v565_v5, %v68_v61  ;;  %v70_v7 = vsub.f32 %v31_v56, %v558_v2 }
  0x10   :  { %510 = vst [vmem:[%s808_s4 + $0x10] sm:$0xff] %v442_v58   ;;  %v71_v8 = vsub.f32 %v32_v57, %v558_v2  ;;  %v174_v10 = vmax.f32 %v142_v62, 0.0  ;;  %v144_v11 = vadd.f32 %v570_v6, %v105_v63  ;;  %v145_v12 = vadd.f32 %v570_v6, %v106_v0  ;;  %v42_v58 = vld [vmem:[%s804_s0 + $0xc8] sm:$0xff] }
  0x11   :  { %v108_v13 = vmul.f32 %v565_v5, %v69_v1  ;;  %v175_v14 = vmax.f32 %v143_v3, 0.0  ;;  %v146_v15 = vadd.f32 %v570_v6, %v107_v4  ;;  %v109_v16 = vmul.f32 %v565_v5, %v70_v7  ;;  %v43_v4 = vld [vmem:[%s804_s0 + $0xd0] sm:$0xff]  ;;  %v44_v7 = vld [vmem:[%s804_s0 + $0xd8] sm:$0xff] }
  0x12   :  { %v110_v17 = vmul.f32 %v565_v5, %v71_v8  ;;  %v176_v19 = vmax.f32 %v144_v11, 0.0  ;;  %v177_v20 = vmax.f32 %v145_v12, 0.0  ;;  %v72_v22 = vsub.f32 %v33_v9, %v558_v2  ;;  %v45_v12 = vld [vmem:[%s804_s0 + $0xe0] sm:$0xff] }
  0x13   :  { %v147_v21 = vadd.f32 %v570_v6, %v108_v13  ;;  %v452_v25 = vpack.c.bf16 %v175_v14, %v174_v10  ;;  %v178_v26 = vmax.f32 %v146_v15, 0.0  ;;  %v148_v27 = vadd.f32 %v570_v6, %v109_v16 }
  0x14   :  { %v149_v28 = vadd.f32 %v570_v6, %v110_v17  ;;  %v457_v30 = vpack.c.bf16 %v177_v20, %v176_v19  ;;  %v73_v32 = vsub.f32 %v34_v18, %v558_v2  ;;  %v111_v33 = vmul.f32 %v565_v5, %v72_v22  ;;  %v46_v17 = vld [vmem:[%s804_s0 + $0xe8] sm:$0xff]  ;;  %v47_v22 = vld [vmem:[%s804_s0 + $0xf0] sm:$0xff] }
  0x15   :  { %v179_v31 = vmax.f32 %v147_v21, 0.0  ;;  %512 = vst [vmem:[%s808_s4 + $0x20] sm:$0xff] %v452_v25   ;;  %v180_v35 = vmax.f32 %v148_v27, 0.0  ;;  %v74_v37 = vsub.f32 %v35_v23, %v558_v2  ;;  %v75_v38 = vsub.f32 %v36_v24, %v558_v2 }
  0x16   :  { %v181_v36 = vmax.f32 %v149_v28, 0.0  ;;  %513 = vst [vmem:[%s808_s4 + $0x28] sm:$0xff] %v457_v30   ;;  %v112_v41 = vmul.f32 %v565_v5, %v73_v32  ;;  %v150_v42 = vadd.f32 %v570_v6, %v111_v33  ;;  %v76_v43 = vsub.f32 %v37_v29, %v558_v2 }
  0x17   :  { %v462_v40 = vpack.c.bf16 %v179_v31, %v178_v26  ;;  %v113_v46 = vmul.f32 %v565_v5, %v74_v37  ;;  %v114_v47 = vmul.f32 %v565_v5, %v75_v38  ;;  %v77_v48 = vsub.f32 %v38_v34, %v558_v2  ;;  %v48_v31 = vld [vmem:[%s804_s0 + $0xf8] sm:$0xff] }
  0x18   :  { %v467_v45 = vpack.c.bf16 %v181_v36, %v180_v35  ;;  %v151_v50 = vadd.f32 %v570_v6, %v112_v41  ;;  %v182_v51 = vmax.f32 %v150_v42, 0.0  ;;  %v115_v52 = vmul.f32 %v565_v5, %v76_v43 }
  0x19   :  { %514 = vst [vmem:[%s808_s4 + $0x30] sm:$0xff] %v462_v40   ;;  %v78_v53 = vsub.f32 %v39_v39, %v558_v2  ;;  %v152_v54 = vadd.f32 %v570_v6, %v113_v46  ;;  %v153_v55 = vadd.f32 %v570_v6, %v114_v47  ;;  %v116_v56 = vmul.f32 %v565_v5, %v77_v48 }
  0x1a   :  { %515 = vst [vmem:[%s808_s4 + $0x38] sm:$0xff] %v467_v45   ;;  %v79_v57 = vsub.f32 %v40_v44, %v558_v2  ;;  %v183_v59 = vmax.f32 %v151_v50, 0.0  ;;  %v154_v60 = vadd.f32 %v570_v6, %v115_v52  ;;  %v80_v62 = vsub.f32 %v41_v49, %v558_v2 }
  0x1b   :  { %v117_v61 = vmul.f32 %v565_v5, %v78_v53  ;;  %v184_v63 = vmax.f32 %v152_v54, 0.0  ;;  %v185_v0 = vmax.f32 %v153_v55, 0.0  ;;  %v155_v1 = vadd.f32 %v570_v6, %v116_v56 }
  0x1c   :  { %v118_v3 = vmul.f32 %v565_v5, %v79_v57  ;;  %v472_v8 = vpack.c.bf16 %v183_v59, %v182_v51  ;;  %v186_v9 = vmax.f32 %v154_v60, 0.0  ;;  %v81_v11 = vsub.f32 %v42_v58, %v558_v2 }
  0x1d   :  { %v156_v10 = vadd.f32 %v570_v6, %v117_v61  ;;  %v477_v13 = vpack.c.bf16 %v185_v0, %v184_v63  ;;  %v187_v14 = vmax.f32 %v155_v1, 0.0  ;;  %v119_v16 = vmul.f32 %v565_v5, %v80_v62 }
  0x1e   :  { %v157_v15 = vadd.f32 %v570_v6, %v118_v3  ;;  %516 = vst [vmem:[%s808_s4 + $0x40] sm:$0xff] %v472_v8   ;;  %v120_v19 = vmul.f32 %v565_v5, %v81_v11  ;;  %v82_v20 = vsub.f32 %v43_v4, %v558_v2  ;;  %v83_v21 = vsub.f32 %v44_v7, %v558_v2 }
  0x1f   :  { %v188_v18 = vmax.f32 %v156_v10, 0.0  ;;  %517 = vst [vmem:[%s808_s4 + $0x48] sm:$0xff] %v477_v13   ;;  %v482_v23 = vpack.c.bf16 %v187_v14, %v186_v9  ;;  %v158_v25 = vadd.f32 %v570_v6, %v119_v16  ;;  %v84_v26 = vsub.f32 %v45_v12, %v558_v2 }
  0x20   :  { %v189_v24 = vmax.f32 %v157_v15, 0.0  ;;  %v159_v27 = vadd.f32 %v570_v6, %v120_v19  ;;  %v121_v28 = vmul.f32 %v565_v5, %v82_v20  ;;  %v122_v29 = vmul.f32 %v565_v5, %v83_v21 }
  0x21   :  { %v85_v30 = vsub.f32 %v46_v17, %v558_v2  ;;  %518 = vst [vmem:[%s808_s4 + $0x50] sm:$0xff] %v482_v23   ;;  %v190_v33 = vmax.f32 %v158_v25, 0.0  ;;  %v123_v34 = vmul.f32 %v565_v5, %v84_v26  ;;  %v86_v35 = vsub.f32 %v47_v22, %v558_v2 }
  0x22   :  { %v487_v32 = vpack.c.bf16 %v189_v24, %v188_v18  ;;  %v191_v36 = vmax.f32 %v159_v27, 0.0  ;;  %v160_v37 = vadd.f32 %v570_v6, %v121_v28  ;;  %v161_v38 = vadd.f32 %v570_v6, %v122_v29 }
  0x23   :  { %v124_v39 = vmul.f32 %v565_v5, %v85_v30  ;;  %v162_v40 = vadd.f32 %v570_v6, %v123_v34  ;;  %v87_v41 = vsub.f32 %v48_v31, %v558_v2  ;;  %v125_v42 = vmul.f32 %v565_v5, %v86_v35 }
  0x24   :  { %519 = vst [vmem:[%s808_s4 + $0x58] sm:$0xff] %v487_v32   ;;  %v492_v43 = vpack.c.bf16 %v191_v36, %v190_v33  ;;  %v192_v44 = vmax.f32 %v160_v37, 0.0  ;;  %v193_v45 = vmax.f32 %v161_v38, 0.0 }
  0x25   :  { %v163_v46 = vadd.f32 %v570_v6, %v124_v39  ;;  %v194_v47 = vmax.f32 %v162_v40, 0.0  ;;  %v126_v48 = vmul.f32 %v565_v5, %v87_v41  ;;  %v164_v49 = vadd.f32 %v570_v6, %v125_v42 }
  0x26   :  { %520 = vst [vmem:[%s808_s4 + $0x60] sm:$0xff] %v492_v43   ;;  %v497_v50 = vpack.c.bf16 %v193_v45, %v192_v44 }
  0x27   :  { %v195_v51 = vmax.f32 %v163_v46, 0.0  ;;  %v165_v2 = vadd.f32 %v570_v6, %v126_v48  ;;  %v196_v52 = vmax.f32 %v164_v49, 0.0 }
  0x28   :  { %521 = vst [vmem:[%s808_s4 + $0x68] sm:$0xff] %v497_v50  }
  0x29   :  { %v502_v53 = vpack.c.bf16 %v195_v51, %v194_v47  ;;  %v197_v54 = vmax.f32 %v165_v2, 0.0 }
  0x2b   :  { %522 = vst [vmem:[%s808_s4 + $0x70] sm:$0xff] %v502_v53   ;;  %v507_v5 = vpack.c.bf16 %v197_v54, %v196_v52 }
  0x2d   :  { %523 = vst [vmem:[%s808_s4 + $0x78] sm:$0xff] %v507_v5  }

// kernel: preact_block_forward.6
= control target key start
LH: loop header
LB: loop body
LE: loop exit
PB: predicated region body
PF: predicated region fallthrough
CT: control target
= control target key end

     0   :  { %s3049_s15 = smov 0   ;;  %s3051_s16 = smov 0   ;;  %s3482_s0 = inlined_call_operand.vmem [shape: bf16[4,2,9,9,64], index: 0, kind: input, shape index: {}]   ;;  %s3483_s1 = inlined_call_operand.vmem [shape: bf16[9,64,128], index: 1, kind: input, shape index: {}]   ;;  %s3484_s2 = inlined_call_operand.vmem [shape: bf16[2,8,8,128], index: 2, kind: output, shape index: {0}]   ;;  %s3485_s3 = inlined_call_operand.vmem [shape: f32[2,1,128], index: 3, kind: output, shape index: {1}]   ;;  %s3486_s4 = inlined_call_operand.vmem [shape: f32[2,1,128], index: 4, kind: output, shape index: {2}]  }
   0x1   :  { %s3053_s17 = smov 0  }
   0x2 LB: > { %s2347_s18 = sadd.s32 4294967295, %s3022_s17   ;;  %s3066_s19 = sadd.s32 1, %s3022_s17   ;;  %s3022_s17 = sphi %s3053_s17, %s3491_s17   ;;  %s3018_s16 = sphi %s3051_s16, %s3490_s16   ;;  %s3014_s15 = sphi %s3049_s15, %s3489_s15  }
   0x3   : > { %s19_s20 = ssub.s32 %s3022_s17, %s3066_s19  ;;  %s22_s21 = sadd.s32 1, %s3018_s16 }
   0x4   : > { %p20_p0 = scmp.eq.s32.totalorder %s19_s20, 0  ;;  %p29_p1 = scmp.ne.s32.totalorder %s3018_s16, %s3014_s15 }
   0x5   : > { %p30_p2 = scmp.eq.s32.totalorder %s3022_s17, 0  ;;  %p2350_p4 = scmp.ge.s32.totalorder %s3022_s17, 2 }
   0x6   : > { %s3075_s22 = scalar_select %p20_p0, %s3018_s16, %s22_s21  }
   0x7   : > { %p31_p3 = por %p30_p2, %p29_p1  ;;  %157 = sbr.rel (%p2350_p4) target bundleno = 37 (0x25), region = 20 }
   0xe   : > { %160 = sbr.rel (!%p31_p3) target bundleno = 37 (0x25), region = 24  ;;  %s162_s23 = sand.u32 (%p31_p3), 1, %s3018_s16  }
   0xf   : > { %s2914_s24 = smul.u32 (%p31_p3), 72, %s3022_s17 }
  0x10   : > { %s2913_s25 = smul.u32 (%p31_p3), 288, %s162_s23 }
  0x11   : > { %s3083_s28 = scalar_lea.vmem (%p31_p3), %s3482_s0, %s2914_s24 }
  0x12   : > { %v183_v0 = vld [vmem:[%s3083_s28] sm:$0xff] (%p31_p3)   ;;  %v187_v1 = vld [vmem:[%s3083_s28 + $0x8] sm:$0xff] (%p31_p3)   ;;  %v191_v2 = vld [vmem:[%s3083_s28 + $0x10] sm:$0xff] (%p31_p3)   ;;  %s3088_s29 = scalar_lea.vmem (%p31_p3), [#allocation2], %s2913_s25 }
  0x13   : > { %184 = vst [vmem:[%s3088_s29] sm:$0xff] (%p31_p3), %v183_v0   ;;  %188 = vst [vmem:[%s3088_s29 + $0x8] sm:$0xff] (%p31_p3), %v187_v1   ;;  %v195_v3 = vld [vmem:[%s3083_s28 + $0x18] sm:$0xff] (%p31_p3)   ;;  %v199_v4 = vld [vmem:[%s3083_s28 + $0x20] sm:$0xff] (%p31_p3)  }
  0x14   : > { %192 = vst [vmem:[%s3088_s29 + $0x10] sm:$0xff] (%p31_p3), %v191_v2   ;;  %v203_v5 = vld [vmem:[%s3083_s28 + $0x28] sm:$0xff] (%p31_p3)   ;;  %196 = vst [vmem:[%s3088_s29 + $0x18] sm:$0xff] (%p31_p3), %v195_v3   ;;  %v207_v6 = vld [vmem:[%s3083_s28 + $0x30] sm:$0xff] (%p31_p3)  }
  0x15   : > { %200 = vst [vmem:[%s3088_s29 + $0x20] sm:$0xff] %v199_v4   ;;  %204 = vst [vmem:[%s3088_s29 + $0x28] sm:$0xff] %v203_v5   ;;  %v211_v7 = vld [vmem:[%s3083_s28 + $0x38] sm:$0xff]   ;;  %v215_v8 = vld [vmem:[%s3083_s28 + $0x40] sm:$0xff]  }
  0x16   : > { %208 = vst [vmem:[%s3088_s29 + $0x30] sm:$0xff] %v207_v6   ;;  %212 = vst [vmem:[%s3088_s29 + $0x38] sm:$0xff] %v211_v7   ;;  %v219_v9 = vld [vmem:[%s3083_s28 + $0x90] sm:$0xff]   ;;  %v223_v10 = vld [vmem:[%s3083_s28 + $0x98] sm:$0xff]  }
  0x17   : > { %216 = vst [vmem:[%s3088_s29 + $0x40] sm:$0xff] %v215_v8   ;;  %v227_v11 = vld [vmem:[%s3083_s28 + $0xa0] sm:$0xff]   ;;  %220 = vst [vmem:[%s3088_s29 + $0x48] sm:$0xff] %v219_v9   ;;  %v231_v12 = vld [vmem:[%s3083_s28 + $0xa8] sm:$0xff]  }
  0x18   : > { %224 = vst [vmem:[%s3088_s29 + $0x50] sm:$0xff] %v223_v10   ;;  %228 = vst [vmem:[%s3088_s29 + $0x58] sm:$0xff] %v227_v11   ;;  %v235_v13 = vld [vmem:[%s3083_s28 + $0xb0] sm:$0xff]   ;;  %v239_v14 = vld [vmem:[%s3083_s28 + $0xb8] sm:$0xff]  }
  0x19   : > { %232 = vst [vmem:[%s3088_s29 + $0x60] sm:$0xff] %v231_v12   ;;  %236 = vst [vmem:[%s3088_s29 + $0x68] sm:$0xff] %v235_v13   ;;  %v243_v15 = vld [vmem:[%s3083_s28 + $0xc0] sm:$0xff]   ;;  %v247_v16 = vld [vmem:[%s3083_s28 + $0xc8] sm:$0xff]  }
  0x1a   : > { %240 = vst [vmem:[%s3088_s29 + $0x70] sm:$0xff] %v239_v14   ;;  %v251_v17 = vld [vmem:[%s3083_s28 + $0xd0] sm:$0xff]   ;;  %244 = vst [vmem:[%s3088_s29 + $0x78] sm:$0xff] %v243_v15   ;;  %v255_v18 = vld [vmem:[%s3083_s28 + $0x120] sm:$0xff]  }
  0x1b   : > { %248 = vst [vmem:[%s3088_s29 + $0x80] sm:$0xff] %v247_v16   ;;  %252 = vst [vmem:[%s3088_s29 + $0x88] sm:$0xff] %v251_v17   ;;  %v259_v19 = vld [vmem:[%s3083_s28 + $0x128] sm:$0xff]   ;;  %v263_v20 = vld [vmem:[%s3083_s28 + $0x130] sm:$0xff]  }
  0x1c   : > { %256 = vst [vmem:[%s3088_s29 + $0x90] sm:$0xff] %v255_v18   ;;  %260 = vst [vmem:[%s3088_s29 + $0x98] sm:$0xff] %v259_v19   ;;  %v267_v21 = vld [vmem:[%s3083_s28 + $0x138] sm:$0xff]   ;;  %v271_v22 = vld [vmem:[%s3083_s28 + $0x140] sm:$0xff]  }
  0x1d   : > { %264 = vst [vmem:[%s3088_s29 + $0xa0] sm:$0xff] %v263_v20   ;;  %v275_v23 = vld [vmem:[%s3083_s28 + $0x148] sm:$0xff]   ;;  %268 = vst [vmem:[%s3088_s29 + $0xa8] sm:$0xff] %v267_v21   ;;  %v279_v24 = vld [vmem:[%s3083_s28 + $0x150] sm:$0xff]  }
  0x1e   : > { %272 = vst [vmem:[%s3088_s29 + $0xb0] sm:$0xff] %v271_v22   ;;  %276 = vst [vmem:[%s3088_s29 + $0xb8] sm:$0xff] %v275_v23   ;;  %v283_v25 = vld [vmem:[%s3083_s28 + $0x158] sm:$0xff]   ;;  %v287_v26 = vld [vmem:[%s3083_s28 + $0x160] sm:$0xff]  }
  0x1f   : > { %280 = vst [vmem:[%s3088_s29 + $0xc0] sm:$0xff] %v279_v24   ;;  %284 = vst [vmem:[%s3088_s29 + $0xc8] sm:$0xff] %v283_v25   ;;  %v291_v27 = vld [vmem:[%s3083_s28 + $0x1b0] sm:$0xff]   ;;  %v295_v28 = vld [vmem:[%s3083_s28 + $0x1b8] sm:$0xff]  }
  0x20   : > { %288 = vst [vmem:[%s3088_s29 + $0xd0] sm:$0xff] %v287_v26   ;;  %v299_v29 = vld [vmem:[%s3083_s28 + $0x1c0] sm:$0xff]   ;;  %292 = vst [vmem:[%s3088_s29 + $0xd8] sm:$0xff] %v291_v27   ;;  %v303_v30 = vld [vmem:[%s3083_s28 + $0x1c8] sm:$0xff]  }
  0x21   : > { %296 = vst [vmem:[%s3088_s29 + $0xe0] sm:$0xff] %v295_v28   ;;  %300 = vst [vmem:[%s3088_s29 + $0xe8] sm:$0xff] %v299_v29   ;;  %v307_v31 = vld [vmem:[%s3083_s28 + $0x1d0] sm:$0xff]   ;;  %v311_v32 = vld [vmem:[%s3083_s28 + $0x1d8] sm:$0xff]  }
  0x22   : > { %304 = vst [vmem:[%s3088_s29 + $0xf0] sm:$0xff] %v303_v30   ;;  %308 = vst [vmem:[%s3088_s29 + $0xf8] sm:$0xff] %v307_v31   ;;  %v315_v33 = vld [vmem:[%s3083_s28 + $0x1e0] sm:$0xff]   ;;  %v319_v34 = vld [vmem:[%s3083_s28 + $0x1e8] sm:$0xff]  }
  0x23   : > { %312 = vst [vmem:[%s3088_s29 + $0x100] sm:$0xff] %v311_v32   ;;  %v323_v35 = vld [vmem:[%s3083_s28 + $0x1f0] sm:$0xff]   ;;  %316 = vst [vmem:[%s3088_s29 + $0x108] sm:$0xff] %v315_v33  }
  0x24   : > { %320 = vst [vmem:[%s3088_s29 + $0x110] sm:$0xff] %v319_v34   ;;  %324 = vst [vmem:[%s3088_s29 + $0x118] sm:$0xff] %v323_v35  }
  0x25 PF: > { %p2352_p5 = scmp.ge.s32.totalorder %s3022_s17, 1  ;;  %p492_p6 = scmp.lt.s32.totalorder %s3022_s17, 3 }
  0x27   : > { %p493_p7 = pnand %p2352_p5, %p492_p6 }
  0x28   : > { %v2940_v36 = vld [vmem:[%s3483_s1 + $0x20] sm:$0xff] (!%p493_p7)   ;;  %s499_s6 = sand.u32 (!%p493_p7), 1, %s3014_s15   ;;  %v2942_v38 = vld [vmem:[%s3483_s1 + $0x28] sm:$0xff] (!%p493_p7)   ;;  %v2944_v40 = vld [vmem:[%s3483_s1 + $0x30] sm:$0xff] (!%p493_p7)   ;;  %vm620_vm0 = vcmask (!%p493_p7), 523264   ;;  %p530_p8 = scmp.lt.s32.totalorder (!%p493_p7), %s2347_s18, 1 }
  0x29   : > { %496 = sbr.rel (%p493_p7) target bundleno = 372 (0x174), region = 65  ;;  %v2941_v37 = vld [vmem:[%s3483_s1 + $0x80] sm:$0xff] (!%p493_p7)   ;;  %2697 = vmatprep.subr.bf16.mxu1 (!%p493_p7), %v2940_v36  ;;  %v2943_v39 = vld [vmem:[%s3483_s1 + $0x88] sm:$0xff] (!%p493_p7)   ;;  %v2945_v41 = vld [vmem:[%s3483_s1 + $0x90] sm:$0xff] (!%p493_p7)   ;;  %vm835_vm1 = vsmask.f32 (!%p493_p7), 3328 }
  0x2a   : > { %s2915_s9 = smul.u32 (!%p493_p7), 288, %s499_s6  ;;  %2761 = vmatprep.subr.bf16.mxu0 (!%p493_p7), %v2941_v37  ;;  %2698 = vmatpush3.bf16.msra.mxu1 (!%p493_p7), %v2940_v36  ;;  %v2946_v42 = vld [vmem:[%s3483_s1 + $0x38] sm:$0xff] (!%p493_p7)   ;;  %v2951_v47 = vld [vmem:[%s3483_s1] sm:$0xff] (!%p493_p7)   ;;  %v2954_v50 = vld [vmem:[%s3483_s1 + $0x8] sm:$0xff] (!%p493_p7)   ;;  %vm836_vm2 = vsmask.f32 (!%p493_p7), 7440 }
  0x2b   : > { %2762 = vmatpush3.bf16.msra.mxu0 (!%p493_p7), %v2941_v37  ;;  %2699 = vmatprep.subr.bf16.mxu1 (!%p493_p7), %v2942_v38  ;;  %v2947_v43 = vld [vmem:[%s3483_s1 + $0x98] sm:$0xff] (!%p493_p7)   ;;  %v2953_v48 = vld [vmem:[%s3483_s1 + $0xa0] sm:$0xff] (!%p493_p7)   ;;  %v2955_v51 = vld [vmem:[%s3483_s1 + $0xa8] sm:$0xff] (!%p493_p7)  }
  0x2c   : > { %2763 = vmatprep.subr.bf16.mxu0 (!%p493_p7), %v2943_v39  ;;  %s3186_s27 = scalar_lea.vmem (!%p493_p7), [#allocation2], %s2915_s9  ;;  %v2959_v55 = vld [vmem:[%s3483_s1 + $0x10] sm:$0xff] (!%p493_p7)   ;;  %v2962_v58 = vld [vmem:[%s3483_s1 + $0x18] sm:$0xff] (!%p493_p7)   ;;  %v2966_v9 = vld [vmem:[%s3483_s1 + $0x40] sm:$0xff] (!%p493_p7)  }
  0x2d   : > { %v2948_v44 = vld [vmem:[%s3186_s27 + $0x48] ss:$8 sps:$4 sm:$0xff] (!%p493_p7)   ;;  %v2949_v45 = vld [vmem:[%s3186_s27 + $0xd8] ss:$8 sps:$4 sm:$0xff] (!%p493_p7)   ;;  %v2472_v62 = vld [vmem:[%s3186_s27 + $0x94] sm:$0x1] (!%p493_p7) }
  0x2e   : > { %2700 = vmatpush3.bf16.msra.mxu1 (!%p493_p7), %v2942_v38  ;;  %2705 = vmatprep.mubr.msk.bf16.mxu1 (!%p493_p7), %vm620_vm0, %v2948_v44  ;;  %v2950_v46 = vld [vmem:[%s3186_s27 + $0x58] ss:$8 sps:$4 sm:$0xff] (!%p493_p7)   ;;  %v2952_v49 = vld [vmem:[%s3186_s27 + $0xe8] ss:$8 sps:$4 sm:$0xff] (!%p493_p7)   ;;  %v2474_v2 = vld [vmem:[%s3186_s27 + $0x9c] sm:$0x1] (!%p493_p7) }
  0x2f   : > { %2764 = vmatpush3.bf16.msra.mxu0 (!%p493_p7), %v2943_v39  ;;  %2701 = vmatprep.subr.bf16.mxu1 (!%p493_p7), %v2944_v40  ;;  %v2956_v52 = vld [vmem:[%s3186_s27 + $0x68] ss:$8 sps:$4 sm:$0xff] (!%p493_p7)   ;;  %v2957_v53 = vld [vmem:[%s3186_s27 + $0xf8] ss:$8 sps:$4 sm:$0xff] (!%p493_p7)   ;;  %v1400_v3 = vshll.u32 (!%p493_p7), %v2472_v62, 16  ;;  %v1414_v8 = vshll.u32 (!%p493_p7), %v2474_v2, 16  ;;  %vm3239_vm3 = vmor (!%p493_p7), %vm835_vm1, %vm836_vm2 }
  0x30   : > { %2765 = vmatprep.subr.bf16.mxu0 %v2945_v41  ;;  %2769 = vmatprep.mubr.msk.bf16.mxu0 %vm620_vm0, %v2949_v45  ;;  %v2958_v54 = vld [vmem:[%s3186_s27 + $0x78] ss:$8 sps:$4 sm:$0xff]   ;;  %v2960_v56 = vld [vmem:[%s3186_s27 + $0x108] ss:$8 sps:$4 sm:$0xff]   ;;  %v2476_v21 = vld [vmem:[%s3186_s27 + $0xa4] sm:$0x1] }
  0x31   : > { %v2961_v57 = vld [vmem:[%s3483_s1 + $0xb0] sm:$0xff]   ;;  %v2963_v59 = vld [vmem:[%s3483_s1 + $0xb8] sm:$0xff]   ;;  %v2964_v60 = vld [vmem:[%s3186_s27] ss:$8 sps:$4 sm:$0xff]   ;;  %v1402_v11 = vrot.slane %v1400_v3, 5  ;;  %v1416_v16 = vrot.slane %v1414_v8, 5 }
  0x32   : > { %2702 = vmatpush3.bf16.msra.mxu1 %v2944_v40  ;;  %v2471_v61 = vld [vmem:[%s3186_s27 + $0x90] sm:$0xf]  ;;  %v2473_v63 = vld [vmem:[%s3186_s27 + $0x98] sm:$0xf]  ;;  %v3246_v14 = vld [vmem:[%s3483_s1 + $0xc0] sm:$0xff]   ;;  %v1428_v28 = vshll.u32 %v2476_v21, 16 }
  0x33   : > { %2766 = vmatpush3.bf16.msra.mxu0 %v2945_v41  ;;  %2703 = vmatprep.subr.bf16.mxu1 %v2946_v42  ;;  %v1391_v0 = vshrl.u32 %v2471_v61, 16  ;;  %v1394_v1 = vshll.u32 %v2471_v61, 16  ;;  %v1405_v4 = vshrl.u32 %v2473_v63, 16  ;;  %v1408_v5 = vshll.u32 %v2473_v63, 16  ;;  %v2965_v17 = vld [vmem:[%s3186_s27 + $0x10] ss:$8 sps:$4 sm:$0xff]  }
  0x34   : > { %2767 = vmatprep.subr.bf16.mxu0 %v2947_v43  ;;  %v2968_v18 = vld [vmem:[%s3483_s1 + $0x48] sm:$0xff]   ;;  %v2475_v20 = vld [vmem:[%s3186_s27 + $0xa0] sm:$0xf]  ;;  %v1430_v36 = vrot.slane %v1428_v28, 5  ;;  %v2972_v38 = vld [vmem:[%s3483_s1 + $0x50] sm:$0xff]   ;;  %s3493_s18 = smov (!%p530_p8, %s2347_s18), 1 }
  0x35   : > { %v1393_v6 = vrot.slane %v1391_v0, 4  ;;  %v1396_v7 = vrot.slane %v1394_v1, 5  ;;  %v1407_v12 = vrot.slane %v1405_v4, 4  ;;  %v1410_v13 = vrot.slane %v1408_v5, 5  ;;  %v2477_v23 = vld [vmem:[%s3186_s27 + $0xa8] sm:$0xf]  ;;  %s537_s28 = scalar_lea.vmem %s3485_s3, %s3493_s18  ;;  %s540_s5 = scalar_lea.vmem %s3486_s4, %s3493_s18 }
  0x36   : > { %2704 = vmatpush3.bf16.msra.mxu1 %v2946_v42  ;;  %v2478_v24 = vld [vmem:[%s3186_s27 + $0xac] sm:$0x1]  ;;  %v1419_v25 = vshrl.u32 %v2475_v20, 16  ;;  %v1422_v27 = vshll.u32 %v2475_v20, 16  ;;  %v1433_v29 = vshrl.u32 %v2477_v23, 16  ;;  %v1436_v32 = vshll.u32 %v2477_v23, 16 }
  0x37   : > { %2768 = vmatpush3.bf16.msra.mxu0 %v2947_v43  ;;  %2713 = vmatprep.subr.bf16.mxu1 %v2951_v47  ;;  %v1397_v15 = vor.u32 %v1396_v7, %v1393_v6  ;;  %v1411_v19 = vor.u32 %v1410_v13, %v1407_v12  ;;  %v1442_v33 = vshll.u32 %v2478_v24, 16  ;;  %v2970_v44 = vld [vmem:[%s3186_s27 + $0x20] ss:$8 sps:$4 sm:$0xff]   ;;  %v2479_v45 = vld [vmem:[%s3186_s27 + $0xb0] sm:$0xf] }
  0x38   : > { %2777 = vmatprep.subr.bf16.mxu0 %v2953_v48  ;;  %v1421_v31 = vrot.slane %v1419_v25, 4  ;;  %v1424_v35 = vrot.slane %v1422_v27, 5  ;;  %v1435_v37 = vrot.slane %v1433_v29, 4  ;;  %v1438_v40 = vrot.slane %v1436_v32, 5  ;;  %v2969_v61 = vld [vmem:[%s3483_s1 + $0xc8] sm:$0xff]  }
  0x39   : > { %2706 = vmatmul.mubr.msk.bf16.vlgmr.msra.gmra.mrb[0].mxu1 %vm620_vm0, %v2950_v46  ;;  %v1398_v22 = vrot.slane %v1397_v15, 4  ;;  %v1412_v26 = vrot.slane %v1411_v19, 4  ;;  %v1444_v41 = vrot.slane %v1442_v33, 5  ;;  %v2480_v46 = vld [vmem:[%s3186_s27 + $0xb4] sm:$0x1] }
  0x3a   : > { %2770 = vmatmul.mubr.msk.bf16.vlgmr.msra.gmra.mrb[0].mxu0 %vm620_vm0, %v2952_v49  ;;  %2714 = vmatpush3.bf16.msra.mxu1 %v2951_v47  ;;  %v1425_v42 = vor.u32 %v1424_v35, %v1421_v31  ;;  %v1439_v43 = vor.u32 %v1438_v40, %v1435_v37  ;;  %v2482_v49 = vld [vmem:[%s3186_s27 + $0xbc] sm:$0x1]  ;;  %v2971_v1 = vld [vmem:[%s3186_s27 + $0x30] ss:$8 sps:$4 sm:$0xff]   ;;  %v2483_v6 = vld [vmem:[%s3186_s27 + $0xc0] sm:$0xf] }
  0x3b   : > { %2778 = vmatpush3.bf16.msra.mxu0 %v2953_v48  ;;  %2715 = vmatprep.subr.bf16.mxu1 %v2954_v50  ;;  %v1403_v30 = vsel %vm3239_vm3, %v1398_v22, %v1402_v11  ;;  %v1417_v34 = vsel %vm3239_vm3, %v1412_v26, %v1416_v16  ;;  %v2481_v48 = vld [vmem:[%s3186_s27 + $0xb8] sm:$0xf]  ;;  %v2484_v7 = vld [vmem:[%s3186_s27 + $0xc4] sm:$0x1]  ;;  %v2485_v8 = vld [vmem:[%s3186_s27 + $0xc8] sm:$0xf] }
  0x3c   : > { %2779 = vmatprep.subr.bf16.mxu0 %v2955_v51  ;;  %2709 = vmatprep.mubr.msk.bf16.mxu1 %vm620_vm0, %v2956_v52  ;;  %v2495_v39 = vcombine.low %v1403_v30, %v1417_v34  ;;  %v1426_v47 = vrot.slane %v1425_v42, 4  ;;  %v1450_v52 = vshll.u32 %v2479_v45, 16  ;;  %v2486_v11 = vld [vmem:[%s3186_s27 + $0xcc] sm:$0x1]  ;;  %v1475_v12 = vshrl.u32 %v2483_v6, 16  ;;  %v2973_v16 = vld [vmem:[%s3483_s1 + $0xd0] sm:$0xff]  }
  0x3d   : > { %2773 = vmatprep.mubr.msk.bf16.mxu0 %vm620_vm0, %v2957_v53  ;;  %v1456_v53 = vshll.u32 %v2480_v46, 16  ;;  %v1478_v13 = vshll.u32 %v2483_v6, 16  ;;  %v1484_v15 = vshll.u32 %v2484_v7, 16  ;;  %v1489_v19 = vshrl.u32 %v2485_v8, 16  ;;  %v2975_v31 = vld [vmem:[%s3483_s1 + $0xd8] sm:$0xff]  }
  0x3e   : > { %2716 = vmatpush3.bf16.msra.mxu1 %v2954_v50  ;;  %v1447_v50 = vshrl.u32 %v2479_v45, 16  ;;  %v1452_v62 = vrot.slane %v1450_v52, 5  ;;  %v1492_v20 = vshll.u32 %v2485_v8, 16  ;;  %v1498_v21 = vshll.u32 %v2486_v11, 16  ;;  %v819_v34 = vld [vmem:[%s3186_s27] sm:$0xf] }
  0x3f   : > { %2780 = vmatpush3.bf16.msra.mxu0 %v2955_v51  ;;  %2717 = vmatprep.subr.bf16.mxu1 %v2959_v55  ;;  %v1440_v51 = vrot.slane %v1439_v43, 4  ;;  %v1458_v63 = vrot.slane %v1456_v53, 5  ;;  %v1477_v23 = vrot.slane %v1475_v12, 4  ;;  %v1480_v24 = vrot.slane %v1478_v13, 5  ;;  %v820_v35 = vld [vmem:[%s3186_s27 + $0x4] sm:$0x1] }
  0x40   : > { %2781 = vmatprep.subr.bf16.mxu0 %v2961_v57  ;;  %v1486_v25 = vrot.slane %v1484_v15, 5  ;;  %v1491_v27 = vrot.slane %v1489_v19, 4  ;;  %v1494_v28 = vrot.slane %v1492_v20, 5  ;;  %v842_v40 = vshll.u32 %v819_v34, 16  ;;  %v2978_v19 = vld [vmem:[%s3186_s27 + $0x18] ss:$8 sps:$4 sm:$0xff]  }
  0x41   : > { %2710 = vmatmul.mubr.msk.bf16.gmra.mrb[4].mxu1 %vm620_vm0, %v2958_v54  ;;  %v1461_v54 = vshrl.u32 %v2481_v48, 16  ;;  %v1481_v30 = vor.u32 %v1480_v24, %v1477_v23  ;;  %v2981_v24 = vld [vmem:[%s3483_s1 + $0xe8] sm:$0xff]  }
  0x42   : > { %2774 = vmatmul.mubr.msk.bf16.gmra.mrb[4].mxu0 %vm620_vm0, %v2960_v56  ;;  %2718 = vmatpush3.bf16.msra.mxu1 %v2959_v55  ;;  %v1431_v55 = vsel %vm3239_vm3, %v1426_v47, %v1430_v36  ;;  %v1449_v56 = vrot.slane %v1447_v50, 4  ;;  %v1495_v33 = vor.u32 %v1494_v28, %v1491_v27  ;;  %v821_v36 = vld [vmem:[%s3186_s27 + $0x8] sm:$0xf] }
  0x43   : > { %2782 = vmatpush3.bf16.msra.mxu0 %v2961_v57  ;;  %2719 = vmatprep.subr.bf16.mxu1 %v2962_v58  ;;  %v1464_v57 = vshll.u32 %v2481_v48, 16  ;;  %v1463_v0 = vrot.slane %v1461_v54, 4  ;;  %v1482_v37 = vrot.slane %v1481_v30, 4  ;;  %v853_v43 = vshrl.u32 %v821_v36, 16  ;;  %v2976_v54 = vld [vmem:[%s3186_s27 + $0x8] ss:$8 sps:$4 sm:$0xff]  }
  0x44   : > { %2783 = vmatprep.subr.bf16.mxu0 %v2963_v59  ;;  %2721 = vmatprep.mubr.msk.bf16.mxu1 %vm620_vm0, %v2964_v60  ;;  %v1445_v60 = vsel %vm3239_vm3, %v1440_v51, %v1444_v41  ;;  %v1453_v5 = vor.u32 %v1452_v62, %v1449_v56  ;;  %v848_v41 = vshll.u32 %v820_v35, 16  ;;  %v1496_v42 = vrot.slane %v1495_v33, 4  ;;  %v826_v62 = vld [vmem:[%s3186_s27 + $0x1c] sm:$0x1]  ;;  %v829_v28 = vld [vmem:[%s3186_s27 + $0x28] sm:$0xf] }
  0x45   : > { %2785 = vmatprep.mubr.msk.bf16.mxu0 %vm620_vm0, %v2495_v39  ;;  %v2496_v2 = vcombine.low %v1431_v55, %v1445_v60  ;;  %v1466_v3 = vrot.slane %v1464_v57, 5  ;;  %v839_v39 = vshrl.u32 %v819_v34, 16  ;;  %v1487_v46 = vsel %vm3239_vm3, %v1482_v37, %v1486_v25  ;;  %v2979_v55 = vld [vmem:[%s3483_s1 + $0xe0] sm:$0xff]   ;;  %v825_v60 = vld [vmem:[%s3186_s27 + $0x18] sm:$0xf] }
  0x46   : > { %2720 = vmatpush3.bf16.msra.mxu1 %v2962_v58  ;;  %v1470_v58 = vshll.u32 %v2482_v49, 16  ;;  %v844_v48 = vrot.slane %v842_v40, 5  ;;  %v850_v49 = vrot.slane %v848_v41, 5  ;;  %v855_v51 = vrot.slane %v853_v43, 4  ;;  %v827_v25 = vld [vmem:[%s3186_s27 + $0x20] sm:$0xf] }
  0x47   : > { %2784 = vmatpush3.bf16.msra.mxu0 %v2963_v59  ;;  %2729 = vmatprep.subr.bf16.mxu1 %v2966_v9  ;;  %v2974_v59 = vld [vmem:[%s3483_s1 + $0x58] sm:$0xff]   ;;  %v841_v47 = vrot.slane %v839_v39, 4  ;;  %v898_v30 = vshll.u32 %v827_v25, 16  ;;  %v909_v33 = vshrl.u32 %v829_v28, 16  ;;  %v912_v34 = vshll.u32 %v829_v28, 16  ;;  %v2985_v43 = vld [vmem:[%s3483_s1 + $0xf0] sm:$0xff]  }
  0x48   : > { %2793 = vmatprep.subr.bf16.mxu0 %v3246_v14  ;;  %v1472_v4 = vrot.slane %v1470_v58, 5  ;;  %v823_v58 = vld [vmem:[%s3186_s27 + $0x10] sm:$0xf]  ;;  %v3403_v28 = vld [vmem:[%s3483_s1 + $0x118] sm:$0xff]  }
  0x49   : > { %2722 = vmatmul.mubr.msk.bf16.vlgmr.msra.gmra.mrb[0].mxu1 %vm620_vm0, %v2965_v17  ;;  %v3295_v17 = vld [vmem:[%s3483_s1 + $0x60] sm:$0xff]   ;;  %v845_v57 = vor.u32 %v844_v48, %v841_v47  ;;  %v911_v40 = vrot.slane %v909_v33, 4  ;;  %v914_v41 = vrot.slane %v912_v34, 5  ;;  %v831_v47 = vld [vmem:[%s3186_s27 + $0x30] sm:$0xf] }
  0x4a   : > { %2730 = vmatpush3.bf16.msra.mxu1 %v2966_v9  ;;  %2725 = vmatprep.mubr.msk.bf16.mxu1 %vm620_vm0, %v2970_v44  ;;  %v1467_v9 = vor.u32 %v1466_v3, %v1463_v0  ;;  %v856_v44 = vshll.u32 %v821_v36, 16  ;;  %v870_v0 = vshll.u32 %v823_v58, 16  ;;  %v881_v3 = vshrl.u32 %v825_v60, 16  ;;  %v2980_v36 = vld [vmem:[%s3483_s1 + $0x68] sm:$0xff]   ;;  %v832_v48 = vld [vmem:[%s3186_s27 + $0x34] sm:$0x1] }
  0x4b   : > { %2731 = vmatprep.subr.bf16.mxu1 %v2968_v18  ;;  %2786 = vmatmul.mubr.msk.bf16.vlgmr.msra.gmra.mrb[0].mxu0 %vm620_vm0, %v2496_v2  ;;  %v846_v2 = vrot.slane %v845_v57, 4  ;;  %v932_v57 = vshll.u32 %v832_v48, 16  ;;  %v2574_v48 = vld [vmem:[%s3186_s27 + $0x34] sm:$0x1] }
  0x4c   : > { %2794 = vmatpush3.bf16.msra.mxu0 %v3246_v14  ;;  %v1468_v22 = vrot.slane %v1467_v9, 4  ;;  %v1500_v14 = vrot.slane %v1498_v21, 5  ;;  %v858_v52 = vrot.slane %v856_v44, 5  ;;  %v872_v8 = vrot.slane %v870_v0, 5 }
  0x4d   : > { %2795 = vmatprep.subr.bf16.mxu0 %v2969_v61  ;;  %v851_v11 = vsel %vm3239_vm3, %v846_v2, %v850_v49  ;;  %v883_v12 = vrot.slane %v881_v3, 4  ;;  %v2983_v49 = vld [vmem:[%s3483_s1 + $0x70] sm:$0xff]   ;;  %v2986_v2 = vld [vmem:[%s3483_s1 + $0x78] sm:$0xff]  }
  0x4e   : > { %2732 = vmatpush3.bf16.msra.mxu1 %v2968_v18  ;;  %v1454_v18 = vrot.slane %v1453_v5, 4  ;;  %v1473_v29 = vsel %vm3239_vm3, %v1468_v22, %v1472_v4  ;;  %v1501_v50 = vsel %vm3239_vm3, %v1496_v42, %v1500_v14  ;;  %v884_v4 = vshll.u32 %v825_v60, 16  ;;  %v830_v14 = vld [vmem:[%s3186_s27 + $0x2c] sm:$0x1]  ;;  %v2982_v42 = vld [vmem:[%s3186_s27 + $0x28] ss:$8 sps:$4 sm:$0xff]  }
  0x4f   : > { %2733 = vmatprep.subr.bf16.mxu1 %v2972_v38  ;;  %v2498_v56 = vcombine.low %v1487_v46, %v1501_v50  ;;  %v890_v5 = vshll.u32 %v826_v62, 16  ;;  %v918_v39 = vshll.u32 %v830_v14, 16  ;;  %v915_v50 = vor.u32 %v914_v41, %v911_v40  ;;  %v2563_v14 = vld [vmem:[%s3186_s27 + $0x8] sm:$0xf]  ;;  %v2572_v41 = vld [vmem:[%s3186_s27 + $0x2c] sm:$0x1] }
  0x50   : > { %v1459_v26 = vsel %vm3239_vm3, %v1454_v18, %v1458_v63  ;;  %2796 = vmatpush3.bf16.msra.mxu0 %v2969_v61  ;;  %v859_v61 = vor.u32 %v858_v52, %v855_v51  ;;  %v867_v63 = vshrl.u32 %v823_v58, 16  ;;  %v886_v13 = vrot.slane %v884_v4, 5  ;;  %v833_v51 = vld [vmem:[%s3186_s27 + $0x38] sm:$0xf]  ;;  %v834_v52 = vld [vmem:[%s3186_s27 + $0x3c] sm:$0x1] }
  0x51   : > { %2726 = vmatmul.mubr.msk.bf16.gmra.mrb[4].mxu1 %vm620_vm0, %v2971_v1  ;;  %v2497_v32 = vcombine.low %v1459_v26, %v1473_v29  ;;  %2797 = vmatprep.subr.bf16.mxu0 %v2973_v16  ;;  %v892_v15 = vrot.slane %v890_v5, 5  ;;  %v828_v26 = vld [vmem:[%s3186_s27 + $0x24] sm:$0x1]  ;;  %v895_v29 = vshrl.u32 %v827_v25, 16  ;;  %v920_v46 = vrot.slane %v918_v39, 5  ;;  %v3395_v25 = vld [vmem:[%s3483_s1 + $0x110] sm:$0xff]  }
  0x52   : > { %2734 = vmatpush3.bf16.msra.mxu1 %v2972_v38  ;;  %v822_v38 = vld [vmem:[%s3186_s27 + $0xc] sm:$0x1]  ;;  %v860_v6 = vrot.slane %v859_v61, 4  ;;  %v869_v7 = vrot.slane %v867_v63, 4  ;;  %v887_v21 = vor.u32 %v886_v13, %v883_v12  ;;  %v937_v58 = vshrl.u32 %v833_v51, 16  ;;  %v2992_v12 = vld [vmem:[%s3483_s1 + $0x100] sm:$0xff]  }
  0x53   : > { %2735 = vmatprep.subr.bf16.mxu1 %v2974_v59  ;;  %2789 = vmatprep.mubr.msk.bf16.mxu0 %vm620_vm0, %v2497_v32  ;;  %v862_v45 = vshll.u32 %v822_v38, 16  ;;  %v904_v32 = vshll.u32 %v828_v26, 16  ;;  %v897_v37 = vrot.slane %v895_v29, 4  ;;  %v900_v38 = vrot.slane %v898_v30, 5  ;;  %v2994_v26 = vld [vmem:[%s3186_s27 + $0xb0] ss:$8 sps:$4 sm:$0xff]  }
  0x54   : > { %2798 = vmatpush3.bf16.msra.mxu0 %v2973_v16  ;;  %v873_v18 = vor.u32 %v872_v8, %v869_v7  ;;  %v888_v23 = vrot.slane %v887_v21, 4  ;;  %v916_v60 = vrot.slane %v915_v50, 4  ;;  %v946_v62 = vshll.u32 %v834_v52, 16  ;;  %v2984_v7 = vld [vmem:[%s3186_s27 + $0x38] ss:$8 sps:$4 sm:$0xff]   ;;  %v2993_v21 = vld [vmem:[%s3483_s1 + $0x108] sm:$0xff]  }
  0x55   : > { %v864_v53 = vrot.slane %v862_v45, 5  ;;  %2799 = vmatprep.subr.bf16.mxu0 %v2975_v31  ;;  %2790 = vmatmul.mubr.msk.bf16.gmra.mrb[4].mxu0 %vm620_vm0, %v2498_v56  ;;  %v901_v44 = vor.u32 %v900_v38, %v897_v37  ;;  %v906_v45 = vrot.slane %v904_v32, 5  ;;  %v939_v0 = vrot.slane %v937_v58, 4  ;;  %v2564_v29 = vld [vmem:[%s3186_s27 + $0xc] sm:$0x1] }
  0x56   : > { %2736 = vmatpush3.bf16.msra.mxu1 %v2974_v59  ;;  %v824_v59 = vld [vmem:[%s3186_s27 + $0x14] sm:$0x1]  ;;  %2801 = vmatprep.mubr.msk.bf16.mxu0 %vm620_vm0, %v2976_v54  ;;  %v874_v22 = vrot.slane %v873_v18, 4  ;;  %v926_v54 = vshll.u32 %v831_v47, 16  ;;  %v921_v3 = vsel %vm3239_vm3, %v916_v60, %v920_v46  ;;  %v934_v5 = vrot.slane %v932_v57, 5 }
  0x57   : > { %2745 = vmatprep.subr.bf16.mxu1 %v3295_v17  ;;  %v876_v1 = vshll.u32 %v824_v59, 16  ;;  %v865_v16 = vsel %vm3239_vm3, %v860_v6, %v864_v53  ;;  %v923_v53 = vshrl.u32 %v831_v47, 16  ;;  %v902_v56 = vrot.slane %v901_v44, 4  ;;  %v2565_v30 = vld [vmem:[%s3186_s27 + $0x10] sm:$0xf] }
  0x58   : > { %2800 = vmatpush3.bf16.msra.mxu0 %v2975_v31  ;;  %v2403_v20 = vcombine.low %v851_v11, %v865_v16  ;;  %v893_v31 = vsel %vm3239_vm3, %v888_v23, %v892_v15  ;;  %v940_v59 = vshll.u32 %v833_v51, 16  ;;  %v928_v61 = vrot.slane %v926_v54, 5  ;;  %v2988_v16 = vld [vmem:[%s3186_s27 + $0x90] ss:$8 sps:$4 sm:$0xff]   ;;  %v2990_v23 = vld [vmem:[%s3186_s27 + $0xa0] ss:$8 sps:$4 sm:$0xff]  }
  0x59   : > { %v878_v9 = vrot.slane %v876_v1, 5  ;;  %2809 = vmatprep.subr.bf16.mxu0 %v2979_v55  ;;  %v907_v63 = vsel %vm3239_vm3, %v902_v56, %v906_v45  ;;  %v948_v6 = vrot.slane %v946_v62, 5  ;;  %v1943_v32 = vshrl.u32 %v2563_v14, 16  ;;  %v2571_v38 = vld [vmem:[%s3186_s27 + $0x28] sm:$0xf] }
  0x5a   : > { %2737 = vmatprep.mubr.msk.bf16.mxu1 %vm620_vm0, %v2403_v20  ;;  %v942_v1 = vrot.slane %v940_v59, 5  ;;  %v2405_v8 = vcombine.low %v907_v63, %v921_v3  ;;  %v1946_v33 = vshll.u32 %v2563_v14, 16  ;;  %v1952_v34 = vshll.u32 %v2564_v29, 16  ;;  %v2568_v58 = vld [vmem:[%s3186_s27 + $0x1c] sm:$0x1] }
  0x5b   : > { %v879_v27 = vsel %vm3239_vm3, %v874_v22, %v878_v9  ;;  %v2991_v22 = vld [vmem:[%s3186_s27 + $0x60] ss:$8 sps:$4 sm:$0xff]   ;;  %v1945_v39 = vrot.slane %v1943_v32, 4  ;;  %v1999_v50 = vshrl.u32 %v2571_v38, 16  ;;  %v2002_v51 = vshll.u32 %v2571_v38, 16 }
  0x5c   : > { %v2404_v35 = vcombine.low %v879_v27, %v893_v31  ;;  %v943_v9 = vor.u32 %v942_v1, %v939_v0  ;;  %v2997_v27 = vld [vmem:[%s3186_s27 + $0x80] ss:$8 sps:$4 sm:$0xff]   ;;  %v2566_v31 = vld [vmem:[%s3186_s27 + $0x14] sm:$0x1]  ;;  %v1948_v40 = vrot.slane %v1946_v33, 5  ;;  %v1954_v44 = vrot.slane %v1952_v34, 5 }
  0x5d   : > { %2802 = vmatmul.mubr.msk.bf16.vlgmr.msra.gmra.mrb[0].mxu0 %vm620_vm0, %v2978_v19  ;;  %v2989_v19 = vld [vmem:[%s3186_s27 + $0x50] ss:$8 sps:$4 sm:$0xff]   ;;  %v1966_v37 = vshll.u32 %v2566_v31, 16  ;;  %v2008_v52 = vshll.u32 %v2572_v41, 16  ;;  %v2022_v57 = vshll.u32 %v2574_v48, 16  ;;  %v2001_v60 = vrot.slane %v1999_v50, 4 }
  0x5e   : > { %2810 = vmatpush3.bf16.msra.mxu0 %v2979_v55  ;;  %2738 = vmatmul.mubr.msk.bf16.vlgmr.msra.gmra.mrb[0].mxu1 %vm620_vm0, %v2404_v35  ;;  %v2987_v55 = vld [vmem:[%s3483_s1 + $0xf8] sm:$0xff]   ;;  %v944_v13 = vrot.slane %v943_v9, 4  ;;  %v1957_v35 = vshrl.u32 %v2565_v30, 16  ;;  %v2569_v62 = vld [vmem:[%s3186_s27 + $0x20] sm:$0xf] }
  0x5f   : > { %2811 = vmatprep.subr.bf16.mxu0 %v2981_v24  ;;  %2746 = vmatpush3.bf16.msra.mxu1 %v3295_v17  ;;  %v925_v17 = vrot.slane %v923_v53, 4  ;;  %v1968_v47 = vrot.slane %v1966_v37, 5  ;;  %v2567_v53 = vld [vmem:[%s3186_s27 + $0x18] sm:$0xf]  ;;  %v2570_v9 = vld [vmem:[%s3186_s27 + $0x24] sm:$0x1] }
  0x60   : > { %2805 = vmatprep.mubr.msk.bf16.mxu0 %vm620_vm0, %v2982_v42  ;;  %2747 = vmatprep.subr.bf16.mxu1 %v2980_v36  ;;  %v949_v18 = vsel %vm3239_vm3, %v944_v13, %v948_v6  ;;  %v2573_v42 = vld [vmem:[%s3186_s27 + $0x30] sm:$0xf]  ;;  %v1959_v45 = vrot.slane %v1957_v35, 4  ;;  %v1974_v6 = vshll.u32 %v2567_v53, 16  ;;  %v2575_v13 = vld [vmem:[%s3186_s27 + $0x38] sm:$0xf] }
  0x61   : > { %v929_v4 = vor.u32 %v928_v61, %v925_v17  ;;  %2741 = vmatprep.mubr.msk.bf16.mxu1 %vm620_vm0, %v2405_v8  ;;  %v2016_v56 = vshll.u32 %v2573_v42, 16  ;;  %v2004_v17 = vrot.slane %v2002_v51, 5  ;;  %v2010_v61 = vrot.slane %v2008_v52, 5  ;;  %v2577_v14 = vld [vmem:[%s3186_s27 + $0x40] sm:$0xf] }
  0x62   : > { %2812 = vmatpush3.bf16.msra.mxu0 %v2981_v24  ;;  %v2995_v24 = vld [vmem:[%s3186_s27 + $0x70] ss:$8 sps:$4 sm:$0xff]   ;;  %v2578_v32 = vld [vmem:[%s3186_s27 + $0x44] sm:$0x1]  ;;  %v2030_v33 = vshll.u32 %v2575_v13, 16  ;;  %v2041_v41 = vshrl.u32 %v2577_v14, 16 }
  0x63   : > { %2813 = vmatprep.subr.bf16.mxu0 %v2985_v43  ;;  %2748 = vmatpush3.bf16.msra.mxu1 %v2980_v36  ;;  %v930_v11 = vrot.slane %v929_v4, 4  ;;  %v1960_v36 = vshll.u32 %v2565_v30, 16  ;;  %v2018_v1 = vrot.slane %v2016_v56, 5  ;;  %v2005_v4 = vor.u32 %v2004_v17, %v2001_v60 }
  0x64   : > { %2749 = vmatprep.subr.bf16.mxu1 %v2983_v49 }
  0x65   : > { %2806 = vmatmul.mubr.msk.bf16.gmra.mrb[4].mxu0 %vm620_vm0, %v2984_v7  ;;  %v935_v15 = vsel %vm3239_vm3, %v930_v11, %v934_v5  ;;  %v1962_v46 = vrot.slane %v1960_v36, 5  ;;  %v1971_v5 = vshrl.u32 %v2567_v53, 16  ;;  %v1980_v11 = vshll.u32 %v2568_v58, 16 }
  0x66   : > { %2814 = vmatpush3.bf16.msra.mxu0 %v2985_v43  ;;  %v2406_v20 = vcombine.low %v935_v15, %v949_v18  ;;  %2817 = vmatprep.mubr.msk.bf16.mxu0 %vm620_vm0, %v2989_v19  ;;  %v2996_v43 = vld [vmem:[%s3186_s27 + $0xc0] ss:$8 sps:$4 sm:$0xff]   ;;  %v1976_v19 = vrot.slane %v1974_v6, 5 }
  0x67   : > { %2815 = vmatprep.subr.bf16.mxu0 %v2987_v55  ;;  %2750 = vmatpush3.bf16.msra.mxu1 %v2983_v49  ;;  %v1949_v49 = vor.u32 %v1948_v40, %v1945_v39  ;;  %v1963_v54 = vor.u32 %v1962_v46, %v1959_v45  ;;  %v1973_v18 = vrot.slane %v1971_v5, 4  ;;  %v1982_v30 = vrot.slane %v1980_v11, 5 }
  0x68   : > { %2751 = vmatprep.subr.bf16.mxu1 %v2986_v2  ;;  %2742 = vmatmul.mubr.msk.bf16.gmra.mrb[4].mxu1 %vm620_vm0, %v2406_v20  ;;  %v2032_v40 = vrot.slane %v2030_v33, 5 }
  0x69   : > { %2753 = vmatprep.mubr.msk.bf16.mxu1 %vm620_vm0, %v2988_v16  ;;  %v1950_v59 = vrot.slane %v1949_v49, 4  ;;  %v1964_v63 = vrot.slane %v1963_v54, 4  ;;  %v2006_v16 = vrot.slane %v2005_v4, 4 }
  0x6a   : > { %2816 = vmatpush3.bf16.msra.mxu0 %v2987_v55  ;;  %v2013_v55 = vshrl.u32 %v2573_v42, 16  ;;  %v2044_v42 = vshll.u32 %v2577_v14, 16 }
  0x6b   : > { %2825 = vmatprep.subr.bf16.mxu0 %v2992_v12  ;;  %2752 = vmatpush3.bf16.msra.mxu1 %v2986_v2  ;;  %v2024_v2 = vrot.slane %v2022_v57, 5  ;;  %v1955_v3 = vsel %vm3239_vm3, %v1950_v59, %v1954_v44  ;;  %v1969_v7 = vsel %vm3239_vm3, %v1964_v63, %v1968_v47  ;;  %v2043_v47 = vrot.slane %v2041_v41, 4 }
  0x6c   : > { %2841 = vmatprep.subr.bf16.mxu1 %v2992_v12  ;;  %v2015_v0 = vrot.slane %v2013_v55, 4  ;;  %v2587_v15 = vcombine.low %v1955_v3, %v1969_v7 }
  0x6d   : > { %2818 = vmatmul.mubr.msk.bf16.vlgmr.msra.gmra.mrb[0].mxu0 %vm620_vm0, %v2991_v22  ;;  %v1988_v22 = vshll.u32 %v2569_v62, 16 }
  0x6e   : > { %2826 = vmatpush3.bf16.msra.mxu0 %v2992_v12  ;;  %2821 = vmatprep.mubr.msk.bf16.mxu0 %vm620_vm0, %v2995_v24  ;;  %v2019_v8 = vor.u32 %v2018_v1, %v2015_v0  ;;  %v2011_v24 = vsel %vm3239_vm3, %v2006_v16, %v2010_v61 }
  0x6f   : > { %2827 = vmatprep.subr.bf16.mxu0 %v2993_v21  ;;  %v1990_v31 = vrot.slane %v1988_v22, 5 }
  0x70   : > { %2754 = vmatmul.mubr.msk.bf16.vlgmr.msra.gmra.mrb[0].mxu1 %vm620_vm0, %v2990_v23  ;;  %v2020_v20 = vrot.slane %v2019_v8, 4  ;;  %v2576_v23 = vld [vmem:[%s3186_s27 + $0x3c] sm:$0x1]  ;;  %s2601_s27 = sshll.u32 %s3493_s18, 5 }
  0x71   : > { %2845 = vmatpush3.bf16.msra.mxu1 %v2992_v12  ;;  %2757 = vmatprep.mubr.msk.bf16.mxu1 %vm620_vm0, %v2994_v26  ;;  %v1985_v12 = vshrl.u32 %v2569_v62, 16  ;;  %v1977_v26 = vor.u32 %v1976_v19, %v1973_v18  ;;  %v2036_v37 = vshll.u32 %v2576_v23, 16  ;;  %s534_s25 = scalar_lea.vmem %s3484_s2, %s2601_s27 }
  0x72   : > { %2828 = vmatpush3.bf16.msra.mxu0 %v2993_v21  ;;  %2842 = vmatprep.subr.bf16.mxu1 %v2993_v21  ;;  %v2025_v29 = vsel %vm3239_vm3, %v2020_v20, %v2024_v2 }
  0x73   : > { %2829 = vmatprep.subr.bf16.mxu0 %v3395_v25  ;;  %v2589_v34 = vcombine.low %v2011_v24, %v2025_v29  ;;  %v1978_v35 = vrot.slane %v1977_v26, 4  ;;  %v2038_v48 = vrot.slane %v2036_v37, 5 }
  0x75   : > { %2822 = vmatmul.mubr.msk.bf16.gmra.mrb[4].mxu0 %vm620_vm0, %v2997_v27  ;;  %2846 = vmatpush3.bf16.msra.mxu1 %v2993_v21  ;;  %v1987_v21 = vrot.slane %v1985_v12, 4  ;;  %v1994_v27 = vshll.u32 %v2570_v9, 16  ;;  %v1983_v44 = vsel %vm3239_vm3, %v1978_v35, %v1982_v30 }
  0x76   : > { %2830 = vmatpush3.bf16.msra.mxu0 %v3395_v25  ;;  %2843 = vmatprep.subr.bf16.mxu1 %v3395_v25 }
  0x77   : > { %2831 = vmatprep.subr.bf16.mxu0 %v3403_v28  ;;  %2833 = vmatprep.mubr.msk.bf16.mxu0 %vm620_vm0, %v2587_v15  ;;  %v1991_v38 = vor.u32 %v1990_v31, %v1987_v21  ;;  %v1996_v39 = vrot.slane %v1994_v27, 5 }
  0x78   : > { %2758 = vmatmul.mubr.msk.bf16.gmra.mrb[4].mxu1 %vm620_vm0, %v2996_v43  ;;  %v2050_v43 = vshll.u32 %v2578_v32, 16 }
  0x79   : > { %2847 = vmatpush3.bf16.msra.mxu1 %v3395_v25  ;;  %v2027_v25 = vshrl.u32 %v2575_v13, 16  ;;  %2837 = vmatprep.mubr.msk.bf16.mxu1 %vm620_vm0, %v2589_v34  ;;  %v1992_v45 = vrot.slane %v1991_v38, 4 }
  0x7a   : > { %2832 = vmatpush3.bf16.msra.mxu0 %v3403_v28  ;;  %2844 = vmatprep.subr.bf16.mxu1 %v3403_v28  ;;  %v2052_v53 = vrot.slane %v2050_v43, 5 }
  0x7b   : > { %v2029_v36 = vrot.slane %v2027_v25, 4  ;;  %v1997_v49 = vsel %vm3239_vm3, %v1992_v45, %v1996_v39 }
  0x7c   : > { %v2588_v51 = vcombine.low %v1983_v44, %v1997_v49 }
  0x7d   : > { %2848 = vmatpush3.bf16.msra.mxu1 %v3403_v28  ;;  %v2033_v46 = vor.u32 %v2032_v40, %v2029_v36  ;;  %v2046_v28 = vrot.slane %v2044_v42, 5 }
  0x7e   : > { %2834 = vmatmul.mubr.msk.bf16.vlgmr.msra.gmra.mrb[0].mxu0 %vm620_vm0, %v2588_v51 }
  0x7f   : > { %v2034_v50 = vrot.slane %v2033_v46, 4  ;;  %v2047_v52 = vor.u32 %v2046_v28, %v2043_v47 }
  0x81   : > { %v2039_v54 = vsel %vm3239_vm3, %v2034_v50, %v2038_v48  ;;  %v2048_v55 = vrot.slane %v2047_v52, 4 }
  0x83   : > { %v2053_v56 = vsel %vm3239_vm3, %v2048_v55, %v2052_v53 }
  0x84   : > { %v2590_v57 = vcombine.low %v2039_v54, %v2053_v56 }
  0x86   : > { %2838 = vmatmul.mubr.msk.bf16.vlgmr.msra.gmra.mrb[8].mxu1 %vm620_vm0, %v2590_v57 }
 0x143   : > { %v2755_v58 = vpop.f32.mrb[0].mxu1 }
 0x144   : > { %v1188_v59 = vpop.f32.mrb[1].mxu1 }
 0x145   : > { %v2756_v60 = vpop.f32.mrb[2].mxu1 }
 0x146   : > { %v1191_v61 = vpop.f32.mrb[3].mxu1 }
 0x148   : > { %v2823_v17 = vpop.f32.mrb[4].mxu0 }
 0x149   : > { %v1903_v62 = vpop.f32.mrb[5].mxu0 }
 0x14a   : > { %v2824_v63 = vpop.f32.mrb[6].mxu0 }
 0x14b   : > { %v1906_v0 = vpop.f32.mrb[7].mxu0  ;;  %v2759_v1 = vpop.f32.mrb[4].mxu1 }
 0x14c   : > { %v2853_v2 = vadd.f32 %v2823_v17, %v2759_v1  ;;  %v1204_v3 = vpop.f32.mrb[5].mxu1 }
 0x14d   : > { %v2855_v4 = vadd.f32 %v1903_v62, %v1204_v3  ;;  %v2760_v5 = vpop.f32.mrb[6].mxu1 }
 0x14e   : > { %v2857_v10 = vadd.f32 %v2824_v63, %v2760_v5  ;;  %v1207_v6 = vpop.f32.mrb[7].mxu1 }
 0x14f   : > { %v2859_v7 = vadd.f32 %v1906_v0, %v1207_v6 }
 0x151   : > { %v2835_v8 = vpop.f32.mrb[0].mxu0 }
 0x152   : > { %v2849_v9 = vadd.f32 %v2835_v8, %v2755_v58  ;;  %v2145_v11 = vpop.f32.mrb[1].mxu0 }
 0x153   : > { %v2850_v12 = vadd.f32 %v2145_v11, %v1188_v59  ;;  %v2836_v13 = vpop.f32.mrb[2].mxu0 }
 0x154   : > { %v2851_v15 = vadd.f32 %v2836_v13, %v2756_v60  ;;  %v2148_v16 = vpop.f32.mrb[3].mxu0  ;;  %v2216_v29 = vmul.f32 %v2849_v9, %v2849_v9 }
 0x155   : > { %v2852_v18 = vadd.f32 %v2148_v16, %v1191_v61  ;;  %v2214_v20 = vmul.f32 %v2850_v12, %v2850_v12 }
 0x156   : > { %v2610_v21 = vpack.c.bf16 %v2851_v15, %v2849_v9  ;;  %v2217_v35 = vmul.f32 %v2851_v15, %v2851_v15 }
 0x157   : > { %v2605_v24 = vpack.c.bf16 %v2852_v18, %v2850_v12  ;;  %v2200_v26 = vadd.f32 %v2852_v18, %v2850_v12  ;;  %v2215_v27 = vmul.f32 %v2852_v18, %v2852_v18 }
 0x158   : > { %2622 = vst [vmem:[%s534_s25 + $0x8] sm:$0xff] %v2610_v21  }
 0x159   : > { %v2839_v19 = vpop.f32.mrb[8].mxu1  ;;  %2606 = vst [vmem:[%s534_s25] sm:$0xff] %v2605_v24   ;;  %v2201_v31 = vadd.f32 %v2849_v9, %v2200_v26  ;;  %v2222_v32 = vadd.f32 %v2215_v27, %v2214_v20 }
 0x15a   : > { %v2854_v22 = vadd.f32 %v2853_v2, %v2839_v19  ;;  %v2161_v23 = vpop.f32.mrb[9].mxu1 }
 0x15b   : > { %v2856_v14 = vadd.f32 %v2855_v4, %v2161_v23  ;;  %v2840_v25 = vpop.f32.mrb[10].mxu1  ;;  %v2223_v37 = vadd.f32 %v2222_v32, %v2216_v29  ;;  %v2202_v38 = vadd.f32 %v2851_v15, %v2201_v31 }
 0x15c   : > { %v2858_v30 = vadd.f32 %v2857_v10, %v2840_v25  ;;  %v2164_v33 = vpop.f32.mrb[11].mxu1  ;;  %v2220_v46 = vmul.f32 %v2854_v22, %v2854_v22 }
 0x15d   : > { %v2860_v34 = vadd.f32 %v2859_v7, %v2164_v33  ;;  %v2218_v40 = vmul.f32 %v2856_v14, %v2856_v14  ;;  %v2203_v41 = vadd.f32 %v2856_v14, %v2202_v38  ;;  %v2224_v42 = vadd.f32 %v2223_v37, %v2217_v35 }
 0x15e   : > { %v2620_v36 = vpack.c.bf16 %v2858_v30, %v2854_v22  ;;  %v2221_v28 = vmul.f32 %v2858_v30, %v2858_v30 }
 0x15f   : > { %v2615_v39 = vpack.c.bf16 %v2860_v34, %v2856_v14  ;;  %v2204_v43 = vadd.f32 %v2860_v34, %v2203_v41  ;;  %v2219_v44 = vmul.f32 %v2860_v34, %v2860_v34  ;;  %v2225_v45 = vadd.f32 %v2224_v42, %v2218_v40 }
 0x160   : > { %2624 = vst [vmem:[%s534_s25 + $0x18] sm:$0xff] %v2620_v36  }
 0x161   : > { %2623 = vst [vmem:[%s534_s25 + $0x10] sm:$0xff] %v2615_v39   ;;  %v2205_v47 = vadd.f32 %v2854_v22, %v2204_v43  ;;  %v2226_v48 = vadd.f32 %v2225_v45, %v2219_v44 }
 0x163   : > { %v2206_v49 = vadd.f32 %v2858_v30, %v2205_v47  ;;  %v2227_v50 = vadd.f32 %v2226_v48, %v2220_v46 }
 0x165   : > { %v2207_v51 = vrot.slane %v2206_v49, 4  ;;  %v2228_v52 = vadd.f32 %v2227_v50, %v2221_v28 }
 0x167   : > { %v2208_v53 = vadd.f32 %v2207_v51, %v2206_v49  ;;  %v2229_v54 = vrot.slane %v2228_v52, 4 }
 0x169   : > { %v2209_v55 = vrot.slane %v2208_v53, 2  ;;  %v2230_v56 = vadd.f32 %v2229_v54, %v2228_v52 }
 0x16b   : > { %v2210_v57 = vadd.f32 %v2209_v55, %v2208_v53  ;;  %v2231_v58 = vrot.slane %v2230_v56, 2 }
 0x16d   : > { %v2211_v59 = vrot.slane %v2210_v57, 1  ;;  %v2232_v60 = vadd.f32 %v2231_v58, %v2230_v56 }
 0x16f   : > { %v2212_v17 = vadd.f32 %v2211_v59, %v2210_v57  ;;  %v2233_v61 = vrot.slane %v2232_v60, 1 }
 0x171   : > { %2213 = vst [vmem:[%s537_s28] sm:$0x1] %v2212_v17  ;;  %v2234_v62 = vadd.f32 %v2233_v61, %v2232_v60 }
 0x173   : > { %2235 = vst [vmem:[%s540_s5] sm:$0x1] %v2234_v62 }
 0x174 PF: > { %p12_p9 = scmp.ge.s32.totalorder %s3066_s19, 4   ;;  %s3489_s15 = smov %s3018_s16 }
 0x175   : > { %s3490_s16 = smov %s3075_s22  ;;  %s3491_s17 = smov %s3066_s19 }
 0x176   :  { %14 = sbr.rel (!%p12_p9) target bundleno = 2 (0x2), region = 141 }

// kernel: preact_block_forward.7
= control target key start
LH: loop header
LB: loop body
LE: loop exit
PB: predicated region body
PF: predicated region fallthrough
CT: control target
= control target key end

     0   :  { %12 = vsyncpa [#allocation4], 0  ;;  %s3431_s0 = inlined_call_operand.vmem [shape: bf16[2,8,8,128], index: 0, kind: input, shape index: {}]   ;;  %s3432_s1 = inlined_call_operand.vmem [shape: f32[1,128], index: 1, kind: input, shape index: {}]   ;;  %s3433_s2 = inlined_call_operand.vmem [shape: f32[1,128], index: 2, kind: input, shape index: {}]   ;;  %s3434_s3 = inlined_call_operand.vmem [shape: f32[1,128], index: 3, kind: input, shape index: {}]   ;;  %s3435_s4 = inlined_call_operand.vmem [shape: bf16[9,128,128], index: 4, kind: input, shape index: {}]   ;;  %s3436_s5 = inlined_call_operand.vmem [shape: bf16[2,8,8,64], index: 5, kind: input, shape index: {}]   ;;  %s3437_s6 = inlined_call_operand.vmem [shape: bf16[64,128], index: 6, kind: input, shape index: {}]   ;;  %s3438_s7 = inlined_call_operand.hbm [shape: f32[2,8,8,128], index: 7, kind: output, shape index: {}]  }
   0x1   :  { %14 = vsyncpa [#allocation4 + $0x1], 0  ;;  %s2873_s24 = smov 0   ;;  %s2875_s25 = smov 0  }
   0x2   :  { %s2877_s26 = smov 0   ;;  %s2879_s27 = smov 0  }
   0x3 LB: > { %s2894_s28 = sadd.s32 4294967295, %s2827_s27   ;;  %s1972_s29 = sadd.s32 4294967294, %s2827_s27   ;;  %s2827_s27 = sphi %s2879_s27, %s3444_s27   ;;  %s2823_s26 = sphi %s2877_s26, %s3443_s26   ;;  %s2819_s25 = sphi %s2875_s25, %s3442_s25   ;;  %s2815_s24 = sphi %s2873_s24, %s3441_s24  }
   0x4   : > { %s2898_s30 = sadd.s32 1, %s2827_s27   ;;  %s184_s8 = sadd.s32 1, %s2823_s26 }
   0x5   : > { %s181_s9 = ssub.s32 %s2827_s27, %s2898_s30  ;;  %p194_p0 = scmp.ne.s32.totalorder %s2823_s26, %s2819_s25 }
   0x6   : > { %p182_p1 = scmp.eq.s32.totalorder %s181_s9, 0  ;;  %p195_p2 = scmp.eq.s32.totalorder %s2894_s28, 1 }
   0x7   : > { %p200_p3 = scmp.ne.s32.totalorder %s2819_s25, %s2815_s24  ;;  %p201_p4 = scmp.eq.s32.totalorder %s1972_s29, 1 }
   0x8   : > { %s2909_s10 = scalar_select %p182_p1, %s2823_s26, %s184_s8  }
   0x9   : > { %p2911_p5 = por %p195_p2, %p194_p0  ;;  %p2915_p6 = por %p201_p4, %p200_p3 }
   0xa   : > { %p1975_p7 = scmp.ge.s32.totalorder %s2827_s27, 1  ;;  %p250_p8 = scmp.lt.s32.totalorder %s2827_s27, 3 }
   0xc   : > { %p251_p9 = pnand %p1975_p7, %p250_p8 }
   0xd   : > { %v2685_v0 = vld [vmem:[%s3435_s4 + $0x40] sm:$0xff] (!%p251_p9)   ;;  %v2687_v2 = vld [vmem:[%s3435_s4 + $0x48] sm:$0xff] (!%p251_p9)   ;;  %v2829_v3 = vmov (!%p251_p9), 0.0   ;;  %p287_p10 = scmp.lt.s32.totalorder (!%p251_p9), %s2894_s28, 1  ;;  %v2689_v5 = vld [vmem:[%s3435_s4 + $0x50] sm:$0xff] (!%p251_p9)   ;;  %vm1790_vm0 = vcmask (!%p251_p9), 523264  }
   0xe   : > { %254 = sbr.rel (%p251_p9) target bundleno = 414 (0x19e), region = 48  ;;  %v2686_v1 = vld [vmem:[%s3435_s4 + $0x140] sm:$0xff] (!%p251_p9)   ;;  %2339 = vmatprep.subr.bf16.mxu1 (!%p251_p9), %v2685_v0  ;;  %367 = vst [vmem:[#allocation2] sm:$0xff] (!%p251_p9), %v2829_v3  ;;  %368 = vst [vmem:[#allocation2 + $0x8] sm:$0x3] (!%p251_p9), %v2829_v3  ;;  %v2688_v4 = vld [vmem:[%s3435_s4 + $0x148] sm:$0xff] (!%p251_p9)  }
   0xf   : > { %369 = vst [vmem:[#allocation2 + $0x10] sm:$0xff] (!%p251_p9), %v2829_v3  ;;  %370 = vst [vmem:[#allocation2 + $0x18] sm:$0x3] (!%p251_p9), %v2829_v3  ;;  %2459 = vmatprep.subr.bf16.mxu0 (!%p251_p9), %v2686_v1  ;;  %2340 = vmatpush3.bf16.msra.mxu1 (!%p251_p9), %v2685_v0  ;;  %v2690_v6 = vld [vmem:[%s3435_s4 + $0x150] sm:$0xff] (!%p251_p9)   ;;  %v2691_v7 = vld [vmem:[%s3435_s4 + $0x58] sm:$0xff] (!%p251_p9)   ;;  %s2830_s29 = smov (!%p251_p9), [#allocation3]  }
  0x10   : > { %371 = vst [vmem:[#allocation2 + $0x20] sm:$0xff] (!%p251_p9), %v2829_v3  ;;  %372 = vst [vmem:[#allocation2 + $0x28] sm:$0x3] (!%p251_p9), %v2829_v3  ;;  %2460 = vmatpush3.bf16.msra.mxu0 (!%p251_p9), %v2686_v1  ;;  %2341 = vmatprep.subr.bf16.mxu1 (!%p251_p9), %v2687_v2  ;;  %v2692_v8 = vld [vmem:[%s3435_s4 + $0x158] sm:$0xff] (!%p251_p9)   ;;  %v2693_v9 = vld [vmem:[%s3435_s4 + $0x60] sm:$0xff] (!%p251_p9)   ;;  %s2769_s9 = sshll.u32 (!%p251_p9), %s2830_s29, 4  ;;  %s2770_s9 = int_to_ptr.vmem [resolvable:$false] %s2769_s9 }
  0x11   : > { %373 = vst [vmem:[#allocation2 + $0x30] sm:$0xff] (!%p251_p9), %v2829_v3  ;;  %374 = vst [vmem:[#allocation2 + $0x38] sm:$0x3] (!%p251_p9), %v2829_v3  ;;  %2461 = vmatprep.subr.bf16.mxu0 (!%p251_p9), %v2688_v4  ;;  %v2694_v10 = vld [vmem:[%s3435_s4 + $0x160] sm:$0xff] (!%p251_p9)   ;;  %v2695_v11 = vld [vmem:[%s3435_s4 + $0x68] sm:$0xff] (!%p251_p9)   ;;  %s2771_s13 = scalar_lea.vmem (!%p251_p9), %s2770_s9, 2048 }
  0x12   : > { %375 = vst [vmem:[#allocation2 + $0x40] sm:$0xff] (!%p251_p9), %v2829_v3  ;;  %376 = vst [vmem:[#allocation2 + $0x48] sm:$0x3] (!%p251_p9), %v2829_v3  ;;  %v2696_v12 = vld [vmem:[%s3435_s4 + $0x168] sm:$0xff] (!%p251_p9)   ;;  %v2992_v13 = vld [vmem:[%s3432_s1] ss:$0 sm:$0xff] (!%p251_p9) }
  0x13   : > { %377 = vst [vmem:[#allocation2 + $0x50] sm:$0xff] (!%p251_p9), %v2829_v3  ;;  %378 = vst [vmem:[#allocation2 + $0x58] sm:$0x3] (!%p251_p9), %v2829_v3  ;;  %2342 = vmatpush3.bf16.msra.mxu1 (!%p251_p9), %v2687_v2  ;;  %v2697_v15 = vld [vmem:[%s3435_s4 + $0x70] sm:$0xff] (!%p251_p9)   ;;  %v3001_v18 = vld [vmem:[%s3433_s2] ss:$0 sm:$0xff] (!%p251_p9) }
  0x14   : > { %379 = vst [vmem:[#allocation2 + $0x60] sm:$0xff] (!%p251_p9), %v2829_v3  ;;  %380 = vst [vmem:[#allocation2 + $0x68] sm:$0x3] (!%p251_p9), %v2829_v3  ;;  %2462 = vmatpush3.bf16.msra.mxu0 (!%p251_p9), %v2688_v4  ;;  %2343 = vmatprep.subr.bf16.mxu1 (!%p251_p9), %v2689_v5  ;;  %v2698_v20 = vld [vmem:[%s3435_s4 + $0x170] sm:$0xff] (!%p251_p9)   ;;  %v3012_v25 = vld [vmem:[%s3434_s3] ss:$0 sm:$0xff] (!%p251_p9) }
  0x15   : > { %381 = vst [vmem:[#allocation2 + $0x70] sm:$0xff] %v2829_v3  ;;  %382 = vst [vmem:[#allocation2 + $0x78] sm:$0x3] %v2829_v3  ;;  %s2961_s8 = scalar_select %p287_p10, %s2894_s28, 1  ;;  %2463 = vmatprep.subr.bf16.mxu0 %v2690_v6  ;;  %v2699_v30 = vld [vmem:[%s3435_s4 + $0x78] sm:$0xff]   ;;  %v424_v35 = vld [vmem:[#allocation2 + $0x1] sm:$0xff] }
  0x16   : > { %383 = vst [vmem:[#allocation2 + $0x80] sm:$0xff] %v2829_v3  ;;  %384 = vst [vmem:[#allocation2 + $0x88] sm:$0x3] %v2829_v3  ;;  %v2700_v31 = vld [vmem:[%s3435_s4 + $0x178] sm:$0xff]   ;;  %v2701_v42 = vld [vmem:[%s3435_s4] sm:$0xff]  }
  0x17   : > { %385 = vst [vmem:[#allocation2 + $0x90] sm:$0xff] %v2829_v3  ;;  %386 = vst [vmem:[#allocation2 + $0x98] sm:$0x3] %v2829_v3  ;;  %2344 = vmatpush3.bf16.msra.mxu1 %v2689_v5  ;;  %s2201_s16 = sshll.u32 %s2961_s8, 5  ;;  %v2702_v44 = vld [vmem:[%s3435_s4 + $0x180] sm:$0xff]   ;;  %v2703_v50 = vld [vmem:[%s3435_s4 + $0x8] sm:$0xff]  }
  0x18   : > { %2464 = vmatpush3.bf16.msra.mxu0 %v2690_v6  ;;  %2345 = vmatprep.subr.bf16.mxu1 %v2691_v7  ;;  %s2981_s23 = scalar_lea.vmem %s3431_s0, %s2201_s16  ;;  %v2705_v1 = vld [vmem:[%s3435_s4 + $0x10] sm:$0xff]  }
  0x19   : > { %2465 = vmatprep.subr.bf16.mxu0 %v2692_v8  ;;  %v2205_v14 = vld [vmem:[%s2981_s23] sm:$0xff]   ;;  %v2220_v19 = vld [vmem:[%s2981_s23 + $0x8] sm:$0xff]   ;;  %v2221_v47 = vld [vmem:[%s2981_s23 + $0x10] sm:$0xff]  }
  0x1a   : > { %v2206_v16 = vunpack.c.l.bf16 %v2205_v14  ;;  %v2207_v17 = vunpack.c.h.bf16 %v2205_v14  ;;  %v2210_v23 = vunpack.c.l.bf16 %v2220_v19  ;;  %v2211_v24 = vunpack.c.h.bf16 %v2220_v19  ;;  %v2222_v51 = vld [vmem:[%s2981_s23 + $0x18] sm:$0xff]   ;;  %s3226_s23 = scalar_lea.vmem %s3436_s5, %s2201_s16  ;;  %s2203_s16 = sshll.u32 %s2894_s28, 10 }
  0x1b   : > { %2346 = vmatpush3.bf16.msra.mxu1 %v2691_v7  ;;  %v2214_v48 = vunpack.c.l.bf16 %v2221_v47  ;;  %v2215_v49 = vunpack.c.h.bf16 %v2221_v47  ;;  %v2218_v54 = vunpack.c.l.bf16 %v2222_v51  ;;  %v2219_v55 = vunpack.c.h.bf16 %v2222_v51  ;;  %v2717_v47 = vld [vmem:[%s3435_s4 + $0x80] sm:$0xff]   ;;  %v2719_v51 = vld [vmem:[%s3435_s4 + $0x88] sm:$0xff]   ;;  %s3384_s21 = scalar_lea.hbm %s3438_s7, %s2203_s16 }
  0x1c   : > { %2466 = vmatpush3.bf16.msra.mxu0 %v2692_v8  ;;  %2347 = vmatprep.subr.bf16.mxu1 %v2693_v9  ;;  %v323_v21 = vsub.f32 %v2206_v16, %v2992_v13  ;;  %v324_v22 = vsub.f32 %v2207_v17, %v2992_v13  ;;  %v325_v28 = vsub.f32 %v2210_v23, %v2992_v13 }
  0x1d   : > { %2467 = vmatprep.subr.bf16.mxu0 %v2694_v10  ;;  %v326_v29 = vsub.f32 %v2211_v24, %v2992_v13  ;;  %v327_v52 = vsub.f32 %v2214_v48, %v2992_v13  ;;  %v328_v53 = vsub.f32 %v2215_v49, %v2992_v13  ;;  %v329_v62 = vsub.f32 %v2218_v54, %v2992_v13  ;;  %v2709_v24 = vld [vmem:[%s3435_s4 + $0x20] sm:$0xff]   ;;  %v2716_v48 = vld [vmem:[%s3435_s4 + $0x1b8] sm:$0xff]  }
  0x1e   : > { %v337_v26 = vmul.f32 %v3001_v18, %v323_v21  ;;  %v338_v27 = vmul.f32 %v3001_v18, %v324_v22  ;;  %v339_v34 = vmul.f32 %v3001_v18, %v325_v28  ;;  %v330_v63 = vsub.f32 %v2219_v55, %v2992_v13  ;;  %v2706_v22 = vld [vmem:[%s3435_s4 + $0x190] sm:$0xff]  }
  0x1f   : > { %2348 = vmatpush3.bf16.msra.mxu1 %v2693_v9  ;;  %v340_v36 = vmul.f32 %v3001_v18, %v326_v29  ;;  %v341_v60 = vmul.f32 %v3001_v18, %v327_v52  ;;  %v342_v61 = vmul.f32 %v3001_v18, %v328_v53  ;;  %v343_v6 = vmul.f32 %v3001_v18, %v329_v62  ;;  %v2718_v52 = vld [vmem:[%s3435_s4 + $0x1c0] sm:$0xff]  }
  0x20   : > { %2468 = vmatpush3.bf16.msra.mxu0 %v2694_v10  ;;  %2349 = vmatprep.subr.bf16.mxu1 %v2695_v11  ;;  %v351_v32 = vadd.f32 %v3012_v25, %v337_v26  ;;  %v352_v33 = vadd.f32 %v3012_v25, %v338_v27  ;;  %v353_v39 = vadd.f32 %v3012_v25, %v339_v34  ;;  %v2704_v10 = vld [vmem:[%s3435_s4 + $0x188] sm:$0xff]   ;;  %v2708_v26 = vld [vmem:[%s3435_s4 + $0x198] sm:$0xff]  }
  0x21   : > { %2469 = vmatprep.subr.bf16.mxu0 %v2696_v12  ;;  %v354_v40 = vadd.f32 %v3012_v25, %v340_v36  ;;  %v355_v4 = vadd.f32 %v3012_v25, %v341_v60  ;;  %v356_v5 = vadd.f32 %v3012_v25, %v342_v61  ;;  %v344_v7 = vmul.f32 %v3001_v18, %v330_v63  ;;  %v2711_v27 = vld [vmem:[%s3435_s4 + $0x28] sm:$0xff]   ;;  %v2713_v36 = vld [vmem:[%s3435_s4 + $0x30] sm:$0xff]  }
  0x22   : > { %v3028_v37 = vmax.f32 %v351_v32, 0.0  ;;  %v3030_v38 = vmax.f32 %v352_v33, 0.0  ;;  %v3040_v43 = vmax.f32 %v353_v39, 0.0  ;;  %v357_v13 = vadd.f32 %v3012_v25, %v343_v6  ;;  %v2721_v60 = vld [vmem:[%s3435_s4 + $0x90] sm:$0xff]   ;;  %v679_v62 = vld [vmem:[#allocation2 + $0x2] sm:$0xff] }
  0x23   : > { %2350 = vmatpush3.bf16.msra.mxu1 %v2695_v11  ;;  %v3045_v45 = vmax.f32 %v354_v40, 0.0  ;;  %v3091_v11 = vmax.f32 %v355_v4, 0.0  ;;  %v358_v16 = vadd.f32 %v3012_v25, %v344_v7  ;;  %v2720_v63 = vld [vmem:[%s3435_s4 + $0x1c8] sm:$0xff]   ;;  %v2725_v6 = vld [vmem:[%s3435_s4 + $0xa0] sm:$0xff]   ;;  %v2724_v7 = vld [vmem:[%s3435_s4 + $0x1d8] sm:$0xff]  }
  0x24   : > { %2470 = vmatpush3.bf16.msra.mxu0 %v2696_v12  ;;  %2351 = vmatprep.subr.bf16.mxu1 %v2697_v15  ;;  %388 = vst [vmem:[#allocation2 + $0x11] sm:$0xff] %v3028_v37  ;;  %v432_v41 = vpack.c.bf16 %v3028_v37, %v424_v35  ;;  %389 = vst [vmem:[#allocation2 + $0x21] sm:$0xff] %v3030_v38  ;;  %v3050_v46 = vpack.c.bf16 %v3040_v43, %v3030_v38  ;;  %v3093_v12 = vmax.f32 %v356_v5, 0.0  ;;  %v2722_v5 = vld [vmem:[%s3435_s4 + $0x1d0] sm:$0xff]  }
  0x25   : > { %2471 = vmatprep.subr.bf16.mxu0 %v2698_v20  ;;  %390 = vst [vmem:[#allocation2 + $0x31] sm:$0xff] %v3040_v43  ;;  %391 = vst [vmem:[#allocation2 + $0x41] sm:$0xff] %v3045_v45  ;;  %v987_v56 = vpack.c.bf16 %v3030_v38, %v3028_v37  ;;  %v988_v57 = vpack.c.bf16 %v3045_v45, %v3040_v43  ;;  %v3105_v17 = vpack.c.bf16 %v3091_v11, %v3045_v45  ;;  %v2762_v37 = vld [vmem:[%s3435_s4 + $0x130] sm:$0xff]   ;;  %v2759_v38 = vld [vmem:[%s3226_s23 + $0x8] sm:$0xff]  }
  0x26   : > { %2355 = vmatprep.mubr.bf16.mxu1 %v432_v41  ;;  %392 = vst [vmem:[#allocation2 + $0x51] sm:$0xff] %v3091_v11  ;;  %393 = vst [vmem:[#allocation2 + $0x61] sm:$0xff] %v3093_v12  ;;  %v3108_v18 = vmax.f32 %v357_v13, 0.0  ;;  %v989_v19 = vpack.c.bf16 %v3093_v12, %v3091_v11  ;;  %v2712_v41 = vld [vmem:[%s3435_s4 + $0x1a8] sm:$0xff]  }
  0x27   : > { %2352 = vmatpush3.bf16.msra.mxu1 %v2697_v15  ;;  %v2707_v15 = vld [vmem:[%s3435_s4 + $0x18] sm:$0xff]   ;;  %v2728_v13 = vld [vmem:[%s3435_s4 + $0x1e8] sm:$0xff]  }
  0x28   : > { %2472 = vmatpush3.bf16.msra.mxu0 %v2698_v20  ;;  %2353 = vmatprep.subr.bf16.mxu1 %v2699_v30  ;;  %v3112_v20 = vmax.f32 %v358_v16, 0.0  ;;  %394 = vst [vmem:[#allocation2 + $0x71] sm:$0xff] %v3108_v18  ;;  %v3122_v23 = vpack.c.bf16 %v3108_v18, %v3093_v12  ;;  %v2733_v16 = vld [vmem:[%s3435_s4 + $0xc0] sm:$0xff]  }
  0x29   : > { %2473 = vmatprep.subr.bf16.mxu0 %v2700_v31 }
  0x2a   : > { %395 = vst [vmem:[#allocation2 + $0x81] sm:$0xff] %v3112_v20  ;;  %v990_v25 = vpack.c.bf16 %v3112_v20, %v3108_v18 }
  0x2b   : > { %2354 = vmatpush3.bf16.msra.mxu1 %v2699_v30  ;;  %v3065_v58 = vld [vmem:[#allocation2 + $0x12] sm:$0xff]  ;;  %v3067_v59 = vld [vmem:[#allocation2 + $0x22] sm:$0xff] }
  0x2c   : > { %2474 = vmatpush3.bf16.msra.mxu0 %v2700_v31  ;;  %2363 = vmatprep.subr.bf16.mxu1 %v2701_v42  ;;  %v1137_v0 = vpack.c.bf16 %v3067_v59, %v3065_v58  ;;  %v3078_v2 = vld [vmem:[#allocation2 + $0x32] sm:$0xff]  ;;  %v3084_v8 = vld [vmem:[#allocation2 + $0x42] sm:$0xff] }
  0x2d   : > { %2483 = vmatprep.subr.bf16.mxu0 %v2702_v44  ;;  %v1138_v9 = vpack.c.bf16 %v3084_v8, %v3078_v2  ;;  %v3096_v14 = vld [vmem:[#allocation2 + $0x10] sm:$0xff]  ;;  %v3140_v29 = vld [vmem:[#allocation2 + $0x62] sm:$0xff] }
  0x2e   : > { %2356 = vmatmul.mubr.bf16.vlgmr.msra.gmra.mrb[0].mxu1 %v3050_v46  ;;  %2475 = vmatprep.mubr.bf16.mxu0 %v1137_v0  ;;  %v404_v21 = vpack.c.bf16 %v3096_v14, %v2829_v3  ;;  %v3138_v28 = vld [vmem:[#allocation2 + $0x52] sm:$0xff]  ;;  %v2710_v30 = vld [vmem:[%s3435_s4 + $0x1a0] sm:$0xff]  }
  0x2f   : > { %2364 = vmatpush3.bf16.msra.mxu1 %v2701_v42  ;;  %2476 = vmatmul.mubr.bf16.vlgmr.msra.gmra.mrb[0].mxu0 %v1138_v9  ;;  %v1139_v31 = vpack.c.bf16 %v3140_v29, %v3138_v28  ;;  %v3147_v32 = vld [vmem:[#allocation2 + $0x20] sm:$0xff]  ;;  %v3149_v33 = vld [vmem:[#allocation2 + $0x72] sm:$0xff]  ;;  %v2727_v9 = vld [vmem:[%s3435_s4 + $0xa8] sm:$0xff]  }
  0x30   : > { %2365 = vmatprep.subr.bf16.mxu1 %v2703_v50  ;;  %2484 = vmatpush3.bf16.msra.mxu0 %v2702_v44  ;;  %v3151_v34 = vld [vmem:[#allocation2 + $0x30] sm:$0xff]  ;;  %v2715_v42 = vld [vmem:[%s3435_s4 + $0x38] sm:$0xff]   ;;  %v3177_v49 = vld [vmem:[#allocation2 + $0x40] sm:$0xff] }
  0x31   : > { %2485 = vmatprep.subr.bf16.mxu0 %v2704_v10  ;;  %2359 = vmatprep.mubr.bf16.mxu1 %v3105_v17  ;;  %v3153_v35 = vld [vmem:[#allocation2 + $0x82] sm:$0xff]  ;;  %v1288_v40 = vpack.c.bf16 %v3151_v34, %v3147_v32  ;;  %v2714_v44 = vld [vmem:[%s3435_s4 + $0x1b0] sm:$0xff]   ;;  %v2723_v0 = vld [vmem:[%s3435_s4 + $0x98] sm:$0xff]  }
  0x32   : > { %2479 = vmatprep.mubr.bf16.mxu0 %v1139_v31  ;;  %v1140_v39 = vpack.c.bf16 %v3153_v35, %v3149_v33  ;;  %v3189_v54 = vld [vmem:[#allocation2 + $0x60] sm:$0xff]  ;;  %v3191_v55 = vld [vmem:[#allocation2 + $0x70] sm:$0xff] }
  0x33   : > { %2366 = vmatpush3.bf16.msra.mxu1 %v2703_v50  ;;  %v3179_v50 = vld [vmem:[#allocation2 + $0x50] sm:$0xff]  ;;  %v1290_v61 = vpack.c.bf16 %v3191_v55, %v3189_v54  ;;  %v3205_v4 = vld [vmem:[#allocation2 + $0x80] sm:$0xff] }
  0x34   : > { %2367 = vmatprep.subr.bf16.mxu1 %v2705_v1  ;;  %2486 = vmatpush3.bf16.msra.mxu0 %v2704_v10  ;;  %v1289_v53 = vpack.c.bf16 %v3179_v50, %v3177_v49  ;;  %v2729_v10 = vld [vmem:[%s3435_s4 + $0xb0] sm:$0xff]  }
  0x35   : > { %2487 = vmatprep.subr.bf16.mxu0 %v2706_v22  ;;  %v1437_v31 = vld [vmem:[#allocation2 + $0x91] sm:$0xff] }
  0x36   : > { %2360 = vmatmul.mubr.bf16.gmra.mrb[4].mxu1 %v3122_v23 }
  0x37   : > { %2368 = vmatpush3.bf16.msra.mxu1 %v2705_v1  ;;  %2379 = vmatprep.mubr.bf16.mxu1 %v404_v21  ;;  %v687_v1 = vpack.c.bf16 %v3065_v58, %v679_v62  ;;  %v1291_v58 = vpack.c.bf16 %v2829_v3, %v3205_v4  ;;  %v2726_v3 = vld [vmem:[%s3435_s4 + $0x1e0] sm:$0xff]   ;;  %v688_v21 = vpack.c.bf16 %v3078_v2, %v3067_v59  ;;  %v2737_v2 = vld [vmem:[%s3435_s4 + $0xd0] sm:$0xff]  }
  0x38   : > { %2369 = vmatprep.subr.bf16.mxu1 %v2707_v15  ;;  %2488 = vmatpush3.bf16.msra.mxu0 %v2706_v22  ;;  %v2732_v22 = vld [vmem:[%s3435_s4 + $0x1f8] sm:$0xff]   ;;  %v2734_v59 = vld [vmem:[%s3435_s4 + $0x200] sm:$0xff]  }
  0x39   : > { %2489 = vmatprep.subr.bf16.mxu0 %v2708_v26  ;;  %2480 = vmatmul.mubr.bf16.gmra.mrb[4].mxu0 %v1140_v39  ;;  %v2744_v39 = vld [vmem:[%s3435_s4 + $0x228] sm:$0xff]   ;;  %v2757_v62 = vld [vmem:[%s3226_s23] sm:$0xff]  }
  0x3a   : > { %2499 = vmatprep.mubr.bf16.mxu0 %v1288_v40 }
  0x3b   : > { %2370 = vmatpush3.bf16.msra.mxu1 %v2707_v15  ;;  %v2730_v15 = vld [vmem:[%s3435_s4 + $0x1f0] sm:$0xff]  }
  0x3c   : > { %2371 = vmatprep.subr.bf16.mxu1 %v2709_v24  ;;  %2490 = vmatpush3.bf16.msra.mxu0 %v2708_v26  ;;  %v3257_v26 = vpack.c.bf16 %v3138_v28, %v3084_v8  ;;  %v2736_v8 = vld [vmem:[%s3435_s4 + $0x208] sm:$0xff]   ;;  %v3274_v28 = vpack.c.bf16 %v3149_v33, %v3140_v29  ;;  %v2741_v29 = vld [vmem:[%s3435_s4 + $0xe0] sm:$0xff]   ;;  %v2745_v33 = vld [vmem:[%s3435_s4 + $0xf0] sm:$0xff]  }
  0x3d   : > { %2491 = vmatprep.subr.bf16.mxu0 %v2710_v30 }
  0x3f   : > { %2372 = vmatpush3.bf16.msra.mxu1 %v2709_v24  ;;  %v2735_v24 = vld [vmem:[%s3435_s4 + $0xc8] sm:$0xff]  }
  0x40   : > { %2373 = vmatprep.subr.bf16.mxu1 %v2711_v27  ;;  %2492 = vmatpush3.bf16.msra.mxu0 %v2710_v30  ;;  %v837_v30 = vpack.c.bf16 %v3147_v32, %v3096_v14  ;;  %v2740_v14 = vld [vmem:[%s3435_s4 + $0x218] sm:$0xff]   ;;  %v2742_v32 = vld [vmem:[%s3435_s4 + $0x220] sm:$0xff]  }
  0x41   : > { %2493 = vmatprep.subr.bf16.mxu0 %v2712_v41 }
  0x43   : > { %2374 = vmatpush3.bf16.msra.mxu1 %v2711_v27  ;;  %v2739_v27 = vld [vmem:[%s3435_s4 + $0xd8] sm:$0xff]  }
  0x44   : > { %2375 = vmatprep.subr.bf16.mxu1 %v2713_v36  ;;  %2494 = vmatpush3.bf16.msra.mxu0 %v2712_v41  ;;  %v2746_v41 = vld [vmem:[%s3435_s4 + $0x230] sm:$0xff]  }
  0x45   : > { %2495 = vmatprep.subr.bf16.mxu0 %v2714_v44 }
  0x47   : > { %2376 = vmatpush3.bf16.msra.mxu1 %v2713_v36  ;;  %v2738_v36 = vld [vmem:[%s3435_s4 + $0x210] sm:$0xff]  }
  0x48   : > { %2377 = vmatprep.subr.bf16.mxu1 %v2715_v42  ;;  %2496 = vmatpush3.bf16.msra.mxu0 %v2714_v44  ;;  %v838_v44 = vpack.c.bf16 %v3177_v49, %v3151_v34  ;;  %v2750_v34 = vld [vmem:[%s3437_s6] sm:$0xff]   ;;  %v2753_v49 = vld [vmem:[%s3435_s4 + $0x110] sm:$0xff]  }
  0x49   : > { %2497 = vmatprep.subr.bf16.mxu0 %v2716_v48 }
  0x4b   : > { %2378 = vmatpush3.bf16.msra.mxu1 %v2715_v42  ;;  %v2749_v42 = vld [vmem:[%s3435_s4 + $0x100] sm:$0xff]  }
  0x4c   : > { %2387 = vmatprep.subr.bf16.mxu1 %v2717_v47  ;;  %2498 = vmatpush3.bf16.msra.mxu0 %v2716_v48  ;;  %v2751_v48 = vld [vmem:[%s3435_s4 + $0x108] sm:$0xff]  }
  0x4d   : > { %2507 = vmatprep.subr.bf16.mxu0 %v2718_v52 }
  0x4e   : > { %2380 = vmatmul.mubr.bf16.vlgmr.msra.gmra.mrb[0].mxu1 %v1288_v40  ;;  %v2747_v40 = vld [vmem:[%s3435_s4 + $0xf8] sm:$0xff]  }
  0x4f   : > { %2388 = vmatpush3.bf16.msra.mxu1 %v2717_v47  ;;  %2383 = vmatprep.mubr.bf16.mxu1 %v1289_v53  ;;  %v2748_v47 = vld [vmem:[%s3435_s4 + $0x238] sm:$0xff]  }
  0x50   : > { %2389 = vmatprep.subr.bf16.mxu1 %v2719_v51  ;;  %2500 = vmatmul.mubr.bf16.vlgmr.msra.gmra.mrb[0].mxu0 %v1289_v53  ;;  %v840_v53 = vpack.c.bf16 %v3205_v4, %v3191_v55 }
  0x51   : > { %2508 = vmatpush3.bf16.msra.mxu0 %v2718_v52  ;;  %2503 = vmatprep.mubr.bf16.mxu0 %v1290_v61  ;;  %v2755_v52 = vld [vmem:[%s3435_s4 + $0x118] sm:$0xff]  }
  0x52   : > { %2509 = vmatprep.subr.bf16.mxu0 %v2720_v63 }
  0x53   : > { %2390 = vmatpush3.bf16.msra.mxu1 %v2719_v51  ;;  %v839_v51 = vpack.c.bf16 %v3189_v54, %v3179_v50  ;;  %v2752_v50 = vld [vmem:[%s3437_s6 + $0x8] sm:$0xff]   ;;  %v1587_v54 = vld [vmem:[#allocation2 + $0x92] sm:$0xff] }
  0x54   : > { %2391 = vmatprep.subr.bf16.mxu1 %v2721_v60  ;;  %v1591_v55 = vpack.c.bf16 %v1587_v54, %v3153_v35  ;;  %v2760_v35 = vld [vmem:[%s3435_s4 + $0x128] sm:$0xff]  }
  0x55   : > { %2510 = vmatpush3.bf16.msra.mxu0 %v2720_v63  ;;  %v2756_v63 = vld [vmem:[%s3437_s6 + $0x18] sm:$0xff]  }
  0x56   : > { %2384 = vmatmul.mubr.bf16.gmra.mrb[4].mxu1 %v1290_v61  ;;  %2511 = vmatprep.subr.bf16.mxu0 %v2722_v5  ;;  %v2758_v61 = vld [vmem:[%s3435_s4 + $0x120] sm:$0xff]  }
  0x57   : > { %2392 = vmatpush3.bf16.msra.mxu1 %v2721_v60  ;;  %2403 = vmatprep.mubr.bf16.mxu1 %v687_v1  ;;  %v2754_v60 = vld [vmem:[%s3437_s6 + $0x10] sm:$0xff]   ;;  %v2763_v1 = vld [vmem:[%s3226_s23 + $0x18] sm:$0xff]  }
  0x58   : > { %2393 = vmatprep.subr.bf16.mxu1 %v2723_v0  ;;  %2504 = vmatmul.mubr.bf16.gmra.mrb[4].mxu0 %v1291_v58 }
  0x59   : > { %2512 = vmatpush3.bf16.msra.mxu0 %v2722_v5  ;;  %2523 = vmatprep.mubr.bf16.mxu0 %v3050_v46  ;;  %v2731_v46 = vld [vmem:[%s3435_s4 + $0xb8] sm:$0xff]  }
  0x5a   : > { %2513 = vmatprep.subr.bf16.mxu0 %v2724_v7 }
  0x5b   : > { %2394 = vmatpush3.bf16.msra.mxu1 %v2723_v0  ;;  %v2764_v0 = vld [vmem:[%s3435_s4 + $0x138] sm:$0xff]  }
  0x5c   : > { %2395 = vmatprep.subr.bf16.mxu1 %v2725_v6 }
  0x5d   : > { %2514 = vmatpush3.bf16.msra.mxu0 %v2724_v7 }
  0x5e   : > { %2515 = vmatprep.subr.bf16.mxu0 %v2726_v3 }
  0x5f   : > { %2396 = vmatpush3.bf16.msra.mxu1 %v2725_v6 }
  0x60   : > { %2397 = vmatprep.subr.bf16.mxu1 %v2727_v9 }
  0x61   : > { %2516 = vmatpush3.bf16.msra.mxu0 %v2726_v3 }
  0x62   : > { %2517 = vmatprep.subr.bf16.mxu0 %v2728_v13 }
  0x63   : > { %2398 = vmatpush3.bf16.msra.mxu1 %v2727_v9 }
  0x64   : > { %2399 = vmatprep.subr.bf16.mxu1 %v2729_v10 }
  0x65   : > { %2518 = vmatpush3.bf16.msra.mxu0 %v2728_v13 }
  0x66   : > { %2519 = vmatprep.subr.bf16.mxu0 %v2730_v15 }
  0x67   : > { %2400 = vmatpush3.bf16.msra.mxu1 %v2729_v10 }
  0x68   : > { %2401 = vmatprep.subr.bf16.mxu1 %v2731_v46 }
  0x69   : > { %2520 = vmatpush3.bf16.msra.mxu0 %v2730_v15 }
  0x6a   : > { %2521 = vmatprep.subr.bf16.mxu0 %v2732_v22 }
  0x6b   : > { %2402 = vmatpush3.bf16.msra.mxu1 %v2731_v46 }
  0x6c   : > { %2411 = vmatprep.subr.bf16.mxu1 %v2733_v16 }
  0x6d   : > { %2522 = vmatpush3.bf16.msra.mxu0 %v2732_v22 }
  0x6e   : > { %2404 = vmatmul.mubr.bf16.vlgmr.msra.gmra.mrb[0].mxu1 %v688_v21  ;;  %2531 = vmatprep.subr.bf16.mxu0 %v2734_v59 }
  0x6f   : > { %2412 = vmatpush3.bf16.msra.mxu1 %v2733_v16  ;;  %2407 = vmatprep.mubr.bf16.mxu1 %v3257_v26 }
  0x70   : > { %2413 = vmatprep.subr.bf16.mxu1 %v2735_v24  ;;  %2524 = vmatmul.mubr.bf16.vlgmr.msra.gmra.mrb[0].mxu0 %v3105_v17  ;;  %v1441_v17 = vpack.c.bf16 %v1437_v31, %v3112_v20 }
  0x71   : > { %2532 = vmatpush3.bf16.msra.mxu0 %v2734_v59  ;;  %2527 = vmatprep.mubr.bf16.mxu0 %v3122_v23  ;;  %v2743_v23 = vld [vmem:[%s3435_s4 + $0xe8] sm:$0xff]  }
  0x72   : > { %2533 = vmatprep.subr.bf16.mxu0 %v2736_v8 }
  0x73   : > { %2414 = vmatpush3.bf16.msra.mxu1 %v2735_v24 }
  0x74   : > { %2415 = vmatprep.subr.bf16.mxu1 %v2737_v2 }
  0x75   : > { %2534 = vmatpush3.bf16.msra.mxu0 %v2736_v8 }
  0x76   : > { %2408 = vmatmul.mubr.bf16.gmra.mrb[4].mxu1 %v3274_v28  ;;  %2535 = vmatprep.subr.bf16.mxu0 %v2738_v36 }
  0x77   : > { %2416 = vmatpush3.bf16.msra.mxu1 %v2737_v2  ;;  %2427 = vmatprep.mubr.bf16.mxu1 %v837_v30 }
  0x78   : > { %2417 = vmatprep.subr.bf16.mxu1 %v2739_v27  ;;  %2528 = vmatmul.mubr.bf16.gmra.mrb[4].mxu0 %v1441_v17 }
  0x79   : > { %2536 = vmatpush3.bf16.msra.mxu0 %v2738_v36  ;;  %2547 = vmatprep.mubr.bf16.mxu0 %v688_v21 }
  0x7a   : > { %2537 = vmatprep.subr.bf16.mxu0 %v2740_v14 }
  0x7b   : > { %2418 = vmatpush3.bf16.msra.mxu1 %v2739_v27 }
  0x7c   : > { %2419 = vmatprep.subr.bf16.mxu1 %v2741_v29 }
  0x7d   : > { %2538 = vmatpush3.bf16.msra.mxu0 %v2740_v14 }
  0x7e   : > { %2539 = vmatprep.subr.bf16.mxu0 %v2742_v32 }
  0x7f   : > { %2420 = vmatpush3.bf16.msra.mxu1 %v2741_v29 }
  0x80   : > { %2421 = vmatprep.subr.bf16.mxu1 %v2743_v23 }
  0x81   : > { %2540 = vmatpush3.bf16.msra.mxu0 %v2742_v32 }
  0x82   : > { %2541 = vmatprep.subr.bf16.mxu0 %v2744_v39 }
  0x83   : > { %2422 = vmatpush3.bf16.msra.mxu1 %v2743_v23 }
  0x84   : > { %2423 = vmatprep.subr.bf16.mxu1 %v2745_v33 }
  0x85   : > { %2542 = vmatpush3.bf16.msra.mxu0 %v2744_v39 }
  0x86   : > { %2543 = vmatprep.subr.bf16.mxu0 %v2746_v41 }
  0x87   : > { %2424 = vmatpush3.bf16.msra.mxu1 %v2745_v33 }
  0x88   : > { %2425 = vmatprep.subr.bf16.mxu1 %v2747_v40 }
  0x89   : > { %2544 = vmatpush3.bf16.msra.mxu0 %v2746_v41 }
  0x8a   : > { %2545 = vmatprep.subr.bf16.mxu0 %v2748_v47 }
  0x8b   : > { %2426 = vmatpush3.bf16.msra.mxu1 %v2747_v40 }
  0x8c   : > { %2435 = vmatprep.subr.bf16.mxu1 %v2749_v42 }
  0x8d   : > { %2546 = vmatpush3.bf16.msra.mxu0 %v2748_v47 }
  0x8e   : > { %2428 = vmatmul.mubr.bf16.vlgmr.msra.gmra.mrb[0].mxu1 %v838_v44  ;;  %2555 = vmatprep.subr.bf16.mxu0 %v2750_v34 }
  0x8f   : > { %2436 = vmatpush3.bf16.msra.mxu1 %v2749_v42  ;;  %2431 = vmatprep.mubr.bf16.mxu1 %v839_v51 }
  0x90   : > { %2437 = vmatprep.subr.bf16.mxu1 %v2751_v48  ;;  %2548 = vmatmul.mubr.bf16.vlgmr.msra.gmra.mrb[0].mxu0 %v3257_v26 }
  0x91   : > { %2556 = vmatpush3.bf16.msra.mxu0 %v2750_v34  ;;  %2551 = vmatprep.mubr.bf16.mxu0 %v3274_v28 }
  0x92   : > { %2557 = vmatprep.subr.bf16.mxu0 %v2752_v50 }
  0x93   : > { %2438 = vmatpush3.bf16.msra.mxu1 %v2751_v48 }
  0x94   : > { %2439 = vmatprep.subr.bf16.mxu1 %v2753_v49 }
  0x95   : > { %2558 = vmatpush3.bf16.msra.mxu0 %v2752_v50 }
  0x96   : > { %2432 = vmatmul.mubr.bf16.gmra.mrb[4].mxu1 %v840_v53  ;;  %2559 = vmatprep.subr.bf16.mxu0 %v2754_v60 }
  0x97   : > { %2440 = vmatpush3.bf16.msra.mxu1 %v2753_v49  ;;  %2451 = vmatprep.mubr.bf16.mxu1 %v987_v56  ;;  %v2761_v56 = vld [vmem:[%s3226_s23 + $0x10] sm:$0xff]   ;;  %s284_s23 = sand.u32 1, %s2819_s25  }
  0x98   : > { %2441 = vmatprep.subr.bf16.mxu1 %v2755_v52  ;;  %2552 = vmatmul.mubr.bf16.gmra.mrb[4].mxu0 %v1591_v55  ;;  %s1976_s17 = sshll.u32 %s284_s23, 6  ;;  %s3390_s28 = scalar_lea.sflag [#allocation4], %s284_s23 }
  0x99   : > { %2560 = vmatpush3.bf16.msra.mxu0 %v2754_v60  ;;  %2563 = vmatprep.mubr.msk.bf16.mxu0 %vm1790_vm0, %v2757_v62  ;;  %s286_s8 = scalar_lea.vmem [#allocation3], %s1976_s17 }
  0x9a   : > { %2561 = vmatprep.subr.bf16.mxu0 %v2756_v63  ;;  %s1898_s18 = sshll.u32 %s286_s8, 4  ;;  %s3386_s18 = int_to_ptr.vmem [resolvable:$true] %s1898_s18 }
  0x9b   : > { %2442 = vmatpush3.bf16.msra.mxu1 %v2755_v52  ;;  %s2765_s22 = scalar_lea.vmem %s3386_s18, 1024  ;;  %p2772_p0 = scmp.lt.s32.totalorder %s3386_s18, %s2770_s9 }
  0x9c   : > { %2443 = vmatprep.subr.bf16.mxu1 %v2758_v61  ;;  %p2766_p11 = scmp.ne.s32.totalorder %s3386_s18, %s2765_s22  ;;  %p2773_p1 = scmp.lt.s32.totalorder %s2771_s13, %s2765_s22 }
  0x9d   : > { %2562 = vmatpush3.bf16.msra.mxu0 %v2756_v63 }
  0x9e   : > { %p2767_p12 = pnand %p2766_p11, %p2911_p5  ;;  %p2774_p2 = por %p2773_p1, %p2772_p0 }
  0x9f   : > { %2444 = vmatpush3.bf16.msra.mxu1 %v2758_v61 }
  0xa0   : > { %2445 = vmatprep.subr.bf16.mxu1 %v2760_v35  ;;  %2564 = vmatmul.mubr.msk.bf16.vlgmr.msra.gmra.mrb[0].mxu0 %vm1790_vm0, %v2759_v38  ;;  %p2768_p13 = pneg %p2767_p12 }
  0xa1   : > { %2567 = vmatprep.mubr.msk.bf16.mxu0 %vm1790_vm0, %v2761_v56 }
  0xa2   : > { %p2775_p3 = pnand %p2774_p2, %p2768_p13 }
  0xa3   : > { %2446 = vmatpush3.bf16.msra.mxu1 %v2760_v35 }
  0xa4   : > { %2447 = vmatprep.subr.bf16.mxu1 %v2762_v37 }
  0xa7   : > { %2448 = vmatpush3.bf16.msra.mxu1 %v2762_v37 }
  0xa8   : > { %2449 = vmatprep.subr.bf16.mxu1 %v2764_v0  ;;  %2568 = vmatmul.mubr.msk.bf16.gmra.mrb[4].mxu0 %vm1790_vm0, %v2763_v1 }
  0xab   : > { %2450 = vmatpush3.bf16.msra.mxu1 %v2764_v0 }
  0xae   : > { %2452 = vmatmul.mubr.bf16.vlgmr.msra.gmra.mrb[0].mxu1 %v988_v57 }
  0xaf   : > { %2455 = vmatprep.mubr.bf16.mxu1 %v989_v19 }
  0xb6   : > { %2456 = vmatmul.mubr.bf16.gmra.mrb[4].mxu1 %v990_v25 }
 0x173   : > { %v2565_v4 = vpop.f32.mrb[0].mxu0 }
 0x174   : > { %v1837_v5 = vpop.f32.mrb[1].mxu0 }
 0x175   : > { %v2566_v6 = vpop.f32.mrb[2].mxu0 }
 0x176   : > { %v1840_v58 = vpop.f32.mrb[3].mxu0 }
 0x17b   : > { %v2569_v7 = vpop.f32.mrb[4].mxu0 }
 0x17c   : > { %v1853_v9 = vpop.f32.mrb[5].mxu0 }
 0x17d   : > { %v2570_v43 = vpop.f32.mrb[6].mxu0 }
 0x17e   : > { %v1856_v11 = vpop.f32.mrb[7].mxu0 }
 0x181   : > { %v2453_v3 = vpop.f32.mrb[0].mxu1 }
 0x182   : > { %v2571_v45 = vadd.f32 %v2565_v4, %v2453_v3  ;;  %v1090_v57 = vpop.f32.mrb[1].mxu1 }
 0x183   : > { %v2572_v12 = vadd.f32 %v1837_v5, %v1090_v57  ;;  %v2454_v19 = vpop.f32.mrb[2].mxu1 }
 0x184   : > { %1878 = vst [vmem:[%s286_s8 + $0x10] sm:$0xff] %v2571_v45  ;;  %v2573_v18 = vadd.f32 %v2566_v6, %v2454_v19  ;;  %v1093_v20 = vpop.f32.mrb[3].mxu1 }
 0x185   : > { %1876 = vst [vmem:[%s286_s8] sm:$0xff] %v2572_v12  ;;  %v2574_v25 = vadd.f32 %v1840_v58, %v1093_v20 }
 0x186   : > { %1879 = vst [vmem:[%s286_s8 + $0x18] sm:$0xff] %v2573_v18 }
 0x187   : > { %1877 = vst [vmem:[%s286_s8 + $0x8] sm:$0xff] %v2574_v25 }
 0x189   : > { %v2457_v10 = vpop.f32.mrb[4].mxu1 }
 0x18a   : > { %v2575_v13 = vadd.f32 %v2569_v7, %v2457_v10  ;;  %v1106_v46 = vpop.f32.mrb[5].mxu1 }
 0x18b   : > { %v2576_v15 = vadd.f32 %v1853_v9, %v1106_v46  ;;  %v2458_v16 = vpop.f32.mrb[6].mxu1 }
 0x18c   : > { %1882 = vst [vmem:[%s286_s8 + $0x30] sm:$0xff] %v2575_v13  ;;  %v2577_v21 = vadd.f32 %v2570_v43, %v2458_v16  ;;  %v1109_v22 = vpop.f32.mrb[7].mxu1 }
 0x18d   : > { %1880 = vst [vmem:[%s286_s8 + $0x20] sm:$0xff] %v2576_v15  ;;  %v2578_v24 = vadd.f32 %v1856_v11, %v1109_v22 }
 0x18e   : > { %1883 = vst [vmem:[%s286_s8 + $0x38] sm:$0xff] %v2577_v21 }
 0x18f   : > { %1881 = vst [vmem:[%s286_s8 + $0x28] sm:$0xff] %v2578_v24 }
 0x190   : > { %2778 = shalt.err (!%p2775_p3)
}
 0x191   : > { %s2779_s14 = scalar_lea.hbm %s3384_s21, 1024  ;;  %s2783_s17 = scalar_lea.hbm %s3438_s7, 2048 }
 0x192   : > { %p2780_p4 = scmp.ne.s32.totalorder %s3384_s21, %s2779_s14  ;;  %p2784_p9 = scmp.lt.u32.totalorder %s3384_s21, %s3438_s7 }
 0x193   : > { %p2785_p10 = scmp.lt.u32.totalorder %s2783_s17, %s2779_s14  ;;  %p2787_p12 = scmp.lt.u32.totalorder %s2779_s14, %s3384_s21 }
 0x194   : > { %p2781_p7 = pnand %p2780_p4, %p2911_p5 }
 0x195   : > { %p2786_p11 = por %p2785_p10, %p2784_p9 }
 0x196   : > { %p2782_p8 = pneg %p2781_p7 }
 0x197   : > { %p2788_p13 = por %p2787_p12, %p2786_p11 }
 0x199   : > { %p2789_p0 = pnand %p2788_p13, %p2782_p8 }
 0x19b   : > { %2792 = shalt.err (!%p2789_p0)
}
 0x19c   : > { %s2831_s19 = smov 128   ;;  %s2832_s20 = smov 8  }
 0x19d   : > { %2643 = dma.vmem_to_hbm [thread:$0]  (%p2911_p5), %s3386_s18, 1024, %s3384_s21, %s3390_s28, %s2831_s19, %s2831_s19, %s2832_s20  }
 0x19e PF: > { %p2649_p1 = scmp.ge.s32.totalorder %s2827_s27, 2  ;;  %s1913_s22 = sand.u32 1, %s2815_s24  }
 0x19f   : > { %s1914_s29 = scalar_lea.sflag [#allocation4], %s1913_s22 }
 0x1a0   : > { %p2646_p2 = pnand %p2649_p1, %p2915_p6 }
 0x1a2   : > { %2810 = dma.done.wait (!%p2646_p2), %s1914_s29, 1024  }
 0x1a3   : > { %2812 = vsyncadd (!%p2646_p2), %s1914_s29, 4294966272  ;;  %p17_p3 = scmp.ge.s32.totalorder %s2898_s30, 4   ;;  %s3441_s24 = smov %s2819_s25 }
 0x1a4   : > { %s3442_s25 = smov %s2823_s26  ;;  %s3443_s26 = smov %s2909_s10 }
 0x1a5   : > { %s3444_s27 = smov %s2898_s30  ;;  %19 = sbr.rel (!%p17_p3) target bundleno = 3 (0x3), region = 96 }
 0x1ac   :  { %1919 = vsyncpa [#allocation4], 1 }
 0x1ad   :  { %1921 = vsyncpa [#allocation4 + $0x1], 1 }

</bundles_post_ra>
